<compile_context>
chip_gen: v6e
topology: v6e:2x2x1
jax: 0.10.0
libtpu: 0.0.40
codegen_flags: <defaults>
</compile_context>

<pallas_src>
import functools

import jax
import jax.numpy as jnp
from jax.experimental import pallas as pl
from jax.experimental.pallas import tpu as pltpu


# =============================================================================
# Fused conv stage (one image per grid step)
# =============================================================================
def _conv_kernel(x_ref, w1_ref, b1_ref, w2_ref, b2_ref, o_ref, y1_ref,
                 *, H, W, C0, C1, C2):
    H2, W2 = H // 2, W // 2

    def conv3x3_relu(pad_ref, w_ref, b_ref, hh, ww, cin, cout):
        # 9 accumulated (hh*ww, cin) @ (cin, cout) matmuls on shifted windows
        # of the padded activation (no im2col scratch / masked col stores).
        acc = jnp.zeros((hh * ww, cout), jnp.float32)
        for kh in range(3):
            for kw in range(3):
                t = kh * 3 + kw
                patch = pad_ref[kh:kh + hh, kw:kw + ww, :].reshape(hh * ww, cin)
                acc = acc + jnp.dot(patch, w_ref[t],
                                    preferred_element_type=jnp.float32)
        return jnp.maximum(acc + b_ref[...], 0.0)

    def maxpool2x2(a, hh, ww, c):
        # a: (hh*ww, c), rows ordered (h, w) -> ((hh//2)*(ww//2), c)
        a = a.reshape(hh * (ww // 2), 2, c)
        a = jnp.maximum(a[:, 0, :], a[:, 1, :])            # pool along W
        a = a.reshape(hh // 2, 2, ww // 2, c)
        a = jnp.maximum(a[:, 0], a[:, 1])                  # pool along H
        return a.reshape((hh // 2) * (ww // 2), c)

    def fill_padded(pad_ref, interior, hh, ww, cin):
        # zero only the 4 halo strips, then write the interior once
        row0 = jnp.zeros((1, ww + 2, cin), jnp.float32)
        col0 = jnp.zeros((hh + 2, 1, cin), jnp.float32)
        pad_ref[0:1, :, :] = row0
        pad_ref[hh + 1:hh + 2, :, :] = row0
        pad_ref[:, 0:1, :] = col0
        pad_ref[:, ww + 1:ww + 2, :] = col0
        pad_ref[1:hh + 1, 1:ww + 1, :] = interior

    # ---- stage 1: conv1 + ReLU + pool (scoped pad scratch) ---------------
    def stage1(pad1):
        fill_padded(pad1, x_ref[0], H, W, C0)
        a1 = conv3x3_relu(pad1, w1_ref, b1_ref, H, W, C0, C1)
        y1_ref[...] = maxpool2x2(a1, H, W, C1)             # (H2*W2, C1)

    pl.run_scoped(stage1, pltpu.VMEM((H + 2, W + 2, C0), jnp.float32))

    # ---- stage 2: conv2 + ReLU + pool (scratch offset reused) ------------
    def stage2(pad2):
        fill_padded(pad2, y1_ref[...].reshape(H2, W2, C1), H2, W2, C1)
        a2 = conv3x3_relu(pad2, w2_ref, b2_ref, H2, W2, C1, C2)
        y2 = maxpool2x2(a2, H2, W2, C2)                    # (H4*W4, C2)
        # NCHW-order flatten: per-channel slabs, lane-dense at real sizes.
        o_ref[0] = jnp.transpose(y2).astype(o_ref.dtype)   # (C2, H4*W4)

    pl.run_scoped(stage2, pltpu.VMEM((H2 + 2, W2 + 2, C1), jnp.float32))


def conv_stage(x_nhwc, w1, b1, w2, b2):
    B, H, W, C0 = x_nhwc.shape
    C1, C2 = w1.shape[-1], w2.shape[-1]
    assert H % 4 == 0 and W % 4 == 0, "spatial dims must be divisible by 4"
    H2, W2, H4, W4 = H // 2, W // 2, H // 4, W // 4
    hw4 = H4 * W4

    kern = functools.partial(_conv_kernel, H=H, W=W, C0=C0, C1=C1, C2=C2)
    return pl.pallas_call(
        kern,
        out_shape=jax.ShapeDtypeStruct((B, C2, hw4), jnp.bfloat16),
        grid=(B,),
        in_specs=[
            pl.BlockSpec((1, H, W, C0), lambda b: (b, 0, 0, 0)),
            pl.BlockSpec((9, C0, C1), lambda b: (0, 0, 0)),   # conv1 weights
            pl.BlockSpec((1, C1), lambda b: (0, 0)),          # conv1 bias
            pl.BlockSpec((9, C1, C2), lambda b: (0, 0, 0)),   # conv2 weights
            pl.BlockSpec((1, C2), lambda b: (0, 0)),          # conv2 bias
        ],
        out_specs=pl.BlockSpec((1, C2, hw4), lambda b: (b, 0, 0)),
        scratch_shapes=[pltpu.VMEM((H2 * W2, C1), jnp.float32)],  # pooled y1
        compiler_params=pltpu.CompilerParams(
            dimension_semantics=("parallel",),
            vmem_limit_bytes=32 * 1024 * 1024),
    )(x_nhwc,
      w1.reshape(9, C0, C1), b1.reshape(1, C1),
      w2.reshape(9, C1, C2), b2.reshape(1, C2))


# =============================================================================
# Tiled Linear: y = x @ w + b with pre-blocked bf16 weights, f32 accumulation
# =============================================================================
def _round_up(v, m):
    return ((v + m - 1) // m) * m


def _largest_divisor_tile(dim, cap):
    """Largest multiple of 128 dividing `dim` (a multiple of 128), <= cap."""
    t = max(128, (min(dim, cap) // 128) * 128)
    while dim % t:
        t -= 128
    return t


def plan_linear(K, N, *, tk_cap=4096, tn_cap=512):
    """Tile plan. tn <= N/2 keeps the 'parallel' N axis >= 2 steps (v7x
    megacore); big tk makes each weight-tile DMA dominate per-step overhead.
    On v5e/v6e (128 MiB VMEM, single TC) tn_cap may be raised to full N."""
    K_pad, N_pad = _round_up(K, 128), _round_up(N, 128)
    tk = _largest_divisor_tile(K_pad, tk_cap)
    tn_lim = min(tn_cap, N_pad // 2) if N_pad >= 256 else N_pad
    tn = _largest_divisor_tile(N_pad, tn_lim)
    # keep double-buffered bf16 weight tiles <= ~24 MB (v7x VMEM budget)
    max_tile_elems = (12 * 1024 * 1024) // 2
    while tk * tn > max_tile_elems and tk > 128:
        tk = _largest_divisor_tile(K_pad, tk - 128)
    return dict(K_pad=K_pad, N_pad=N_pad, tk=tk, tn=tn,
                n_k=K_pad // tk, n_n=N_pad // tn)


def pack_fc_weight(w, plan):
    """(K, N) f32 -> (n_k, n_n, tk, tn) bf16 contiguous tiles (one-time)."""
    K, N = w.shape
    w = jnp.pad(w.astype(jnp.float32),
                ((0, plan["K_pad"] - K), (0, plan["N_pad"] - N)))
    w = w.astype(jnp.bfloat16)
    w = w.reshape(plan["n_k"], plan["tk"], plan["n_n"], plan["tn"])
    return jnp.transpose(w, (0, 2, 1, 3))


def _linear_kernel(x_ref, w_ref, b_ref, o_ref, acc_ref, *, relu, n_k):
    k = pl.program_id(1)

    @pl.when(k == 0)
    def _init():
        acc_ref[...] = jnp.zeros_like(acc_ref)

    acc_ref[...] += jnp.dot(x_ref[...], w_ref[0, 0, :, :],
                            preferred_element_type=jnp.float32)

    @pl.when(k == n_k - 1)
    def _finalize():
        y = acc_ref[...] + b_ref[...]                      # f32 bias add
        if relu:
            y = jnp.maximum(y, 0.0)
        o_ref[...] = y.astype(o_ref.dtype)


def linear_packed(x, w_blocks, b, *, relu, out_dtype):
    B, K = x.shape
    n_k, n_n, tk, tn = w_blocks.shape
    K_pad, N_pad = n_k * tk, n_n * tn
    N = b.shape[0]

    x = x.astype(jnp.bfloat16)                             # cast once (no-op if bf16)
    if K_pad != K:
        x = jnp.pad(x, ((0, 0), (0, K_pad - K)))
    b2 = jnp.pad(b.astype(jnp.float32), ((0, N_pad - N),)).reshape(1, N_pad)

    out = pl.pallas_call(
        functools.partial(_linear_kernel, relu=relu, n_k=n_k),
        out_shape=jax.ShapeDtypeStruct((B, N_pad), out_dtype),
        grid=(n_n, n_k),                                   # K reduction last
        in_specs=[
            pl.BlockSpec((B, tk), lambda n, k: (0, k)),            # activations
            pl.BlockSpec((1, 1, tk, tn), lambda n, k: (k, n, 0, 0)),  # weight tile
            pl.BlockSpec((1, tn), lambda n, k: (0, n)),            # bias
        ],
        out_specs=pl.BlockSpec((B, tn), lambda n, k: (0, n)),
        scratch_shapes=[pltpu.VMEM((B, tn), jnp.float32)],
        compiler_params=pltpu.CompilerParams(
            dimension_semantics=("parallel", "arbitrary"),
            vmem_limit_bytes=48 * 1024 * 1024),
    )(x, w_blocks, b2)
    return out[:, :N]


# =============================================================================
# Parameters & full forward pass
# =============================================================================
def init_params(key, H, W, num_keypoints=17, output_length=50, hidden=1024):
    # Deterministic synthetic f32 parameters (PyTorch-like uniform fan-in).
    # TODO(synk): the original module hard-codes fc1 in_features = 32*1024*10
    # (a specific input resolution); here it adapts to 32*(H/4)*(W/4) so the
    # model is runnable at small test shapes.
    ks = jax.random.split(key, 8)
    feat = 32 * (H // 4) * (W // 4)

    def u(k, shape, fan_in):
        bound = 1.0 / float(fan_in) ** 0.5
        return jax.random.uniform(k, shape, jnp.float32, -bound, bound)

    return {
        "w_conv1": u(ks[0], (3, 3, 3, 16), 3 * 9),
        "b_conv1": u(ks[1], (16,), 3 * 9),
        "w_conv2": u(ks[2], (3, 3, 16, 32), 16 * 9),
        "b_conv2": u(ks[3], (32,), 16 * 9),
        "w_fc1":   u(ks[4], (feat, hidden), feat),
        "b_fc1":   u(ks[5], (hidden,), feat),
        "w_fc2":   u(ks[6], (hidden, num_keypoints * output_length), hidden),
        "b_fc2":   u(ks[7], (num_keypoints * output_length,), hidden),
    }


def prepare_params(params, *, tk_cap=4096, tn_cap=512):
    """One-time packing of FC weights into contiguous bf16 HBM tiles."""
    plan1 = plan_linear(*params["w_fc1"].shape, tk_cap=tk_cap, tn_cap=tn_cap)
    plan2 = plan_linear(*params["w_fc2"].shape, tk_cap=tk_cap, tn_cap=tn_cap)
    return {
        "w_conv1": params["w_conv1"], "b_conv1": params["b_conv1"],
        "w_conv2": params["w_conv2"], "b_conv2": params["b_conv2"],
        "w_fc1": pack_fc_weight(params["w_fc1"], plan1),
        "b_fc1": params["b_fc1"],
        "w_fc2": pack_fc_weight(params["w_fc2"], plan2),
        "b_fc2": params["b_fc2"],
    }


def pose_keypoint_dct_forward(x_nchw, packed, num_keypoints=17,
                              output_length=50):
    B = x_nchw.shape[0]
    x = jnp.transpose(x_nchw, (0, 2, 3, 1))                # NCHW -> NHWC
    # conv stage emits the NCHW-flattened feature as (B, C2, H4*W4) bf16
    f = conv_stage(x, packed["w_conv1"], packed["b_conv1"],
                   packed["w_conv2"], packed["b_conv2"])
    f = f.reshape(B, -1)                                   # free row-major collapse
    z = linear_packed(f, packed["w_fc1"], packed["b_fc1"],
                      relu=True, out_dtype=jnp.bfloat16)
    y = linear_packed(z, packed["w_fc2"], packed["b_fc2"],
                      relu=False, out_dtype=jnp.float32)
    return y.reshape(B, num_keypoints, output_length)


# Pure-JAX reference mirroring the kernel numerics (f32 conv, bf16 FC weights
# and activations, f32 accumulation / bias / ReLU).
def _reference_forward(x_nchw, params, num_keypoints=17, output_length=50):
    hi = jax.lax.Precision.HIGHEST

    def conv(x, w, b):
        y = jax.lax.conv_general_dilated(
            x, w, window_strides=(1, 1), padding="SAME",
            dimension_numbers=("NHWC", "HWIO", "NHWC"), precision=hi)
        return jax.nn.relu(y + b)

    def pool(x):
        b, h, w, c = x.shape
        return x.reshape(b, h // 2, 2, w // 2, 2, c).max(axis=(2, 4))

    x = jnp.transpose(x_nchw, (0, 2, 3, 1))
    h = pool(conv(x, params["w_conv1"], params["b_conv1"]))
    h = pool(conv(h, params["w_conv2"], params["b_conv2"]))
    B = h.shape[0]
    f = jnp.transpose(h, (0, 3, 1, 2)).reshape(B, -1)      # NCHW flatten

    def fc(a, w, b, relu, out_dtype):
        y = jnp.dot(a.astype(jnp.bfloat16), w.astype(jnp.bfloat16),
                    preferred_element_type=jnp.float32) + b
        if relu:
            y = jnp.maximum(y, 0.0)
        return y.astype(out_dtype)

    z = fc(f, params["w_fc1"], params["b_fc1"], True, jnp.bfloat16)
    o = fc(z, params["w_fc2"], params["b_fc2"], False, jnp.float32)
    return o.reshape(B, num_keypoints, output_length)


if __name__ == "__main__":
    key = jax.random.PRNGKey(0)
    kx, kp = jax.random.split(key)

    B, C, H, W = 2, 3, 16, 16                              # small NCHW input
    x = jax.random.normal(kx, (B, C, H, W), jnp.float32)
    params = init_params(kp, H, W)
    packed = prepare_params(params)

    fwd = jax.jit(pose_keypoint_dct_forward)
    out = jax.block_until_ready(fwd(x, packed))

    assert out.shape == (B, 17, 50), out.shape
    assert out.dtype == jnp.float32, out.dtype

    ref = _reference_forward(x, params)
    err = float(jnp.max(jnp.abs(out - ref)))
    assert jnp.allclose(out, ref, rtol=5e-2, atol=5e-3), f"max abs err = {err}"

    print("KERNEL_OK")
</pallas_src>

<mosaic_0001>
module attributes {stable_mosaic.version = 11 : i64} {
  func.func @_linear_kernel(%arg0: i32, %arg1: i32, %arg2: memref<2x512xbf16, #tpu.memory_space<vmem>>, %arg3: memref<1x1x512x512xbf16, #tpu.memory_space<vmem>>, %arg4: memref<1x512xf32, #tpu.memory_space<vmem>>, %arg5: memref<2x512xbf16, #tpu.memory_space<vmem>>, %arg6: memref<2x512xf32, #tpu.memory_space<vmem>>) attributes {dimension_semantics = [#tpu.dimension_semantics<parallel>, #tpu.dimension_semantics<arbitrary>], iteration_bounds = array<i64: 2, 1>, scalar_prefetch = 0 : i64, scratch_operands = 1 : i64, tpu.core_type = #tpu.core_type<tc>, window_params = [{transform_indices = @transform_0, window_bounds = array<i64: 2, 512>}, {transform_indices = @transform_1, window_bounds = array<i64: 1, 1, 512, 512>}, {transform_indices = @transform_2, window_bounds = array<i64: 1, 512>}, {transform_indices = @transform_3, window_bounds = array<i64: 2, 512>}]} {
    %c0_i32 = arith.constant 0 : i32
    %0 = arith.cmpi eq, %arg1, %c0_i32 : i32
    %1 = arith.extui %0 : i1 to i32
    %c0_i32_0 = arith.constant 0 : i32
    %2 = arith.cmpi ne, %1, %c0_i32_0 : i32
    scf.if %2 {
      %cst_12 = arith.constant 0.000000e+00 : f32
      %13 = vector.broadcast %cst_12 : f32 to vector<2x512xf32>
      %c0_13 = arith.constant 0 : index
      %c0_14 = arith.constant 0 : index
      %14 = vector.load %arg6[%c0_13, %c0_14] : memref<2x512xf32, #tpu.memory_space<vmem>>, vector<2x512xf32>
      tpu.vector_store %arg6[%c0_13, %c0_14], %13 {strides = array<i32>} : memref<2x512xf32, #tpu.memory_space<vmem>>, vector<2x512xf32>,
    } else {
    }
    %c0 = arith.constant 0 : index
    %c0_1 = arith.constant 0 : index
    %3 = vector.load %arg6[%c0, %c0_1] : memref<2x512xf32, #tpu.memory_space<vmem>>, vector<2x512xf32>
    %c0_2 = arith.constant 0 : index
    %c0_3 = arith.constant 0 : index
    %4 = vector.load %arg2[%c0_2, %c0_3] : memref<2x512xbf16, #tpu.memory_space<vmem>>, vector<2x512xbf16>
    %c0_4 = arith.constant 0 : index
    %c0_5 = arith.constant 0 : index
    %c0_6 = arith.constant 0 : index
    %c0_7 = arith.constant 0 : index
    %5 = vector.load %arg3[%c0_4, %c0_5, %c0_6, %c0_7] : memref<1x1x512x512xbf16, #tpu.memory_space<vmem>>, vector<1x1x512x512xbf16>
    %6 = vector.shape_cast %5 : vector<1x1x512x512xbf16> to vector<512x512xbf16>
    %cst = arith.constant dense<0.000000e+00> : vector<2x512xf32>
    %7 = tpu.matmul %4, %6, %cst {dimension_numbers = #tpu.dot_dimension_numbers<[1], [0], [0], [1], [0, 0, 1, 1], [], []>} : vector<2x512xbf16>, vector<512x512xbf16>, vector<2x512xf32> -> vector<2x512xf32>
    %8 = arith.addf %3, %7 : vector<2x512xf32>
    %c0_8 = arith.constant 0 : index
    %c0_9 = arith.constant 0 : index
    %9 = vector.load %arg6[%c0_8, %c0_9] : memref<2x512xf32, #tpu.memory_space<vmem>>, vector<2x512xf32>
    tpu.vector_store %arg6[%c0_8, %c0_9], %8 {strides = array<i32>} : memref<2x512xf32, #tpu.memory_space<vmem>>, vector<2x512xf32>,
    %c0_i32_10 = arith.constant 0 : i32
    %10 = arith.cmpi eq, %arg1, %c0_i32_10 : i32
    %11 = arith.extui %10 : i1 to i32
    %c0_i32_11 = arith.constant 0 : i32
    %12 = arith.cmpi ne, %11, %c0_i32_11 : i32
    scf.if %12 {
      %c0_12 = arith.constant 0 : index
      %c0_13 = arith.constant 0 : index
      %13 = vector.load %arg6[%c0_12, %c0_13] : memref<2x512xf32, #tpu.memory_space<vmem>>, vector<2x512xf32>
      %c0_14 = arith.constant 0 : index
      %c0_15 = arith.constant 0 : index
      %14 = vector.load %arg4[%c0_14, %c0_15] : memref<1x512xf32, #tpu.memory_space<vmem>>, vector<1x512xf32>
      %15 = vector.broadcast %14 : vector<1x512xf32> to vector<2x512xf32>
      %16 = arith.addf %13, %15 : vector<2x512xf32>
      %cst_16 = arith.constant 0.000000e+00 : f32
      %17 = vector.broadcast %cst_16 : f32 to vector<2x512xf32>
      %18 = arith.maximumf %16, %17 : vector<2x512xf32>
      %19 = arith.truncf %18 : vector<2x512xf32> to vector<2x512xbf16>
      %c0_17 = arith.constant 0 : index
      %c0_18 = arith.constant 0 : index
      %20 = vector.load %arg5[%c0_17, %c0_18] : memref<2x512xbf16, #tpu.memory_space<vmem>>, vector<2x512xbf16>
      tpu.vector_store %arg5[%c0_17, %c0_18], %19 {strides = array<i32>} : memref<2x512xbf16, #tpu.memory_space<vmem>>, vector<2x512xbf16>,
    } else {
    }
    return
  }
  func.func @transform_0(%arg0: i32, %arg1: i32) -> (i32, i32) {
    %c0_i32 = arith.constant 0 : i32
    %c0_i32_0 = arith.constant 0 : i32
    return %c0_i32, %arg1 : i32, i32
  }
  func.func @transform_1(%arg0: i32, %arg1: i32) -> (i32, i32, i32, i32) {
    %c0_i32 = arith.constant 0 : i32
    %c0_i32_0 = arith.constant 0 : i32
    %c0_i32_1 = arith.constant 0 : i32
    return %arg1, %arg0, %c0_i32, %c0_i32_0 : i32, i32, i32, i32
  }
  func.func @transform_2(%arg0: i32, %arg1: i32) -> (i32, i32) {
    %c0_i32 = arith.constant 0 : i32
    %c0_i32_0 = arith.constant 0 : i32
    return %c0_i32, %arg0 : i32, i32
  }
  func.func @transform_3(%arg0: i32, %arg1: i32) -> (i32, i32) {
    %c0_i32 = arith.constant 0 : i32
    %c0_i32_0 = arith.constant 0 : i32
    return %c0_i32, %arg0 : i32, i32
  }
}

module attributes {stable_mosaic.version = 11 : i64} {
  func.func @_conv_kernel(%arg0: i32, %arg1: memref<1x16x16x3xf32, #tpu.memory_space<vmem>>, %arg2: memref<9x3x16xf32, #tpu.memory_space<vmem>>, %arg3: memref<1x16xf32, #tpu.memory_space<vmem>>, %arg4: memref<9x16x32xf32, #tpu.memory_space<vmem>>, %arg5: memref<1x32xf32, #tpu.memory_space<vmem>>, %arg6: memref<1x32x16xbf16, #tpu.memory_space<vmem>>, %arg7: memref<64x16xf32, #tpu.memory_space<vmem>>) attributes {dimension_semantics = [#tpu.dimension_semantics<parallel>], iteration_bounds = array<i64: 2>, scalar_prefetch = 0 : i64, scratch_operands = 1 : i64, tpu.core_type = #tpu.core_type<tc>, window_params = [{transform_indices = @transform_0, window_bounds = array<i64: 1, 16, 16, 3>}, {pipeline_mode = #tpu.pipeline_mode<synchronous>, transform_indices = @transform_1, window_bounds = array<i64: 9, 3, 16>}, {pipeline_mode = #tpu.pipeline_mode<synchronous>, transform_indices = @transform_2, window_bounds = array<i64: 1, 16>}, {pipeline_mode = #tpu.pipeline_mode<synchronous>, transform_indices = @transform_3, window_bounds = array<i64: 9, 16, 32>}, {pipeline_mode = #tpu.pipeline_mode<synchronous>, transform_indices = @transform_4, window_bounds = array<i64: 1, 32>}, {transform_indices = @transform_5, window_bounds = array<i64: 1, 32, 16>}]} {
    "tpu.region"() ({
      %alloca = memref.alloca() : memref<18x18x3xf32, #tpu.memory_space<vmem>>
      %c0 = arith.constant 0 : index
      %c0_0 = arith.constant 0 : index
      %c0_1 = arith.constant 0 : index
      %c0_2 = arith.constant 0 : index
      %0 = vector.load %arg1[%c0, %c0_0, %c0_1, %c0_2] : memref<1x16x16x3xf32, #tpu.memory_space<vmem>>, vector<1x16x16x3xf32>
      %1 = vector.shape_cast %0 : vector<1x16x16x3xf32> to vector<16x16x3xf32>
      %cst = arith.constant 0.000000e+00 : f32
      %2 = vector.broadcast %cst : f32 to vector<1x18x3xf32>
      %cst_3 = arith.constant 0.000000e+00 : f32
      %3 = vector.broadcast %cst_3 : f32 to vector<18x1x3xf32>
      %c0_4 = arith.constant 0 : index
      %c0_5 = arith.constant 0 : index
      %c0_6 = arith.constant 0 : index
      %4 = vector.load %alloca[%c0_4, %c0_5, %c0_6] : memref<18x18x3xf32, #tpu.memory_space<vmem>>, vector<1x18x3xf32>
      tpu.vector_store %alloca[%c0_4, %c0_5, %c0_6], %2 {strides = array<i32>} : memref<18x18x3xf32, #tpu.memory_space<vmem>>, vector<1x18x3xf32>,
      %c17 = arith.constant 17 : index
      %c0_7 = arith.constant 0 : index
      %c0_8 = arith.constant 0 : index
      %5 = vector.load %alloca[%c17, %c0_7, %c0_8] : memref<18x18x3xf32, #tpu.memory_space<vmem>>, vector<1x18x3xf32>
      tpu.vector_store %alloca[%c17, %c0_7, %c0_8], %2 {strides = array<i32>} : memref<18x18x3xf32, #tpu.memory_space<vmem>>, vector<1x18x3xf32>,
      %c0_9 = arith.constant 0 : index
      %c0_10 = arith.constant 0 : index
      %c0_11 = arith.constant 0 : index
      %6 = vector.load %alloca[%c0_9, %c0_10, %c0_11] : memref<18x18x3xf32, #tpu.memory_space<vmem>>, vector<18x1x3xf32>
      tpu.vector_store %alloca[%c0_9, %c0_10, %c0_11], %3 {strides = array<i32>} : memref<18x18x3xf32, #tpu.memory_space<vmem>>, vector<18x1x3xf32>,
      %c0_12 = arith.constant 0 : index
      %c17_13 = arith.constant 17 : index
      %c0_14 = arith.constant 0 : index
      %7 = vector.load %alloca[%c0_12, %c17_13, %c0_14] : memref<18x18x3xf32, #tpu.memory_space<vmem>>, vector<18x1x3xf32>
      tpu.vector_store %alloca[%c0_12, %c17_13, %c0_14], %3 {strides = array<i32>} : memref<18x18x3xf32, #tpu.memory_space<vmem>>, vector<18x1x3xf32>,
      %c1 = arith.constant 1 : index
      %c1_15 = arith.constant 1 : index
      %c0_16 = arith.constant 0 : index
      %8 = vector.load %alloca[%c1, %c1_15, %c0_16] : memref<18x18x3xf32, #tpu.memory_space<vmem>>, vector<16x16x3xf32>
      tpu.vector_store %alloca[%c1, %c1_15, %c0_16], %1 {strides = array<i32>} : memref<18x18x3xf32, #tpu.memory_space<vmem>>, vector<16x16x3xf32>,
      %cst_17 = arith.constant 0.000000e+00 : f32
      %9 = vector.broadcast %cst_17 : f32 to vector<256x16xf32>
      %c0_18 = arith.constant 0 : index
      %c0_19 = arith.constant 0 : index
      %c0_20 = arith.constant 0 : index
      %10 = vector.load %alloca[%c0_18, %c0_19, %c0_20] : memref<18x18x3xf32, #tpu.memory_space<vmem>>, vector<16x16x3xf32>
      %11 = vector.shape_cast %10 : vector<16x16x3xf32> to vector<256x3xf32>
      %c0_21 = arith.constant 0 : index
      %c0_22 = arith.constant 0 : index
      %c0_23 = arith.constant 0 : index
      %12 = vector.load %arg2[%c0_21, %c0_22, %c0_23] : memref<9x3x16xf32, #tpu.memory_space<vmem>>, vector<1x3x16xf32>
      %13 = vector.shape_cast %12 : vector<1x3x16xf32> to vector<3x16xf32>
      %cst_24 = arith.constant dense<0.000000e+00> : vector<256x16xf32>
      %14 = tpu.matmul %11, %13, %cst_24 {dimension_numbers = #tpu.dot_dimension_numbers<[1], [0], [0], [1], [0, 0, 1, 1], [], []>} : vector<256x3xf32>, vector<3x16xf32>, vector<256x16xf32> -> vector<256x16xf32>
      %15 = arith.addf %9, %14 : vector<256x16xf32>
      %c0_25 = arith.constant 0 : index
      %c1_26 = arith.constant 1 : index
      %c0_27 = arith.constant 0 : index
      %16 = vector.load %alloca[%c0_25, %c1_26, %c0_27] : memref<18x18x3xf32, #tpu.memory_space<vmem>>, vector<16x16x3xf32>
      %17 = vector.shape_cast %16 : vector<16x16x3xf32> to vector<256x3xf32>
      %c1_28 = arith.constant 1 : index
      %c0_29 = arith.constant 0 : index
      %c0_30 = arith.constant 0 : index
      %18 = vector.load %arg2[%c1_28, %c0_29, %c0_30] : memref<9x3x16xf32, #tpu.memory_space<vmem>>, vector<1x3x16xf32>
      %19 = vector.shape_cast %18 : vector<1x3x16xf32> to vector<3x16xf32>
      %cst_31 = arith.constant dense<0.000000e+00> : vector<256x16xf32>
      %20 = tpu.matmul %17, %19, %cst_31 {dimension_numbers = #tpu.dot_dimension_numbers<[1], [0], [0], [1], [0, 0, 1, 1], [], []>} : vector<256x3xf32>, vector<3x16xf32>, vector<256x16xf32> -> vector<256x16xf32>
      %21 = arith.addf %15, %20 : vector<256x16xf32>
      %c0_32 = arith.constant 0 : index
      %c2 = arith.constant 2 : index
      %c0_33 = arith.constant 0 : index
      %22 = vector.load %alloca[%c0_32, %c2, %c0_33] : memref<18x18x3xf32, #tpu.memory_space<vmem>>, vector<16x16x3xf32>
      %23 = vector.shape_cast %22 : vector<16x16x3xf32> to vector<256x3xf32>
      %c2_34 = arith.constant 2 : index
      %c0_35 = arith.constant 0 : index
      %c0_36 = arith.constant 0 : index
      %24 = vector.load %arg2[%c2_34, %c0_35, %c0_36] : memref<9x3x16xf32, #tpu.memory_space<vmem>>, vector<1x3x16xf32>
      %25 = vector.shape_cast %24 : vector<1x3x16xf32> to vector<3x16xf32>
      %cst_37 = arith.constant dense<0.000000e+00> : vector<256x16xf32>
      %26 = tpu.matmul %23, %25, %cst_37 {dimension_numbers = #tpu.dot_dimension_numbers<[1], [0], [0], [1], [0, 0, 1, 1], [], []>} : vector<256x3xf32>, vector<3x16xf32>, vector<256x16xf32> -> vector<256x16xf32>
      %27 = arith.addf %21, %26 : vector<256x16xf32>
      %c1_38 = arith.constant 1 : index
      %c0_39 = arith.constant 0 : index
      %c0_40 = arith.constant 0 : index
      %28 = vector.load %alloca[%c1_38, %c0_39, %c0_40] : memref<18x18x3xf32, #tpu.memory_space<vmem>>, vector<16x16x3xf32>
      %29 = vector.shape_cast %28 : vector<16x16x3xf32> to vector<256x3xf32>
      %c3 = arith.constant 3 : index
      %c0_41 = arith.constant 0 : index
      %c0_42 = arith.constant 0 : index
      %30 = vector.load %arg2[%c3, %c0_41, %c0_42] : memref<9x3x16xf32, #tpu.memory_space<vmem>>, vector<1x3x16xf32>
      %31 = vector.shape_cast %30 : vector<1x3x16xf32> to vector<3x16xf32>
      %cst_43 = arith.constant dense<0.000000e+00> : vector<256x16xf32>
      %32 = tpu.matmul %29, %31, %cst_43 {dimension_numbers = #tpu.dot_dimension_numbers<[1], [0], [0], [1], [0, 0, 1, 1], [], []>} : vector<256x3xf32>, vector<3x16xf32>, vector<256x16xf32> -> vector<256x16xf32>
      %33 = arith.addf %27, %32 : vector<256x16xf32>
      %c1_44 = arith.constant 1 : index
      %c1_45 = arith.constant 1 : index
      %c0_46 = arith.constant 0 : index
      %34 = vector.load %alloca[%c1_44, %c1_45, %c0_46] : memref<18x18x3xf32, #tpu.memory_space<vmem>>, vector<16x16x3xf32>
      %35 = vector.shape_cast %34 : vector<16x16x3xf32> to vector<256x3xf32>
      %c4 = arith.constant 4 : index
      %c0_47 = arith.constant 0 : index
      %c0_48 = arith.constant 0 : index
      %36 = vector.load %arg2[%c4, %c0_47, %c0_48] : memref<9x3x16xf32, #tpu.memory_space<vmem>>, vector<1x3x16xf32>
      %37 = vector.shape_cast %36 : vector<1x3x16xf32> to vector<3x16xf32>
      %cst_49 = arith.constant dense<0.000000e+00> : vector<256x16xf32>
      %38 = tpu.matmul %35, %37, %cst_49 {dimension_numbers = #tpu.dot_dimension_numbers<[1], [0], [0], [1], [0, 0, 1, 1], [], []>} : vector<256x3xf32>, vector<3x16xf32>, vector<256x16xf32> -> vector<256x16xf32>
      %39 = arith.addf %33, %38 : vector<256x16xf32>
      %c1_50 = arith.constant 1 : index
      %c2_51 = arith.constant 2 : index
      %c0_52 = arith.constant 0 : index
      %40 = vector.load %alloca[%c1_50, %c2_51, %c0_52] : memref<18x18x3xf32, #tpu.memory_space<vmem>>, vector<16x16x3xf32>
      %41 = vector.shape_cast %40 : vector<16x16x3xf32> to vector<256x3xf32>
      %c5 = arith.constant 5 : index
      %c0_53 = arith.constant 0 : index
      %c0_54 = arith.constant 0 : index
      %42 = vector.load %arg2[%c5, %c0_53, %c0_54] : memref<9x3x16xf32, #tpu.memory_space<vmem>>, vector<1x3x16xf32>
      %43 = vector.shape_cast %42 : vector<1x3x16xf32> to vector<3x16xf32>
      %cst_55 = arith.constant dense<0.000000e+00> : vector<256x16xf32>
      %44 = tpu.matmul %41, %43, %cst_55 {dimension_numbers = #tpu.dot_dimension_numbers<[1], [0], [0], [1], [0, 0, 1, 1], [], []>} : vector<256x3xf32>, vector<3x16xf32>, vector<256x16xf32> -> vector<256x16xf32>
      %45 = arith.addf %39, %44 : vector<256x16xf32>
      %c2_56 = arith.constant 2 : index
      %c0_57 = arith.constant 0 : index
      %c0_58 = arith.constant 0 : index
      %46 = vector.load %alloca[%c2_56, %c0_57, %c0_58] : memref<18x18x3xf32, #tpu.memory_space<vmem>>, vector<16x16x3xf32>
      %47 = vector.shape_cast %46 : vector<16x16x3xf32> to vector<256x3xf32>
      %c6 = arith.constant 6 : index
      %c0_59 = arith.constant 0 : index
      %c0_60 = arith.constant 0 : index
      %48 = vector.load %arg2[%c6, %c0_59, %c0_60] : memref<9x3x16xf32, #tpu.memory_space<vmem>>, vector<1x3x16xf32>
      %49 = vector.shape_cast %48 : vector<1x3x16xf32> to vector<3x16xf32>
      %cst_61 = arith.constant dense<0.000000e+00> : vector<256x16xf32>
      %50 = tpu.matmul %47, %49, %cst_61 {dimension_numbers = #tpu.dot_dimension_numbers<[1], [0], [0], [1], [0, 0, 1, 1], [], []>} : vector<256x3xf32>, vector<3x16xf32>, vector<256x16xf32> -> vector<256x16xf32>
      %51 = arith.addf %45, %50 : vector<256x16xf32>
      %c2_62 = arith.constant 2 : index
      %c1_63 = arith.constant 1 : index
      %c0_64 = arith.constant 0 : index
      %52 = vector.load %alloca[%c2_62, %c1_63, %c0_64] : memref<18x18x3xf32, #tpu.memory_space<vmem>>, vector<16x16x3xf32>
      %53 = vector.shape_cast %52 : vector<16x16x3xf32> to vector<256x3xf32>
      %c7 = arith.constant 7 : index
      %c0_65 = arith.constant 0 : index
      %c0_66 = arith.constant 0 : index
      %54 = vector.load %arg2[%c7, %c0_65, %c0_66] : memref<9x3x16xf32, #tpu.memory_space<vmem>>, vector<1x3x16xf32>
      %55 = vector.shape_cast %54 : vector<1x3x16xf32> to vector<3x16xf32>
      %cst_67 = arith.constant dense<0.000000e+00> : vector<256x16xf32>
      %56 = tpu.matmul %53, %55, %cst_67 {dimension_numbers = #tpu.dot_dimension_numbers<[1], [0], [0], [1], [0, 0, 1, 1], [], []>} : vector<256x3xf32>, vector<3x16xf32>, vector<256x16xf32> -> vector<256x16xf32>
      %57 = arith.addf %51, %56 : vector<256x16xf32>
      %c2_68 = arith.constant 2 : index
      %c2_69 = arith.constant 2 : index
      %c0_70 = arith.constant 0 : index
      %58 = vector.load %alloca[%c2_68, %c2_69, %c0_70] : memref<18x18x3xf32, #tpu.memory_space<vmem>>, vector<16x16x3xf32>
      %59 = vector.shape_cast %58 : vector<16x16x3xf32> to vector<256x3xf32>
      %c8 = arith.constant 8 : index
      %c0_71 = arith.constant 0 : index
      %c0_72 = arith.constant 0 : index
      %60 = vector.load %arg2[%c8, %c0_71, %c0_72] : memref<9x3x16xf32, #tpu.memory_space<vmem>>, vector<1x3x16xf32>
      %61 = vector.shape_cast %60 : vector<1x3x16xf32> to vector<3x16xf32>
      %cst_73 = arith.constant dense<0.000000e+00> : vector<256x16xf32>
      %62 = tpu.matmul %59, %61, %cst_73 {dimension_numbers = #tpu.dot_dimension_numbers<[1], [0], [0], [1], [0, 0, 1, 1], [], []>} : vector<256x3xf32>, vector<3x16xf32>, vector<256x16xf32> -> vector<256x16xf32>
      %63 = arith.addf %57, %62 : vector<256x16xf32>
      %c0_74 = arith.constant 0 : index
      %c0_75 = arith.constant 0 : index
      %64 = vector.load %arg3[%c0_74, %c0_75] : memref<1x16xf32, #tpu.memory_space<vmem>>, vector<1x16xf32>
      %65 = vector.broadcast %64 : vector<1x16xf32> to vector<256x16xf32>
      %66 = arith.addf %63, %65 : vector<256x16xf32>
      %cst_76 = arith.constant 0.000000e+00 : f32
      %67 = vector.broadcast %cst_76 : f32 to vector<256x16xf32>
      %68 = arith.maximumf %66, %67 : vector<256x16xf32>
      %69 = vector.shape_cast %68 : vector<256x16xf32> to vector<128x2x16xf32>
      %70 = vector.extract_strided_slice %69 {offsets = [0, 0, 0], sizes = [128, 1, 16], strides = [1, 1, 1]} : vector<128x2x16xf32> to vector<128x1x16xf32>
      %71 = vector.shape_cast %70 : vector<128x1x16xf32> to vector<128x16xf32>
      %72 = vector.extract_strided_slice %69 {offsets = [0, 1, 0], sizes = [128, 1, 16], strides = [1, 1, 1]} : vector<128x2x16xf32> to vector<128x1x16xf32>
      %73 = vector.shape_cast %72 : vector<128x1x16xf32> to vector<128x16xf32>
      %74 = arith.maximumf %71, %73 : vector<128x16xf32>
      %75 = vector.shape_cast %74 : vector<128x16xf32> to vector<8x2x8x16xf32>
      %76 = vector.extract_strided_slice %75 {offsets = [0, 0, 0, 0], sizes = [8, 1, 8, 16], strides = [1, 1, 1, 1]} : vector<8x2x8x16xf32> to vector<8x1x8x16xf32>
      %77 = vector.shape_cast %76 : vector<8x1x8x16xf32> to vector<8x8x16xf32>
      %78 = vector.extract_strided_slice %75 {offsets = [0, 1, 0, 0], sizes = [8, 1, 8, 16], strides = [1, 1, 1, 1]} : vector<8x2x8x16xf32> to vector<8x1x8x16xf32>
      %79 = vector.shape_cast %78 : vector<8x1x8x16xf32> to vector<8x8x16xf32>
      %80 = arith.maximumf %77, %79 : vector<8x8x16xf32>
      %81 = vector.shape_cast %80 : vector<8x8x16xf32> to vector<64x16xf32>
      %c0_77 = arith.constant 0 : index
      %c0_78 = arith.constant 0 : index
      %82 = vector.load %arg7[%c0_77, %c0_78] : memref<64x16xf32, #tpu.memory_space<vmem>>, vector<64x16xf32>
      tpu.vector_store %arg7[%c0_77, %c0_78], %81 {strides = array<i32>} : memref<64x16xf32, #tpu.memory_space<vmem>>, vector<64x16xf32>,
      tpu.yield
    }) : () -> ()
    "tpu.region"() ({
      %alloca = memref.alloca() : memref<10x10x16xf32, #tpu.memory_space<vmem>>
      %c0 = arith.constant 0 : index
      %c0_0 = arith.constant 0 : index
      %0 = vector.load %arg7[%c0, %c0_0] : memref<64x16xf32, #tpu.memory_space<vmem>>, vector<64x16xf32>
      %1 = vector.shape_cast %0 : vector<64x16xf32> to vector<8x8x16xf32>
      %cst = arith.constant 0.000000e+00 : f32
      %2 = vector.broadcast %cst : f32 to vector<1x10x16xf32>
      %cst_1 = arith.constant 0.000000e+00 : f32
      %3 = vector.broadcast %cst_1 : f32 to vector<10x1x16xf32>
      %c0_2 = arith.constant 0 : index
      %c0_3 = arith.constant 0 : index
      %c0_4 = arith.constant 0 : index
      %4 = vector.load %alloca[%c0_2, %c0_3, %c0_4] : memref<10x10x16xf32, #tpu.memory_space<vmem>>, vector<1x10x16xf32>
      tpu.vector_store %alloca[%c0_2, %c0_3, %c0_4], %2 {strides = array<i32>} : memref<10x10x16xf32, #tpu.memory_space<vmem>>, vector<1x10x16xf32>,
      %c9 = arith.constant 9 : index
      %c0_5 = arith.constant 0 : index
      %c0_6 = arith.constant 0 : index
      %5 = vector.load %alloca[%c9, %c0_5, %c0_6] : memref<10x10x16xf32, #tpu.memory_space<vmem>>, vector<1x10x16xf32>
      tpu.vector_store %alloca[%c9, %c0_5, %c0_6], %2 {strides = array<i32>} : memref<10x10x16xf32, #tpu.memory_space<vmem>>, vector<1x10x16xf32>,
      %c0_7 = arith.constant 0 : index
      %c0_8 = arith.constant 0 : index
      %c0_9 = arith.constant 0 : index
      %6 = vector.load %alloca[%c0_7, %c0_8, %c0_9] : memref<10x10x16xf32, #tpu.memory_space<vmem>>, vector<10x1x16xf32>
      tpu.vector_store %alloca[%c0_7, %c0_8, %c0_9], %3 {strides = array<i32>} : memref<10x10x16xf32, #tpu.memory_space<vmem>>, vector<10x1x16xf32>,
      %c0_10 = arith.constant 0 : index
      %c9_11 = arith.constant 9 : index
      %c0_12 = arith.constant 0 : index
      %7 = vector.load %alloca[%c0_10, %c9_11, %c0_12] : memref<10x10x16xf32, #tpu.memory_space<vmem>>, vector<10x1x16xf32>
      tpu.vector_store %alloca[%c0_10, %c9_11, %c0_12], %3 {strides = array<i32>} : memref<10x10x16xf32, #tpu.memory_space<vmem>>, vector<10x1x16xf32>,
      %c1 = arith.constant 1 : index
      %c1_13 = arith.constant 1 : index
      %c0_14 = arith.constant 0 : index
      %8 = vector.load %alloca[%c1, %c1_13, %c0_14] : memref<10x10x16xf32, #tpu.memory_space<vmem>>, vector<8x8x16xf32>
      tpu.vector_store %alloca[%c1, %c1_13, %c0_14], %1 {strides = array<i32>} : memref<10x10x16xf32, #tpu.memory_space<vmem>>, vector<8x8x16xf32>,
      %cst_15 = arith.constant 0.000000e+00 : f32
      %9 = vector.broadcast %cst_15 : f32 to vector<64x32xf32>
      %c0_16 = arith.constant 0 : index
      %c0_17 = arith.constant 0 : index
      %c0_18 = arith.constant 0 : index
      %10 = vector.load %alloca[%c0_16, %c0_17, %c0_18] : memref<10x10x16xf32, #tpu.memory_space<vmem>>, vector<8x8x16xf32>
      %11 = vector.shape_cast %10 : vector<8x8x16xf32> to vector<64x16xf32>
      %c0_19 = arith.constant 0 : index
      %c0_20 = arith.constant 0 : index
      %c0_21 = arith.constant 0 : index
      %12 = vector.load %arg4[%c0_19, %c0_20, %c0_21] : memref<9x16x32xf32, #tpu.memory_space<vmem>>, vector<1x16x32xf32>
      %13 = vector.shape_cast %12 : vector<1x16x32xf32> to vector<16x32xf32>
      %cst_22 = arith.constant dense<0.000000e+00> : vector<64x32xf32>
      %14 = tpu.matmul %11, %13, %cst_22 {dimension_numbers = #tpu.dot_dimension_numbers<[1], [0], [0], [1], [0, 0, 1, 1], [], []>} : vector<64x16xf32>, vector<16x32xf32>, vector<64x32xf32> -> vector<64x32xf32>
      %15 = arith.addf %9, %14 : vector<64x32xf32>
      %c0_23 = arith.constant 0 : index
      %c1_24 = arith.constant 1 : index
      %c0_25 = arith.constant 0 : index
      %16 = vector.load %alloca[%c0_23, %c1_24, %c0_25] : memref<10x10x16xf32, #tpu.memory_space<vmem>>, vector<8x8x16xf32>
      %17 = vector.shape_cast %16 : vector<8x8x16xf32> to vector<64x16xf32>
      %c1_26 = arith.constant 1 : index
      %c0_27 = arith.constant 0 : index
      %c0_28 = arith.constant 0 : index
      %18 = vector.load %arg4[%c1_26, %c0_27, %c0_28] : memref<9x16x32xf32, #tpu.memory_space<vmem>>, vector<1x16x32xf32>
      %19 = vector.shape_cast %18 : vector<1x16x32xf32> to vector<16x32xf32>
      %cst_29 = arith.constant dense<0.000000e+00> : vector<64x32xf32>
      %20 = tpu.matmul %17, %19, %cst_29 {dimension_numbers = #tpu.dot_dimension_numbers<[1], [0], [0], [1], [0, 0, 1, 1], [], []>} : vector<64x16xf32>, vector<16x32xf32>, vector<64x32xf32> -> vector<64x32xf32>
      %21 = arith.addf %15, %20 : vector<64x32xf32>
      %c0_30 = arith.constant 0 : index
      %c2 = arith.constant 2 : index
      %c0_31 = arith.constant 0 : index
      %22 = vector.load %alloca[%c0_30, %c2, %c0_31] : memref<10x10x16xf32, #tpu.memory_space<vmem>>, vector<8x8x16xf32>
      %23 = vector.shape_cast %22 : vector<8x8x16xf32> to vector<64x16xf32>
      %c2_32 = arith.constant 2 : index
      %c0_33 = arith.constant 0 : index
      %c0_34 = arith.constant 0 : index
      %24 = vector.load %arg4[%c2_32, %c0_33, %c0_34] : memref<9x16x32xf32, #tpu.memory_space<vmem>>, vector<1x16x32xf32>
      %25 = vector.shape_cast %24 : vector<1x16x32xf32> to vector<16x32xf32>
      %cst_35 = arith.constant dense<0.000000e+00> : vector<64x32xf32>
      %26 = tpu.matmul %23, %25, %cst_35 {dimension_numbers = #tpu.dot_dimension_numbers<[1], [0], [0], [1], [0, 0, 1, 1], [], []>} : vector<64x16xf32>, vector<16x32xf32>, vector<64x32xf32> -> vector<64x32xf32>
      %27 = arith.addf %21, %26 : vector<64x32xf32>
      %c1_36 = arith.constant 1 : index
      %c0_37 = arith.constant 0 : index
      %c0_38 = arith.constant 0 : index
      %28 = vector.load %alloca[%c1_36, %c0_37, %c0_38] : memref<10x10x16xf32, #tpu.memory_space<vmem>>, vector<8x8x16xf32>
      %29 = vector.shape_cast %28 : vector<8x8x16xf32> to vector<64x16xf32>
      %c3 = arith.constant 3 : index
      %c0_39 = arith.constant 0 : index
      %c0_40 = arith.constant 0 : index
      %30 = vector.load %arg4[%c3, %c0_39, %c0_40] : memref<9x16x32xf32, #tpu.memory_space<vmem>>, vector<1x16x32xf32>
      %31 = vector.shape_cast %30 : vector<1x16x32xf32> to vector<16x32xf32>
      %cst_41 = arith.constant dense<0.000000e+00> : vector<64x32xf32>
      %32 = tpu.matmul %29, %31, %cst_41 {dimension_numbers = #tpu.dot_dimension_numbers<[1], [0], [0], [1], [0, 0, 1, 1], [], []>} : vector<64x16xf32>, vector<16x32xf32>, vector<64x32xf32> -> vector<64x32xf32>
      %33 = arith.addf %27, %32 : vector<64x32xf32>
      %c1_42 = arith.constant 1 : index
      %c1_43 = arith.constant 1 : index
      %c0_44 = arith.constant 0 : index
      %34 = vector.load %alloca[%c1_42, %c1_43, %c0_44] : memref<10x10x16xf32, #tpu.memory_space<vmem>>, vector<8x8x16xf32>
      %35 = vector.shape_cast %34 : vector<8x8x16xf32> to vector<64x16xf32>
      %c4 = arith.constant 4 : index
      %c0_45 = arith.constant 0 : index
      %c0_46 = arith.constant 0 : index
      %36 = vector.load %arg4[%c4, %c0_45, %c0_46] : memref<9x16x32xf32, #tpu.memory_space<vmem>>, vector<1x16x32xf32>
      %37 = vector.shape_cast %36 : vector<1x16x32xf32> to vector<16x32xf32>
      %cst_47 = arith.constant dense<0.000000e+00> : vector<64x32xf32>
      %38 = tpu.matmul %35, %37, %cst_47 {dimension_numbers = #tpu.dot_dimension_numbers<[1], [0], [0], [1], [0, 0, 1, 1], [], []>} : vector<64x16xf32>, vector<16x32xf32>, vector<64x32xf32> -> vector<64x32xf32>
      %39 = arith.addf %33, %38 : vector<64x32xf32>
      %c1_48 = arith.constant 1 : index
      %c2_49 = arith.constant 2 : index
      %c0_50 = arith.constant 0 : index
      %40 = vector.load %alloca[%c1_48, %c2_49, %c0_50] : memref<10x10x16xf32, #tpu.memory_space<vmem>>, vector<8x8x16xf32>
      %41 = vector.shape_cast %40 : vector<8x8x16xf32> to vector<64x16xf32>
      %c5 = arith.constant 5 : index
      %c0_51 = arith.constant 0 : index
      %c0_52 = arith.constant 0 : index
      %42 = vector.load %arg4[%c5, %c0_51, %c0_52] : memref<9x16x32xf32, #tpu.memory_space<vmem>>, vector<1x16x32xf32>
      %43 = vector.shape_cast %42 : vector<1x16x32xf32> to vector<16x32xf32>
      %cst_53 = arith.constant dense<0.000000e+00> : vector<64x32xf32>
      %44 = tpu.matmul %41, %43, %cst_53 {dimension_numbers = #tpu.dot_dimension_numbers<[1], [0], [0], [1], [0, 0, 1, 1], [], []>} : vector<64x16xf32>, vector<16x32xf32>, vector<64x32xf32> -> vector<64x32xf32>
      %45 = arith.addf %39, %44 : vector<64x32xf32>
      %c2_54 = arith.constant 2 : index
      %c0_55 = arith.constant 0 : index
      %c0_56 = arith.constant 0 : index
      %46 = vector.load %alloca[%c2_54, %c0_55, %c0_56] : memref<10x10x16xf32, #tpu.memory_space<vmem>>, vector<8x8x16xf32>
      %47 = vector.shape_cast %46 : vector<8x8x16xf32> to vector<64x16xf32>
      %c6 = arith.constant 6 : index
      %c0_57 = arith.constant 0 : index
      %c0_58 = arith.constant 0 : index
      %48 = vector.load %arg4[%c6, %c0_57, %c0_58] : memref<9x16x32xf32, #tpu.memory_space<vmem>>, vector<1x16x32xf32>
      %49 = vector.shape_cast %48 : vector<1x16x32xf32> to vector<16x32xf32>
      %cst_59 = arith.constant dense<0.000000e+00> : vector<64x32xf32>
      %50 = tpu.matmul %47, %49, %cst_59 {dimension_numbers = #tpu.dot_dimension_numbers<[1], [0], [0], [1], [0, 0, 1, 1], [], []>} : vector<64x16xf32>, vector<16x32xf32>, vector<64x32xf32> -> vector<64x32xf32>
      %51 = arith.addf %45, %50 : vector<64x32xf32>
      %c2_60 = arith.constant 2 : index
      %c1_61 = arith.constant 1 : index
      %c0_62 = arith.constant 0 : index
      %52 = vector.load %alloca[%c2_60, %c1_61, %c0_62] : memref<10x10x16xf32, #tpu.memory_space<vmem>>, vector<8x8x16xf32>
      %53 = vector.shape_cast %52 : vector<8x8x16xf32> to vector<64x16xf32>
      %c7 = arith.constant 7 : index
      %c0_63 = arith.constant 0 : index
      %c0_64 = arith.constant 0 : index
      %54 = vector.load %arg4[%c7, %c0_63, %c0_64] : memref<9x16x32xf32, #tpu.memory_space<vmem>>, vector<1x16x32xf32>
      %55 = vector.shape_cast %54 : vector<1x16x32xf32> to vector<16x32xf32>
      %cst_65 = arith.constant dense<0.000000e+00> : vector<64x32xf32>
      %56 = tpu.matmul %53, %55, %cst_65 {dimension_numbers = #tpu.dot_dimension_numbers<[1], [0], [0], [1], [0, 0, 1, 1], [], []>} : vector<64x16xf32>, vector<16x32xf32>, vector<64x32xf32> -> vector<64x32xf32>
      %57 = arith.addf %51, %56 : vector<64x32xf32>
      %c2_66 = arith.constant 2 : index
      %c2_67 = arith.constant 2 : index
      %c0_68 = arith.constant 0 : index
      %58 = vector.load %alloca[%c2_66, %c2_67, %c0_68] : memref<10x10x16xf32, #tpu.memory_space<vmem>>, vector<8x8x16xf32>
      %59 = vector.shape_cast %58 : vector<8x8x16xf32> to vector<64x16xf32>
      %c8 = arith.constant 8 : index
      %c0_69 = arith.constant 0 : index
      %c0_70 = arith.constant 0 : index
      %60 = vector.load %arg4[%c8, %c0_69, %c0_70] : memref<9x16x32xf32, #tpu.memory_space<vmem>>, vector<1x16x32xf32>
      %61 = vector.shape_cast %60 : vector<1x16x32xf32> to vector<16x32xf32>
      %cst_71 = arith.constant dense<0.000000e+00> : vector<64x32xf32>
      %62 = tpu.matmul %59, %61, %cst_71 {dimension_numbers = #tpu.dot_dimension_numbers<[1], [0], [0], [1], [0, 0, 1, 1], [], []>} : vector<64x16xf32>, vector<16x32xf32>, vector<64x32xf32> -> vector<64x32xf32>
      %63 = arith.addf %57, %62 : vector<64x32xf32>
      %c0_72 = arith.constant 0 : index
      %c0_73 = arith.constant 0 : index
      %64 = vector.load %arg5[%c0_72, %c0_73] : memref<1x32xf32, #tpu.memory_space<vmem>>, vector<1x32xf32>
      %65 = vector.broadcast %64 : vector<1x32xf32> to vector<64x32xf32>
      %66 = arith.addf %63, %65 : vector<64x32xf32>
      %cst_74 = arith.constant 0.000000e+00 : f32
      %67 = vector.broadcast %cst_74 : f32 to vector<64x32xf32>
      %68 = arith.maximumf %66, %67 : vector<64x32xf32>
      %69 = vector.shape_cast %68 : vector<64x32xf32> to vector<32x2x32xf32>
      %70 = vector.extract_strided_slice %69 {offsets = [0, 0, 0], sizes = [32, 1, 32], strides = [1, 1, 1]} : vector<32x2x32xf32> to vector<32x1x32xf32>
      %71 = vector.shape_cast %70 : vector<32x1x32xf32> to vector<32x32xf32>
      %72 = vector.extract_strided_slice %69 {offsets = [0, 1, 0], sizes = [32, 1, 32], strides = [1, 1, 1]} : vector<32x2x32xf32> to vector<32x1x32xf32>
      %73 = vector.shape_cast %72 : vector<32x1x32xf32> to vector<32x32xf32>
      %74 = arith.maximumf %71, %73 : vector<32x32xf32>
      %75 = vector.shape_cast %74 : vector<32x32xf32> to vector<4x2x4x32xf32>
      %76 = vector.extract_strided_slice %75 {offsets = [0, 0, 0, 0], sizes = [4, 1, 4, 32], strides = [1, 1, 1, 1]} : vector<4x2x4x32xf32> to vector<4x1x4x32xf32>
      %77 = vector.shape_cast %76 : vector<4x1x4x32xf32> to vector<4x4x32xf32>
      %78 = vector.extract_strided_slice %75 {offsets = [0, 1, 0, 0], sizes = [4, 1, 4, 32], strides = [1, 1, 1, 1]} : vector<4x2x4x32xf32> to vector<4x1x4x32xf32>
      %79 = vector.shape_cast %78 : vector<4x1x4x32xf32> to vector<4x4x32xf32>
      %80 = arith.maximumf %77, %79 : vector<4x4x32xf32>
      %81 = vector.shape_cast %80 : vector<4x4x32xf32> to vector<16x32xf32>
      %82 = tpu.transpose %81, [1, 0] : vector<16x32xf32> -> vector<32x16xf32>
      %83 = arith.truncf %82 : vector<32x16xf32> to vector<32x16xbf16>
      %c0_75 = arith.constant 0 : index
      %c0_76 = arith.constant 0 : index
      %c0_77 = arith.constant 0 : index
      %84 = vector.load %arg6[%c0_75, %c0_76, %c0_77] : memref<1x32x16xbf16, #tpu.memory_space<vmem>>, vector<1x32x16xbf16>
      %85 = vector.shape_cast %84 : vector<1x32x16xbf16> to vector<32x16xbf16>
      %86 = vector.shape_cast %83 : vector<32x16xbf16> to vector<1x32x16xbf16>
      tpu.vector_store %arg6[%c0_75, %c0_76, %c0_77], %86 {strides = array<i32>} : memref<1x32x16xbf16, #tpu.memory_space<vmem>>, vector<1x32x16xbf16>,
      tpu.yield
    }) : () -> ()
    return
  }
  func.func @transform_0(%arg0: i32) -> (i32, i32, i32, i32) {
    %c0_i32 = arith.constant 0 : i32
    %c0_i32_0 = arith.constant 0 : i32
    %c0_i32_1 = arith.constant 0 : i32
    %c0_i32_2 = arith.constant 0 : i32
    return %arg0, %c0_i32, %c0_i32_0, %c0_i32_1 : i32, i32, i32, i32
  }
  func.func @transform_1(%arg0: i32) -> (i32, i32, i32) {
    %c0_i32 = arith.constant 0 : i32
    %c0_i32_0 = arith.constant 0 : i32
    %c0_i32_1 = arith.constant 0 : i32
    %c0_i32_2 = arith.constant 0 : i32
    return %c0_i32, %c0_i32_0, %c0_i32_1 : i32, i32, i32
  }
  func.func @transform_2(%arg0: i32) -> (i32, i32) {
    %c0_i32 = arith.constant 0 : i32
    %c0_i32_0 = arith.constant 0 : i32
    %c0_i32_1 = arith.constant 0 : i32
    return %c0_i32, %c0_i32_0 : i32, i32
  }
  func.func @transform_3(%arg0: i32) -> (i32, i32, i32) {
    %c0_i32 = arith.constant 0 : i32
    %c0_i32_0 = arith.constant 0 : i32
    %c0_i32_1 = arith.constant 0 : i32
    %c0_i32_2 = arith.constant 0 : i32
    return %c0_i32, %c0_i32_0, %c0_i32_1 : i32, i32, i32
  }
  func.func @transform_4(%arg0: i32) -> (i32, i32) {
    %c0_i32 = arith.constant 0 : i32
    %c0_i32_0 = arith.constant 0 : i32
    %c0_i32_1 = arith.constant 0 : i32
    return %c0_i32, %c0_i32_0 : i32, i32
  }
  func.func @transform_5(%arg0: i32) -> (i32, i32, i32) {
    %c0_i32 = arith.constant 0 : i32
    %c0_i32_0 = arith.constant 0 : i32
    %c0_i32_1 = arith.constant 0 : i32
    return %arg0, %c0_i32, %c0_i32_0 : i32, i32, i32
  }
}

module attributes {stable_mosaic.version = 11 : i64} {
  func.func @_linear_kernel(%arg0: i32, %arg1: i32, %arg2: memref<2x1024xbf16, #tpu.memory_space<vmem>>, %arg3: memref<1x1x1024x128xbf16, #tpu.memory_space<vmem>>, %arg4: memref<1x128xf32, #tpu.memory_space<vmem>>, %arg5: memref<2x128xf32, #tpu.memory_space<vmem>>, %arg6: memref<2x128xf32, #tpu.memory_space<vmem>>) attributes {dimension_semantics = [#tpu.dimension_semantics<parallel>, #tpu.dimension_semantics<arbitrary>], iteration_bounds = array<i64: 7, 1>, scalar_prefetch = 0 : i64, scratch_operands = 1 : i64, tpu.core_type = #tpu.core_type<tc>, window_params = [{transform_indices = @transform_0, window_bounds = array<i64: 2, 1024>}, {transform_indices = @transform_1, window_bounds = array<i64: 1, 1, 1024, 128>}, {transform_indices = @transform_2, window_bounds = array<i64: 1, 128>}, {transform_indices = @transform_3, window_bounds = array<i64: 2, 128>}]} {
    %c0_i32 = arith.constant 0 : i32
    %0 = arith.cmpi eq, %arg1, %c0_i32 : i32
    %1 = arith.extui %0 : i1 to i32
    %c0_i32_0 = arith.constant 0 : i32
    %2 = arith.cmpi ne, %1, %c0_i32_0 : i32
    scf.if %2 {
      %cst_12 = arith.constant 0.000000e+00 : f32
      %13 = vector.broadcast %cst_12 : f32 to vector<2x128xf32>
      %c0_13 = arith.constant 0 : index
      %c0_14 = arith.constant 0 : index
      %14 = vector.load %arg6[%c0_13, %c0_14] : memref<2x128xf32, #tpu.memory_space<vmem>>, vector<2x128xf32>
      tpu.vector_store %arg6[%c0_13, %c0_14], %13 {strides = array<i32>} : memref<2x128xf32, #tpu.memory_space<vmem>>, vector<2x128xf32>,
    } else {
    }
    %c0 = arith.constant 0 : index
    %c0_1 = arith.constant 0 : index
    %3 = vector.load %arg6[%c0, %c0_1] : memref<2x128xf32, #tpu.memory_space<vmem>>, vector<2x128xf32>
    %c0_2 = arith.constant 0 : index
    %c0_3 = arith.constant 0 : index
    %4 = vector.load %arg2[%c0_2, %c0_3] : memref<2x1024xbf16, #tpu.memory_space<vmem>>, vector<2x1024xbf16>
    %c0_4 = arith.constant 0 : index
    %c0_5 = arith.constant 0 : index
    %c0_6 = arith.constant 0 : index
    %c0_7 = arith.constant 0 : index
    %5 = vector.load %arg3[%c0_4, %c0_5, %c0_6, %c0_7] : memref<1x1x1024x128xbf16, #tpu.memory_space<vmem>>, vector<1x1x1024x128xbf16>
    %6 = vector.shape_cast %5 : vector<1x1x1024x128xbf16> to vector<1024x128xbf16>
    %cst = arith.constant dense<0.000000e+00> : vector<2x128xf32>
    %7 = tpu.matmul %4, %6, %cst {dimension_numbers = #tpu.dot_dimension_numbers<[1], [0], [0], [1], [0, 0, 1, 1], [], []>} : vector<2x1024xbf16>, vector<1024x128xbf16>, vector<2x128xf32> -> vector<2x128xf32>
    %8 = arith.addf %3, %7 : vector<2x128xf32>
    %c0_8 = arith.constant 0 : index
    %c0_9 = arith.constant 0 : index
    %9 = vector.load %arg6[%c0_8, %c0_9] : memref<2x128xf32, #tpu.memory_space<vmem>>, vector<2x128xf32>
    tpu.vector_store %arg6[%c0_8, %c0_9], %8 {strides = array<i32>} : memref<2x128xf32, #tpu.memory_space<vmem>>, vector<2x128xf32>,
    %c0_i32_10 = arith.constant 0 : i32
    %10 = arith.cmpi eq, %arg1, %c0_i32_10 : i32
    %11 = arith.extui %10 : i1 to i32
    %c0_i32_11 = arith.constant 0 : i32
    %12 = arith.cmpi ne, %11, %c0_i32_11 : i32
    scf.if %12 {
      %c0_12 = arith.constant 0 : index
      %c0_13 = arith.constant 0 : index
      %13 = vector.load %arg6[%c0_12, %c0_13] : memref<2x128xf32, #tpu.memory_space<vmem>>, vector<2x128xf32>
      %c0_14 = arith.constant 0 : index
      %c0_15 = arith.constant 0 : index
      %14 = vector.load %arg4[%c0_14, %c0_15] : memref<1x128xf32, #tpu.memory_space<vmem>>, vector<1x128xf32>
      %15 = vector.broadcast %14 : vector<1x128xf32> to vector<2x128xf32>
      %16 = arith.addf %13, %15 : vector<2x128xf32>
      %c0_16 = arith.constant 0 : index
      %c0_17 = arith.constant 0 : index
      %17 = vector.load %arg5[%c0_16, %c0_17] : memref<2x128xf32, #tpu.memory_space<vmem>>, vector<2x128xf32>
      tpu.vector_store %arg5[%c0_16, %c0_17], %16 {strides = array<i32>} : memref<2x128xf32, #tpu.memory_space<vmem>>, vector<2x128xf32>,
    } else {
    }
    return
  }
  func.func @transform_0(%arg0: i32, %arg1: i32) -> (i32, i32) {
    %c0_i32 = arith.constant 0 : i32
    %c0_i32_0 = arith.constant 0 : i32
    return %c0_i32, %arg1 : i32, i32
  }
  func.func @transform_1(%arg0: i32, %arg1: i32) -> (i32, i32, i32, i32) {
    %c0_i32 = arith.constant 0 : i32
    %c0_i32_0 = arith.constant 0 : i32
    %c0_i32_1 = arith.constant 0 : i32
    return %arg1, %arg0, %c0_i32, %c0_i32_0 : i32, i32, i32, i32
  }
  func.func @transform_2(%arg0: i32, %arg1: i32) -> (i32, i32) {
    %c0_i32 = arith.constant 0 : i32
    %c0_i32_0 = arith.constant 0 : i32
    return %c0_i32, %arg0 : i32, i32
  }
  func.func @transform_3(%arg0: i32, %arg1: i32) -> (i32, i32) {
    %c0_i32 = arith.constant 0 : i32
    %c0_i32_0 = arith.constant 0 : i32
    return %c0_i32, %arg0 : i32, i32
  }
}

</mosaic_0001>

<bundles_post_ra>
// kernel: pose_keypoint_dct_forward.4
= control target key start
LH: loop header
LB: loop body
LE: loop exit
PB: predicated region body
PF: predicated region fallthrough
CT: control target
= control target key end

     0   :  { %8 = vsyncpa [#allocation4], 0  ;;  %s2290_s0 = inlined_call_operand.vmem [shape: bf16[2,512], index: 0, kind: input, shape index: {}]   ;;  %s2291_s1 = inlined_call_operand.hbm [shape: bf16[1,2,512,512], index: 1, kind: input, shape index: {}]   ;;  %s2292_s2 = inlined_call_operand.hbm [shape: f32[1,1024], index: 2, kind: input, shape index: {}]   ;;  %s2293_s3 = inlined_call_operand.vmem [shape: bf16[2,1024], index: 3, kind: output, shape index: {}]  }
   0x1   :  { %10 = vsyncpa [#allocation4 + $0x1], 0 }
   0x2   :  { %11 = vsyncpa [#allocation6], 0 }
   0x3   :  { %13 = vsyncpa [#allocation6 + $0x1], 0  ;;  %s2007_s12 = smov 0   ;;  %s2009_s13 = smov 0  }
   0x4   :  { %s2011_s14 = smov 0   ;;  %s2013_s15 = smov 0  }
   0x5   :  { %s2015_s16 = smov 0   ;;  %s2017_s17 = smov 0  }
   0x6 LB: > { %s1462_s18 = sadd.s32 4294967295, %s1979_s17   ;;  %s31_s19 = sadd.s32 1, %s1975_s16  ;;  %s1979_s17 = sphi %s2017_s17, %s19_s17   ;;  %s1975_s16 = sphi %s2015_s16, %s2302_s16   ;;  %s1971_s15 = sphi %s2013_s15, %s2301_s15   ;;  %s1967_s14 = sphi %s2011_s14, %s2300_s14   ;;  %s1963_s13 = sphi %s2009_s13, %s2299_s13   ;;  %s1959_s12 = sphi %s2007_s12, %s2298_s12  }
   0x7   : > { %p33_p0 = scmp.ge.s32.totalorder %s31_s19, 2  ;;  %s66_s20 = sadd.s32 1, %s1967_s14 }
   0x8   : > { %p73_p1 = scmp.ne.s32.totalorder %s1967_s14, %s1963_s13  ;;  %p74_p2 = scmp.eq.s32.totalorder %s1979_s17, 0 }
   0x9   : > { %s2304_s19 = smov (%p33_p0, %s31_s19), 0  ;;  %p79_p4 = scmp.ne.s32.totalorder %s1963_s13, %s1959_s12 }
   0xa   : > { %p2043_p3 = por %p74_p2, %p73_p1  ;;  %s62_s22 = ssub.s32 %s1975_s16, %s2304_s19 }
   0xb   : > { %p80_p5 = scmp.eq.s32.totalorder %s1462_s18, 0  ;;  %p64_p6 = scmp.eq.s32.totalorder %s62_s22, 0 }
   0xc   : > { %p1624_p8 = scmp.lt.s32.totalorder %s1979_s17, 2  ;;  %s2059_s25 = sand.u32 1, %s1967_s14  }
   0xd   : > { %p2050_p7 = por %p80_p5, %p79_p4  ;;  %s1611_s26 = sshll.u32 %s1975_s16, 14 }
   0xe   : > { %s2056_s24 = scalar_select %p64_p6, %s1967_s14, %s66_s20  }
   0xf   : > { %s1467_s27 = sshll.u32 %s2059_s25, 10  ;;  %s175_s30 = scalar_lea.hbm %s2291_s1, %s1611_s26 }
  0x10   : > { %s167_s4 = scalar_lea.vmem [#allocation3], %s1467_s27  ;;  %p2068_p9 = pnand %p1624_p8, %p2043_p3 }
  0x11   : > { %s176_s5 = sshll.u32 %s167_s4, 4  ;;  %s164_s7 = scalar_lea.sflag [#allocation4], %s2059_s25  ;;  %s177_s5 = int_to_ptr.vmem [resolvable:$true] %s176_s5 }
  0x12   : > { %p1871_p10 = pneg %p2068_p9  ;;  %s1882_s8 = scalar_lea.vmem %s177_s5, 16384 }
  0x13   : > { %p1883_p11 = scmp.ne.s32.totalorder %s177_s5, %s1882_s8  ;;  %s1981_s9 = smov [#allocation3]  }
  0x14   : > { %s1887_s10 = sshll.u32 %s1981_s9, 4  ;;  %s1888_s10 = int_to_ptr.vmem [resolvable:$false] %s1887_s10 }
  0x15   : > { %p1885_p12 = pnand %p1883_p11, %p1871_p10  ;;  %s1889_s11 = scalar_lea.vmem %s1888_s10, 32768 }
  0x16   : > { %p1890_p0 = scmp.lt.s32.totalorder %s177_s5, %s1888_s10  ;;  %p1891_p1 = scmp.lt.s32.totalorder %s1889_s11, %s1882_s8 }
  0x17   : > { %p1886_p13 = pneg %p1885_p12 }
  0x18   : > { %p1892_p2 = por %p1891_p1, %p1890_p0 }
  0x1a   : > { %p1893_p3 = pnand %p1892_p2, %p1886_p13 }
  0x1c   : > { %1896 = shalt.err (!%p1893_p3)
}
  0x1d   : > { %s1982_s12 = smov 256   ;;  %s1983_s18 = smov 16  }
  0x1e   : > { %1620 = dma.hbm_to_vmem [thread:$0]  (!%p2068_p9), %s175_s30, 16384, %s177_s5, %s164_s7, %s1982_s12, %s1982_s12, %s1983_s18  }
  0x1f   : > { %p1473_p4 = scmp.ge.s32.totalorder %s1979_s17, 1  ;;  %p203_p5 = scmp.lt.s32.totalorder %s1979_s17, 3 }
  0x20   : > { %s1470_s20 = sshll.u32 %s2059_s25, 2  ;;  %s1612_s22 = sshll.u32 %s1975_s16, 6 }
  0x21   : > { %p2083_p6 = pnand %p1473_p4, %p203_p5  ;;  %s190_s26 = scalar_lea.vmem [#allocation5], %s1470_s20 }
  0x22   : > { %s198_s27 = sshll.u32 %s190_s26, 4  ;;  %s196_s4 = scalar_lea.hbm %s2292_s2, %s1612_s22  ;;  %s199_s27 = int_to_ptr.vmem [resolvable:$true] %s198_s27 }
  0x23   : > { %s187_s8 = scalar_lea.sflag [#allocation6], %s2059_s25  ;;  %s1910_s9 = scalar_lea.vmem %s199_s27, 64 }
  0x24   : > { %p1911_p8 = scmp.ne.s32.totalorder %s199_s27, %s1910_s9  ;;  %s1984_s30 = smov [#allocation5]  }
  0x25   : > { %s1915_s5 = sshll.u32 %s1984_s30, 4  ;;  %s1916_s5 = int_to_ptr.vmem [resolvable:$false] %s1915_s5 }
  0x26   : > { %p1913_p11 = pnand %p1911_p8, %p1871_p10  ;;  %s1917_s7 = scalar_lea.vmem %s1916_s5, 128 }
  0x27   : > { %p1918_p13 = scmp.lt.s32.totalorder %s199_s27, %s1916_s5  ;;  %p1919_p0 = scmp.lt.s32.totalorder %s1917_s7, %s1910_s9 }
  0x28   : > { %p1914_p12 = pneg %p1913_p11 }
  0x29   : > { %p1920_p1 = por %p1919_p0, %p1918_p13 }
  0x2b   : > { %p1921_p2 = pnand %p1920_p1, %p1914_p12 }
  0x2d   : > { %1924 = shalt.err (!%p1921_p2)
}
  0x2e   : > { %1623 = dma.hbm_to_vmem [thread:$0]  (!%p2068_p9), %s196_s4, 64, %s199_s27, %s187_s8  }
  0x2f   : > { %207 = sbr.rel (%p2083_p6) target bundleno = 406 (0x196), region = 32  ;;  %s209_s25 = sand.u32 (!%p2083_p6), 1, %s1963_s13  }
  0x30   : > { %s1474_s10 = sshll.u32 (!%p2083_p6), %s209_s25, 10  ;;  %s210_s11 = scalar_lea.sflag (!%p2083_p6), [#allocation4], %s209_s25 }
  0x31   : > { %s2100_s12 = scalar_lea.vmem (!%p2083_p6), [#allocation3], %s1474_s10 }
  0x34   : > { %1950 = dma.done.wait (%p2050_p7), %s210_s11, 16384  }
  0x35   : > { %1952 = vsyncadd (%p2050_p7), %s210_s11, 4294950912  ;;  %s1475_s18 = sshll.u32 %s209_s25, 2  ;;  %s219_s20 = scalar_lea.sflag [#allocation6], %s209_s25 }
  0x36   : > { %s2106_s6 = scalar_lea.vmem [#allocation5], %s1475_s18 }
  0x37   : > { %1954 = dma.done.wait (%p2050_p7), %s219_s20, 64  }
  0x38   : > { %1956 = vsyncadd (%p2050_p7), %s219_s20, 4294967232  ;;  %v1677_v0 = vld [vmem:[%s2100_s12 + $0xe4] ss:$16 sps:$4 sm:$0xff]   ;;  %v1681_v2 = vld [vmem:[%s2100_s12 + $0xe0] ss:$16 sps:$4 sm:$0xff]   ;;  %v411_v40 = vlaneseq  ;;  %s1476_s22 = sshll.u32 %s1971_s15, 2 }
  0x39   : > { %v1679_v1 = vld [vmem:[%s2100_s12 + $0x2e4] ss:$16 sps:$4 sm:$0xff]   ;;  %1068 = vmatprep.subr.bf16.mxu0 %v1677_v0  ;;  %v1682_v3 = vld [vmem:[%s2100_s12 + $0x2e0] ss:$16 sps:$4 sm:$0xff]   ;;  %v1985_v38 = vmov 1966171168  }
  0x3a   : > { %1109 = vmatprep.subr.bf16.mxu1 %v1679_v1  ;;  %v1683_v4 = vld [vmem:[%s2100_s12 + $0xc4] ss:$16 sps:$4 sm:$0xff]   ;;  %1069 = vmatpush1.bf16.msra.mxu0 %v1681_v2  ;;  %v1687_v6 = vld [vmem:[%s2100_s12 + $0xc0] ss:$16 sps:$4 sm:$0xff]   ;;  %v409_v39 = vunpack.c.l.s4 %v1985_v38  ;;  %v2154_v46 = vshrl.u32 %v411_v40, 7  ;;  %p260_p7 = scmp.lt.s32.totalorder %s1476_s22, 7 }
  0x3b   : > { %1110 = vmatpush1.bf16.msra.mxu1 %v1682_v3  ;;  %v1685_v5 = vld [vmem:[%s2100_s12 + $0x2c4] ss:$16 sps:$4 sm:$0xff]   ;;  %1070 = vmatprep.subr.bf16.mxu0 %v1683_v4  ;;  %v1688_v7 = vld [vmem:[%s2100_s12 + $0x2c0] ss:$16 sps:$4 sm:$0xff]   ;;  %v1809_v38 = vld [vmem:[%s2100_s12 + $0x28] ss:$16 sps:$4 sm:$0xff]  }
  0x3c   : > { %1111 = vmatprep.subr.bf16.mxu1 %v1685_v5  ;;  %v1689_v8 = vld [vmem:[%s2100_s12 + $0xa4] ss:$16 sps:$4 sm:$0xff]   ;;  %v1693_v10 = vld [vmem:[%s2100_s12 + $0xa0] ss:$16 sps:$4 sm:$0xff]   ;;  %v410_v45 = vunpack.c.0.s8 %v409_v39  ;;  %v1812_v39 = vld [vmem:[%s2100_s12 + $0x228] ss:$16 sps:$4 sm:$0xff]  }
  0x3d   : > { %v1691_v9 = vld [vmem:[%s2100_s12 + $0x2a4] ss:$16 sps:$4 sm:$0xff]   ;;  %v1694_v11 = vld [vmem:[%s2100_s12 + $0x2a0] ss:$16 sps:$4 sm:$0xff]   ;;  %v1817_v40 = vld [vmem:[%s2100_s12 + $0xc] ss:$16 sps:$4 sm:$0xff]  }
  0x3e   : > { %1071 = vmatpush1.bf16.msra.mxu0 %v1687_v6  ;;  %v1695_v12 = vld [vmem:[%s2100_s12 + $0x84] ss:$16 sps:$4 sm:$0xff]   ;;  %v1699_v14 = vld [vmem:[%s2100_s12 + $0x80] ss:$16 sps:$4 sm:$0xff]   ;;  %v2161_v51 = vsub.s32 %v410_v45, %v2154_v46  ;;  %v1826_v45 = vld [vmem:[%s2100_s12 + $0x3ec] ss:$16 sps:$4 sm:$0xff]  }
  0x3f   : > { %1112 = vmatpush1.bf16.msra.mxu1 %v1688_v7  ;;  %1072 = vmatprep.subr.bf16.mxu0 %v1689_v8  ;;  %v1697_v13 = vld [vmem:[%s2100_s12 + $0x284] ss:$16 sps:$4 sm:$0xff]   ;;  %v1700_v15 = vld [vmem:[%s2100_s12 + $0x280] ss:$16 sps:$4 sm:$0xff]   ;;  %s2306_s22 = smov (!%p260_p7, %s1476_s22), 7 }
  0x40   : > { %1113 = vmatprep.subr.bf16.mxu1 %v1691_v9  ;;  %v1701_v16 = vld [vmem:[%s2100_s12 + $0x64] ss:$16 sps:$4 sm:$0xff]   ;;  %v1705_v18 = vld [vmem:[%s2100_s12 + $0x60] ss:$16 sps:$4 sm:$0xff]   ;;  %s262_s28 = scalar_lea.vmem %s2293_s3, %s2306_s22 }
  0x41   : > { %v1703_v17 = vld [vmem:[%s2100_s12 + $0x264] ss:$16 sps:$4 sm:$0xff]   ;;  %v1706_v19 = vld [vmem:[%s2100_s12 + $0x260] ss:$16 sps:$4 sm:$0xff]  }
  0x42   : > { %1073 = vmatpush1.bf16.msra.mxu0 %v1693_v10  ;;  %v1707_v20 = vld [vmem:[%s2100_s12 + $0x44] ss:$16 sps:$4 sm:$0xff]   ;;  %v1711_v22 = vld [vmem:[%s2100_s12 + $0x40] ss:$16 sps:$4 sm:$0xff]  }
  0x43   : > { %1114 = vmatpush1.bf16.msra.mxu1 %v1694_v11  ;;  %1074 = vmatprep.subr.bf16.mxu0 %v1695_v12  ;;  %v1709_v21 = vld [vmem:[%s2100_s12 + $0x244] ss:$16 sps:$4 sm:$0xff]   ;;  %v1712_v23 = vld [vmem:[%s2100_s12 + $0x240] ss:$16 sps:$4 sm:$0xff]   ;;  %v1775_v11 = vld [vmem:[%s2100_s12 + $0xec] ss:$16 sps:$4 sm:$0xff]  }
  0x44   : > { %1115 = vmatprep.subr.bf16.mxu1 %v1697_v13  ;;  %v1713_v24 = vld [vmem:[%s2100_s12 + $0x24] ss:$16 sps:$4 sm:$0xff]   ;;  %v1717_v26 = vld [vmem:[%s2100_s12 + $0x20] ss:$16 sps:$4 sm:$0xff]   ;;  %v1778_v12 = vld [vmem:[%s2100_s12 + $0x2ec] ss:$16 sps:$4 sm:$0xff]  }
  0x45   : > { %v1715_v25 = vld [vmem:[%s2100_s12 + $0x224] ss:$16 sps:$4 sm:$0xff]   ;;  %v1718_v27 = vld [vmem:[%s2100_s12 + $0x220] ss:$16 sps:$4 sm:$0xff]  }
  0x46   : > { %1075 = vmatpush1.bf16.msra.mxu0 %v1699_v14  ;;  %v1719_v28 = vld [vmem:[%s2100_s12 + $0x4] ss:$16 sps:$4 sm:$0xff]   ;;  %v1723_v30 = vld [vmem:[%s2100_s12] ss:$16 sps:$4 sm:$0xff]   ;;  %v1773_v14 = vld [vmem:[%s2100_s12 + $0xe8] ss:$16 sps:$4 sm:$0xff]  }
  0x47   : > { %1116 = vmatpush1.bf16.msra.mxu1 %v1700_v15  ;;  %1076 = vmatprep.subr.bf16.mxu0 %v1701_v16  ;;  %v1721_v29 = vld [vmem:[%s2100_s12 + $0x204] ss:$16 sps:$4 sm:$0xff]   ;;  %v1724_v31 = vld [vmem:[%s2100_s12 + $0x200] ss:$16 sps:$4 sm:$0xff]   ;;  %v1776_v15 = vld [vmem:[%s2100_s12 + $0x2e8] ss:$16 sps:$4 sm:$0xff]  }
  0x48   : > { %1117 = vmatprep.subr.bf16.mxu1 %v1703_v17  ;;  %v1725_v32 = vld [vmem:[%s2100_s12 + $0x1e4] ss:$16 sps:$4 sm:$0xff]   ;;  %v1729_v34 = vld [vmem:[%s2100_s12 + $0x1e0] ss:$16 sps:$4 sm:$0xff]   ;;  %v1781_v16 = vld [vmem:[%s2100_s12 + $0xcc] ss:$16 sps:$4 sm:$0xff]  }
  0x49   : > { %v1727_v33 = vld [vmem:[%s2100_s12 + $0x3e4] ss:$16 sps:$4 sm:$0xff]   ;;  %v1730_v35 = vld [vmem:[%s2100_s12 + $0x3e0] ss:$16 sps:$4 sm:$0xff]   ;;  %v1784_v17 = vld [vmem:[%s2100_s12 + $0x2cc] ss:$16 sps:$4 sm:$0xff]  }
  0x4a   : > { %1077 = vmatpush1.bf16.msra.mxu0 %v1705_v18  ;;  %v1731_v36 = vld [vmem:[%s2100_s12 + $0x1c4] ss:$16 sps:$4 sm:$0xff]   ;;  %v1735_v41 = vld [vmem:[%s2100_s12 + $0x1c0] ss:$16 sps:$4 sm:$0xff]   ;;  %v1779_v18 = vld [vmem:[%s2100_s12 + $0xc8] ss:$16 sps:$4 sm:$0xff]  }
  0x4b   : > { %1118 = vmatpush1.bf16.msra.mxu1 %v1706_v19  ;;  %1078 = vmatprep.subr.bf16.mxu0 %v1707_v20  ;;  %v1733_v37 = vld [vmem:[%s2100_s12 + $0x3c4] ss:$16 sps:$4 sm:$0xff]   ;;  %v1736_v42 = vld [vmem:[%s2100_s12 + $0x3c0] ss:$16 sps:$4 sm:$0xff]   ;;  %v1782_v19 = vld [vmem:[%s2100_s12 + $0x2c8] ss:$16 sps:$4 sm:$0xff]  }
  0x4c   : > { %1119 = vmatprep.subr.bf16.mxu1 %v1709_v21  ;;  %v1737_v43 = vld [vmem:[%s2100_s12 + $0x1a4] ss:$16 sps:$4 sm:$0xff]   ;;  %v1741_v47 = vld [vmem:[%s2100_s12 + $0x1a0] ss:$16 sps:$4 sm:$0xff]   ;;  %v1787_v20 = vld [vmem:[%s2100_s12 + $0xac] ss:$16 sps:$4 sm:$0xff]  }
  0x4d   : > { %v1739_v44 = vld [vmem:[%s2100_s12 + $0x3a4] ss:$16 sps:$4 sm:$0xff]   ;;  %v1742_v48 = vld [vmem:[%s2100_s12 + $0x3a0] ss:$16 sps:$4 sm:$0xff]   ;;  %v1790_v21 = vld [vmem:[%s2100_s12 + $0x2ac] ss:$16 sps:$4 sm:$0xff]  }
  0x4e   : > { %1079 = vmatpush1.bf16.msra.mxu0 %v1711_v22  ;;  %v1743_v49 = vld [vmem:[%s2100_s12 + $0x184] ss:$16 sps:$4 sm:$0xff]   ;;  %v1477_v52 = vld.sshfl [vmem:[%s2290_s0] sm:$0x33 pattern:$0x75316420] }
  0x4f   : > { %1120 = vmatpush1.bf16.msra.mxu1 %v1712_v23  ;;  %1080 = vmatprep.subr.bf16.mxu0 %v1713_v24  ;;  %v1745_v50 = vld [vmem:[%s2100_s12 + $0x384] ss:$16 sps:$4 sm:$0xff]   ;;  %v1747_v53 = vld [vmem:[%s2100_s12 + $0x180] ss:$16 sps:$4 sm:$0xff]   ;;  %v407_v55 = vcombine.high %v1477_v52, %v1477_v52  ;;  %v2185_v9 = vrot.slane %v1477_v52, %v2161_v51  ;;  %v1785_v22 = vld [vmem:[%s2100_s12 + $0xa8] ss:$16 sps:$4 sm:$0xff]  }
  0x50   : > { %1121 = vmatprep.subr.bf16.mxu1 %v1715_v25  ;;  %v1748_v54 = vld [vmem:[%s2100_s12 + $0x380] ss:$16 sps:$4 sm:$0xff]   ;;  %v1749_v56 = vld [vmem:[%s2100_s12 + $0x164] ss:$16 sps:$4 sm:$0xff]   ;;  %v1788_v23 = vld [vmem:[%s2100_s12 + $0x2a8] ss:$16 sps:$4 sm:$0xff]  }
  0x51   : > { %v1751_v57 = vld [vmem:[%s2100_s12 + $0x364] ss:$16 sps:$4 sm:$0xff]   ;;  %v421_v58 = vrot.slane %v407_v55, %v2161_v51  ;;  %v1753_v59 = vld [vmem:[%s2100_s12 + $0x160] ss:$16 sps:$4 sm:$0xff]   ;;  %v2192_v13 = vcombine.high %v2185_v9, %v2185_v9  ;;  %v1793_v24 = vld [vmem:[%s2100_s12 + $0x8c] ss:$16 sps:$4 sm:$0xff]  }
  0x52   : > { %1081 = vmatpush1.bf16.msra.mxu0 %v1717_v26  ;;  %v1754_v60 = vld [vmem:[%s2100_s12 + $0x360] ss:$16 sps:$4 sm:$0xff]   ;;  %v1755_v62 = vld [vmem:[%s2100_s12 + $0x144] ss:$16 sps:$4 sm:$0xff]   ;;  %v1796_v25 = vld [vmem:[%s2100_s12 + $0x28c] ss:$16 sps:$4 sm:$0xff]  }
  0x53   : > { %1122 = vmatpush1.bf16.msra.mxu1 %v1718_v27  ;;  %1082 = vmatprep.subr.bf16.mxu0 %v1719_v28  ;;  %v423_v61 = vcombine.high %v421_v58, %v421_v58  ;;  %v1757_v63 = vld [vmem:[%s2100_s12 + $0x344] ss:$16 sps:$4 sm:$0xff]   ;;  %v1759_v0 = vld [vmem:[%s2100_s12 + $0x140] ss:$16 sps:$4 sm:$0xff]   ;;  %v1791_v26 = vld [vmem:[%s2100_s12 + $0x88] ss:$16 sps:$4 sm:$0xff]  }
  0x54   : > { %1123 = vmatprep.subr.bf16.mxu1 %v1721_v29  ;;  %1100 = vmatprep.mubr.bf16.mxu0 %v421_v58  ;;  %v1760_v1 = vld [vmem:[%s2100_s12 + $0x340] ss:$16 sps:$4 sm:$0xff]   ;;  %v1761_v2 = vld [vmem:[%s2100_s12 + $0x124] ss:$16 sps:$4 sm:$0xff]   ;;  %v1794_v27 = vld [vmem:[%s2100_s12 + $0x288] ss:$16 sps:$4 sm:$0xff]  }
  0x55   : > { %1141 = vmatprep.mubr.bf16.mxu1 %v423_v61  ;;  %v1763_v3 = vld [vmem:[%s2100_s12 + $0x324] ss:$16 sps:$4 sm:$0xff]   ;;  %v1765_v4 = vld [vmem:[%s2100_s12 + $0x120] ss:$16 sps:$4 sm:$0xff]   ;;  %v1799_v28 = vld [vmem:[%s2100_s12 + $0x6c] ss:$16 sps:$4 sm:$0xff]  }
  0x56   : > { %1083 = vmatpush1.bf16.msra.mxu0 %v1723_v30  ;;  %v1766_v5 = vld [vmem:[%s2100_s12 + $0x320] ss:$16 sps:$4 sm:$0xff]   ;;  %v1767_v6 = vld [vmem:[%s2100_s12 + $0x104] ss:$16 sps:$4 sm:$0xff]   ;;  %v1802_v29 = vld [vmem:[%s2100_s12 + $0x26c] ss:$16 sps:$4 sm:$0xff]  }
  0x57   : > { %1124 = vmatpush1.bf16.msra.mxu1 %v1724_v31  ;;  %1084 = vmatprep.subr.bf16.mxu0 %v1725_v32  ;;  %v1769_v7 = vld [vmem:[%s2100_s12 + $0x304] ss:$16 sps:$4 sm:$0xff]   ;;  %v1771_v8 = vld [vmem:[%s2100_s12 + $0x100] ss:$16 sps:$4 sm:$0xff]   ;;  %v1797_v30 = vld [vmem:[%s2100_s12 + $0x68] ss:$16 sps:$4 sm:$0xff]  }
  0x58   : > { %1125 = vmatprep.subr.bf16.mxu1 %v1727_v33  ;;  %v1772_v10 = vld [vmem:[%s2100_s12 + $0x300] ss:$16 sps:$4 sm:$0xff]   ;;  %v1800_v31 = vld [vmem:[%s2100_s12 + $0x268] ss:$16 sps:$4 sm:$0xff]   ;;  %v1805_v32 = vld [vmem:[%s2100_s12 + $0x4c] ss:$16 sps:$4 sm:$0xff]  }
  0x59   : > { %v1808_v33 = vld [vmem:[%s2100_s12 + $0x24c] ss:$16 sps:$4 sm:$0xff]   ;;  %v1827_v52 = vld [vmem:[%s2100_s12 + $0x1c8] ss:$16 sps:$4 sm:$0xff]  }
  0x5a   : > { %1085 = vmatpush2.bf16.msra.mxu0 %v1729_v34  ;;  %v1803_v34 = vld [vmem:[%s2100_s12 + $0x48] ss:$16 sps:$4 sm:$0xff]   ;;  %v1838_v55 = vld [vmem:[%s2100_s12 + $0x3ac] ss:$16 sps:$4 sm:$0xff]  }
  0x5b   : > { %1126 = vmatpush2.bf16.msra.mxu1 %v1730_v35  ;;  %1086 = vmatprep.subr.bf16.mxu0 %v1731_v36  ;;  %v1806_v35 = vld [vmem:[%s2100_s12 + $0x248] ss:$16 sps:$4 sm:$0xff]   ;;  %v1811_v36 = vld [vmem:[%s2100_s12 + $0x2c] ss:$16 sps:$4 sm:$0xff]  }
  0x5c   : > { %1127 = vmatprep.subr.bf16.mxu1 %v1733_v37  ;;  %v1814_v37 = vld [vmem:[%s2100_s12 + $0x22c] ss:$16 sps:$4 sm:$0xff]  }
  0x5e   : > { %1087 = vmatpush2.bf16.msra.mxu0 %v1735_v41  ;;  %v1820_v41 = vld [vmem:[%s2100_s12 + $0x20c] ss:$16 sps:$4 sm:$0xff]  }
  0x5f   : > { %1128 = vmatpush2.bf16.msra.mxu1 %v1736_v42  ;;  %1088 = vmatprep.subr.bf16.mxu0 %v1737_v43  ;;  %v1815_v42 = vld [vmem:[%s2100_s12 + $0x8] ss:$16 sps:$4 sm:$0xff]  }
  0x60   : > { %1129 = vmatprep.subr.bf16.mxu1 %v1739_v44  ;;  %v1818_v43 = vld [vmem:[%s2100_s12 + $0x208] ss:$16 sps:$4 sm:$0xff]   ;;  %v1823_v44 = vld [vmem:[%s2100_s12 + $0x1ec] ss:$16 sps:$4 sm:$0xff]  }
  0x62   : > { %1089 = vmatpush2.bf16.msra.mxu0 %v1741_v47  ;;  %v1821_v47 = vld [vmem:[%s2100_s12 + $0x1e8] ss:$16 sps:$4 sm:$0xff]  }
  0x63   : > { %1130 = vmatpush2.bf16.msra.mxu1 %v1742_v48  ;;  %1090 = vmatprep.subr.bf16.mxu0 %v1743_v49  ;;  %v1824_v48 = vld [vmem:[%s2100_s12 + $0x3e8] ss:$16 sps:$4 sm:$0xff]   ;;  %v1829_v49 = vld [vmem:[%s2100_s12 + $0x1cc] ss:$16 sps:$4 sm:$0xff]  }
  0x64   : > { %1131 = vmatprep.subr.bf16.mxu1 %v1745_v50  ;;  %v1832_v50 = vld [vmem:[%s2100_s12 + $0x3cc] ss:$16 sps:$4 sm:$0xff]  }
  0x66   : > { %1091 = vmatpush2.bf16.msra.mxu0 %v1747_v53  ;;  %v1830_v53 = vld [vmem:[%s2100_s12 + $0x3c8] ss:$16 sps:$4 sm:$0xff]  }
  0x67   : > { %1132 = vmatpush2.bf16.msra.mxu1 %v1748_v54  ;;  %1092 = vmatprep.subr.bf16.mxu0 %v1749_v56  ;;  %v1835_v54 = vld [vmem:[%s2100_s12 + $0x1ac] ss:$16 sps:$4 sm:$0xff]   ;;  %v1833_v56 = vld [vmem:[%s2100_s12 + $0x1a8] ss:$16 sps:$4 sm:$0xff]  }
  0x68   : > { %1133 = vmatprep.subr.bf16.mxu1 %v1751_v57  ;;  %v1836_v57 = vld [vmem:[%s2100_s12 + $0x3a8] ss:$16 sps:$4 sm:$0xff]  }
  0x6a   : > { %1093 = vmatpush2.bf16.msra.mxu0 %v1753_v59  ;;  %v1844_v59 = vld [vmem:[%s2100_s12 + $0x38c] ss:$16 sps:$4 sm:$0xff]  }
  0x6b   : > { %1134 = vmatpush2.bf16.msra.mxu1 %v1754_v60  ;;  %1094 = vmatprep.subr.bf16.mxu0 %v1755_v62  ;;  %v1839_v60 = vld [vmem:[%s2100_s12 + $0x188] ss:$16 sps:$4 sm:$0xff]   ;;  %v1847_v62 = vld [vmem:[%s2100_s12 + $0x16c] ss:$16 sps:$4 sm:$0xff]  }
  0x6c   : > { %1135 = vmatprep.subr.bf16.mxu1 %v1757_v63  ;;  %v1850_v63 = vld [vmem:[%s2100_s12 + $0x36c] ss:$16 sps:$4 sm:$0xff]  }
  0x6e   : > { %1095 = vmatpush2.bf16.msra.mxu0 %v1759_v0  ;;  %v1845_v0 = vld [vmem:[%s2100_s12 + $0x168] ss:$16 sps:$4 sm:$0xff]  }
  0x6f   : > { %1136 = vmatpush2.bf16.msra.mxu1 %v1760_v1  ;;  %1096 = vmatprep.subr.bf16.mxu0 %v1761_v2  ;;  %v1848_v1 = vld [vmem:[%s2100_s12 + $0x368] ss:$16 sps:$4 sm:$0xff]   ;;  %v1853_v2 = vld [vmem:[%s2100_s12 + $0x14c] ss:$16 sps:$4 sm:$0xff]  }
  0x70   : > { %1137 = vmatprep.subr.bf16.mxu1 %v1763_v3  ;;  %v1856_v3 = vld [vmem:[%s2100_s12 + $0x34c] ss:$16 sps:$4 sm:$0xff]  }
  0x72   : > { %1097 = vmatpush2.bf16.msra.mxu0 %v1765_v4  ;;  %v1851_v4 = vld [vmem:[%s2100_s12 + $0x148] ss:$16 sps:$4 sm:$0xff]  }
  0x73   : > { %1138 = vmatpush2.bf16.msra.mxu1 %v1766_v5  ;;  %1098 = vmatprep.subr.bf16.mxu0 %v1767_v6  ;;  %v1854_v5 = vld [vmem:[%s2100_s12 + $0x348] ss:$16 sps:$4 sm:$0xff]   ;;  %v1859_v6 = vld [vmem:[%s2100_s12 + $0x12c] ss:$16 sps:$4 sm:$0xff]  }
  0x74   : > { %1139 = vmatprep.subr.bf16.mxu1 %v1769_v7  ;;  %v1862_v7 = vld [vmem:[%s2100_s12 + $0x32c] ss:$16 sps:$4 sm:$0xff]  }
  0x76   : > { %1099 = vmatpush2.bf16.msra.mxu0 %v1771_v8  ;;  %v1857_v8 = vld [vmem:[%s2100_s12 + $0x128] ss:$16 sps:$4 sm:$0xff]  }
  0x77   : > { %1140 = vmatpush2.bf16.msra.mxu1 %v1772_v10  ;;  %1150 = vmatprep.subr.bf16.mxu0 %v1775_v11  ;;  %v1860_v10 = vld [vmem:[%s2100_s12 + $0x328] ss:$16 sps:$4 sm:$0xff]   ;;  %v1865_v11 = vld [vmem:[%s2100_s12 + $0x10c] ss:$16 sps:$4 sm:$0xff]  }
  0x78   : > { %1191 = vmatprep.subr.bf16.mxu1 %v1778_v12  ;;  %v1868_v12 = vld [vmem:[%s2100_s12 + $0x30c] ss:$16 sps:$4 sm:$0xff]  }
  0x79   : > { %1101 = vmatmul.mubr.bf16.vlgmr.msra.gmra.mxu0 %v2185_v9 }
  0x7a   : > { %1142 = vmatmul.mubr.bf16.vlgmr.msra.gmra.mxu1 %v2192_v13  ;;  %1151 = vmatpush1.bf16.msra.mxu0 %v1773_v14  ;;  %v1863_v14 = vld [vmem:[%s2100_s12 + $0x108] ss:$16 sps:$4 sm:$0xff]  }
  0x7b   : > { %1192 = vmatpush1.bf16.msra.mxu1 %v1776_v15  ;;  %1152 = vmatprep.subr.bf16.mxu0 %v1781_v16  ;;  %v1866_v15 = vld [vmem:[%s2100_s12 + $0x308] ss:$16 sps:$4 sm:$0xff]  }
  0x7c   : > { %1193 = vmatprep.subr.bf16.mxu1 %v1784_v17  ;;  %1182 = vmatprep.mubr.bf16.mxu0 %v421_v58  ;;  %v1841_v58 = vld [vmem:[%s2100_s12 + $0x18c] ss:$16 sps:$4 sm:$0xff]  }
  0x7d   : > { %1223 = vmatprep.mubr.bf16.mxu1 %v423_v61  ;;  %v1842_v61 = vld [vmem:[%s2100_s12 + $0x388] ss:$16 sps:$4 sm:$0xff]  }
  0x7e   : > { %1153 = vmatpush1.bf16.msra.mxu0 %v1779_v18 }
  0x7f   : > { %1194 = vmatpush1.bf16.msra.mxu1 %v1782_v19  ;;  %1154 = vmatprep.subr.bf16.mxu0 %v1787_v20 }
  0x80   : > { %1195 = vmatprep.subr.bf16.mxu1 %v1790_v21 }
  0x82   : > { %1155 = vmatpush1.bf16.msra.mxu0 %v1785_v22 }
  0x83   : > { %1196 = vmatpush1.bf16.msra.mxu1 %v1788_v23  ;;  %1156 = vmatprep.subr.bf16.mxu0 %v1793_v24 }
  0x84   : > { %1197 = vmatprep.subr.bf16.mxu1 %v1796_v25 }
  0x86   : > { %1157 = vmatpush1.bf16.msra.mxu0 %v1791_v26 }
  0x87   : > { %1198 = vmatpush1.bf16.msra.mxu1 %v1794_v27  ;;  %1158 = vmatprep.subr.bf16.mxu0 %v1799_v28  ;;  %v1264_v27 = vsub.s32 0, %v2154_v46  ;;  %v1268_v28 = vsub.s32 1, %v2154_v46 }
  0x88   : > { %1199 = vmatprep.subr.bf16.mxu1 %v1802_v29  ;;  %v1260_v29 = vld [vmem:[%s2106_s6] sm:$0xf] }
  0x8a   : > { %1159 = vmatpush1.bf16.msra.mxu0 %v1797_v30  ;;  %v1986_v30 = vmov 1983009808  }
  0x8b   : > { %1200 = vmatpush1.bf16.msra.mxu1 %v1800_v31  ;;  %1160 = vmatprep.subr.bf16.mxu0 %v1805_v32  ;;  %v1239_v31 = vunpack.c.l.s4 %v1986_v30  ;;  %v1265_v32 = vrot.slane %v1260_v29, %v1264_v27 }
  0x8c   : > { %1201 = vmatprep.subr.bf16.mxu1 %v1808_v33  ;;  %v1269_v33 = vrot.slane %v1260_v29, %v1268_v28 }
  0x8e   : > { %1161 = vmatpush1.bf16.msra.mxu0 %v1803_v34 }
  0x8f   : > { %1202 = vmatpush1.bf16.msra.mxu1 %v1806_v35  ;;  %1162 = vmatprep.subr.bf16.mxu0 %v1811_v36  ;;  %v1240_v36 = vunpack.c.0.s8 %v1239_v31 }
  0x90   : > { %1203 = vmatprep.subr.bf16.mxu1 %v1814_v37  ;;  %v1278_v37 = vcombine.low %v1265_v32, %v1269_v33 }
  0x92   : > { %1163 = vmatpush1.bf16.msra.mxu0 %v1809_v38 }
  0x93   : > { %1204 = vmatpush1.bf16.msra.mxu1 %v1812_v39  ;;  %1164 = vmatprep.subr.bf16.mxu0 %v1817_v40 }
  0x94   : > { %1205 = vmatprep.subr.bf16.mxu1 %v1820_v41  ;;  %v1243_v41 = vsub.s32 %v1240_v36, %v2154_v46 }
  0x96   : > { %1165 = vmatpush1.bf16.msra.mxu0 %v1815_v42 }
  0x97   : > { %1206 = vmatpush1.bf16.msra.mxu1 %v1818_v43  ;;  %1166 = vmatprep.subr.bf16.mxu0 %v1823_v44 }
  0x98   : > { %1207 = vmatprep.subr.bf16.mxu1 %v1826_v45 }
  0x9a   : > { %1167 = vmatpush2.bf16.msra.mxu0 %v1821_v47  ;;  %v1286_v47 = vrot.slane %v1278_v37, %v1243_v41 }
  0x9b   : > { %1208 = vmatpush2.bf16.msra.mxu1 %v1824_v48  ;;  %1168 = vmatprep.subr.bf16.mxu0 %v1829_v49 }
  0x9c   : > { %1209 = vmatprep.subr.bf16.mxu1 %v1832_v50 }
  0x9e   : > { %1169 = vmatpush2.bf16.msra.mxu0 %v1827_v52 }
  0x9f   : > { %1210 = vmatpush2.bf16.msra.mxu1 %v1830_v53  ;;  %1170 = vmatprep.subr.bf16.mxu0 %v1835_v54 }
  0xa0   : > { %1211 = vmatprep.subr.bf16.mxu1 %v1838_v55 }
  0xa2   : > { %1171 = vmatpush2.bf16.msra.mxu0 %v1833_v56 }
  0xa3   : > { %1212 = vmatpush2.bf16.msra.mxu1 %v1836_v57  ;;  %1172 = vmatprep.subr.bf16.mxu0 %v1841_v58 }
  0xa4   : > { %1213 = vmatprep.subr.bf16.mxu1 %v1844_v59 }
  0xa6   : > { %1173 = vmatpush2.bf16.msra.mxu0 %v1839_v60 }
  0xa7   : > { %1214 = vmatpush2.bf16.msra.mxu1 %v1842_v61  ;;  %1174 = vmatprep.subr.bf16.mxu0 %v1847_v62 }
  0xa8   : > { %1215 = vmatprep.subr.bf16.mxu1 %v1850_v63 }
  0xaa   : > { %1175 = vmatpush2.bf16.msra.mxu0 %v1845_v0 }
  0xab   : > { %1216 = vmatpush2.bf16.msra.mxu1 %v1848_v1  ;;  %1176 = vmatprep.subr.bf16.mxu0 %v1853_v2 }
  0xac   : > { %1217 = vmatprep.subr.bf16.mxu1 %v1856_v3 }
  0xae   : > { %1177 = vmatpush2.bf16.msra.mxu0 %v1851_v4 }
  0xaf   : > { %1218 = vmatpush2.bf16.msra.mxu1 %v1854_v5  ;;  %1178 = vmatprep.subr.bf16.mxu0 %v1859_v6 }
  0xb0   : > { %1219 = vmatprep.subr.bf16.mxu1 %v1862_v7 }
  0xb2   : > { %1179 = vmatpush2.bf16.msra.mxu0 %v1857_v8 }
  0xb3   : > { %1220 = vmatpush2.bf16.msra.mxu1 %v1860_v10  ;;  %1180 = vmatprep.subr.bf16.mxu0 %v1865_v11 }
  0xb4   : > { %1221 = vmatprep.subr.bf16.mxu1 %v1868_v12 }
  0xb6   : > { %1181 = vmatpush2.bf16.msra.mxu0 %v1863_v14 }
  0xb7   : > { %1222 = vmatpush2.bf16.msra.mxu1 %v1866_v15 }
  0xb9   : > { %1183 = vmatmul.mubr.bf16.vlgmr.msra.gmra.mxu0 %v2185_v9  ;;  %v1272_v9 = vsub.s32 2, %v2154_v46 }
  0xba   : > { %1224 = vmatmul.mubr.bf16.vlgmr.msra.gmra.mxu1 %v2192_v13  ;;  %v1276_v13 = vsub.s32 3, %v2154_v46 }
  0xbb   : > { %v1273_v34 = vrot.slane %v1260_v29, %v1272_v9 }
  0xbc   : > { %v1277_v35 = vrot.slane %v1260_v29, %v1276_v13 }
  0xbe   : > { %v1279_v38 = vcombine.low %v1273_v34, %v1277_v35 }
  0xc0   : > { %v1293_v48 = vrot.slane %v1279_v38, %v1243_v41 }
  0xc2   : > { %v1294_v57 = vcombine.low %v1286_v47, %v1293_v48 }
 0x139   : > { %v1102_v16 = vpop.f32.mrf.mxu0 }
 0x13a   : > { %v1143_v17 = vpop.f32.mrf.mxu1 }
 0x13b   : > { %v1144_v18 = vadd.f32 %v1143_v17, %v1102_v16  ;;  %v1104_v19 = vpop.f32.mrf.mxu0 }
 0x13c   : > { %v1145_v20 = vpop.f32.mrf.mxu1 }
 0x13d   : > { %v1146_v21 = vadd.f32 %v1145_v20, %v1104_v19  ;;  %v1106_v22 = vpop.f32.mrf.mxu0 }
 0x13e   : > { %v1147_v23 = vpop.f32.mrf.mxu1 }
 0x13f   : > { %v1236_v24 = vcombine.low %v1144_v18, %v1146_v21  ;;  %v1107_v25 = vpop.f32.mrf.mxu0 }
 0x140   : > { %v1148_v26 = vpop.f32.mrf.mxu1 }
 0x141   : > { %v1244_v55 = vrot.slane %v1236_v24, %v1243_v41 }
 0x179   : > { %v1184_v39 = vpop.f32.mrf.mxu0 }
 0x17a   : > { %v1225_v40 = vpop.f32.mrf.mxu1 }
 0x17b   : > { %v1186_v42 = vpop.f32.mrf.mxu0  ;;  %v1226_v44 = vadd.f32 %v1225_v40, %v1184_v39 }
 0x17c   : > { %v1227_v43 = vpop.f32.mrf.mxu1 }
 0x17d   : > { %v1228_v45 = vadd.f32 %v1227_v43, %v1186_v42  ;;  %v1188_v49 = vpop.f32.mrf.mxu0 }
 0x17e   : > { %v1229_v50 = vpop.f32.mrf.mxu1 }
 0x17f   : > { %v1237_v52 = vcombine.low %v1226_v44, %v1228_v45  ;;  %v1189_v53 = vpop.f32.mrf.mxu0 }
 0x180   : > { %v1230_v54 = vpop.f32.mrf.mxu1 }
 0x181   : > { %v1251_v56 = vrot.slane %v1237_v52, %v1243_v41 }
 0x183   : > { %v1252_v58 = vcombine.low %v1244_v55, %v1251_v56 }
 0x185   : > { %v1296_v59 = vadd.f32 %v1294_v57, %v1252_v58 }
 0x187   : > { %v1297_v60 = vmax.f32 %v1296_v59, 0.0 }
 0x189   : > { %v1299_v46 = vcombine.high %v1297_v60, %v1297_v60  ;;  %v1306_v61 = vrot.slane %v1297_v60, %v1243_v41 }
 0x18b   : > { %v1313_v62 = vrot.slane %v1299_v46, %v1243_v41  ;;  %v1314_v63 = vcombine.high %v1306_v61, %v1306_v61 }
 0x18d   : > { %v1315_v0 = vcombine.high %v1313_v62, %v1313_v62  ;;  %v1606_v1 = vpack.c.bf16 %v1314_v63, %v1306_v61 }
 0x18f   : > { %v1607_v2 = vpack.c.bf16 %v1315_v0, %v1313_v62  ;;  %v1336_v3 = vrot.slane %v1606_v1, %v2161_v51 }
 0x191   : > { %v1343_v4 = vrot.slane %v1607_v2, %v2161_v51 }
 0x193   : > { %v1344_v5 = vcombine.low %v1336_v3, %v1343_v4 }
 0x195   : > { %1608 = vst.sshfl [vmem:[%s262_s28] sm:$0x55 pattern:$0x73625140] %v1344_v5 }
 0x196 PF: > { %s19_s17 = sadd.s32 1, %s1979_s17   ;;  %s2298_s12 = smov %s1963_s13 }
 0x197   : > { %p16_p9 = scmp.ge.s32.totalorder %s19_s17, 4   ;;  %s2299_s13 = smov %s1967_s14 }
 0x198   : > { %s2300_s14 = smov %s2056_s24  ;;  %s2301_s15 = smov %s1975_s16 }
 0x199   : > { %s2302_s16 = smov %s2304_s19  ;;  %18 = sbr.rel (!%p16_p9) target bundleno = 6 (0x6), region = 96 }
 0x19e   :  { %1374 = vsyncpa [#allocation4], 1 }
 0x19f   :  { %1376 = vsyncpa [#allocation4 + $0x1], 1 }
 0x1a0   :  { %1377 = vsyncpa [#allocation6], 1 }
 0x1a1   :  { %1379 = vsyncpa [#allocation6 + $0x1], 1 }

// kernel: pose_keypoint_dct_forward.5
= control target key start
LH: loop header
LB: loop body
LE: loop exit
PB: predicated region body
PF: predicated region fallthrough
CT: control target
= control target key end

     0   :  { %8 = vsyncpa [#allocation4], 0  ;;  %s1665_s0 = inlined_call_operand.vmem [shape: bf16[2,1024], index: 0, kind: input, shape index: {}]   ;;  %s1666_s1 = inlined_call_operand.hbm [shape: bf16[1,7,1024,128], index: 1, kind: input, shape index: {}]   ;;  %s1667_s2 = inlined_call_operand.vmem [shape: f32[1,896], index: 2, kind: input, shape index: {}]   ;;  %s1668_s3 = inlined_call_operand.vmem [shape: f32[2,896], index: 3, kind: output, shape index: {}]  }
   0x1   :  { %10 = vsyncpa [#allocation4 + $0x1], 0  ;;  %s1484_s12 = smov 0   ;;  %s1486_s13 = smov 0  }
   0x2   :  { %s1488_s14 = smov 0   ;;  %s1490_s15 = smov 0  }
   0x3   :  { %s1492_s16 = smov 0   ;;  %s1494_s17 = smov 0  }
   0x4 LB: > { %s1088_s18 = sadd.s32 4294967295, %s1457_s17   ;;  %s28_s19 = sadd.s32 1, %s1453_s16  ;;  %s1457_s17 = sphi %s1494_s17, %s16_s17   ;;  %s1453_s16 = sphi %s1492_s16, %s1676_s16   ;;  %s1449_s15 = sphi %s1490_s15, %s1675_s15   ;;  %s1445_s14 = sphi %s1488_s14, %s1674_s14   ;;  %s1441_s13 = sphi %s1486_s13, %s1673_s13   ;;  %s1437_s12 = sphi %s1484_s12, %s1672_s12  }
   0x5   : > { %p30_p0 = scmp.ge.s32.totalorder %s28_s19, 7  ;;  %s63_s20 = sadd.s32 1, %s1445_s14 }
   0x6   : > { %p70_p1 = scmp.ne.s32.totalorder %s1445_s14, %s1441_s13  ;;  %p71_p2 = scmp.eq.s32.totalorder %s1457_s17, 0 }
   0x7   : > { %s1678_s19 = smov (%p30_p0, %s28_s19), 0  ;;  %p76_p4 = scmp.ne.s32.totalorder %s1441_s13, %s1437_s12 }
   0x8   : > { %p1520_p3 = por %p71_p2, %p70_p1  ;;  %s59_s22 = ssub.s32 %s1453_s16, %s1678_s19 }
   0x9   : > { %p77_p5 = scmp.eq.s32.totalorder %s1088_s18, 0  ;;  %p61_p6 = scmp.eq.s32.totalorder %s59_s22, 0 }
   0xa   : > { %p1261_p8 = scmp.lt.s32.totalorder %s1457_s17, 7  ;;  %s160_s25 = sand.u32 1, %s1445_s14  }
   0xb   : > { %p1527_p7 = por %p77_p5, %p76_p4  ;;  %s1166_s26 = sshll.u32 %s1453_s16, 13 }
   0xc   : > { %s1533_s24 = scalar_select %p61_p6, %s1445_s14, %s63_s20  }
   0xd   : > { %s1093_s27 = sshll.u32 %s160_s25, 9  ;;  %s172_s30 = scalar_lea.hbm %s1666_s1, %s1166_s26 }
   0xe   : > { %s164_s4 = scalar_lea.vmem [#allocation3], %s1093_s27  ;;  %p1542_p9 = pnand %p1261_p8, %p1520_p3 }
   0xf   : > { %s173_s5 = sshll.u32 %s164_s4, 4  ;;  %s161_s7 = scalar_lea.sflag [#allocation4], %s160_s25  ;;  %s174_s5 = int_to_ptr.vmem [resolvable:$true] %s173_s5 }
  0x10   : > { %p1381_p10 = pneg %p1542_p9  ;;  %s1392_s8 = scalar_lea.vmem %s174_s5, 8192 }
  0x11   : > { %p1393_p11 = scmp.ne.s32.totalorder %s174_s5, %s1392_s8  ;;  %s1459_s9 = smov [#allocation3]  }
  0x12   : > { %s1397_s10 = sshll.u32 %s1459_s9, 4  ;;  %s1398_s10 = int_to_ptr.vmem [resolvable:$false] %s1397_s10 }
  0x13   : > { %p1395_p12 = pnand %p1393_p11, %p1381_p10  ;;  %s1399_s11 = scalar_lea.vmem %s1398_s10, 16384 }
  0x14   : > { %p1400_p0 = scmp.lt.s32.totalorder %s174_s5, %s1398_s10  ;;  %p1401_p1 = scmp.lt.s32.totalorder %s1399_s11, %s1392_s8 }
  0x15   : > { %p1396_p13 = pneg %p1395_p12 }
  0x16   : > { %p1402_p2 = por %p1401_p1, %p1400_p0 }
  0x18   : > { %p1403_p3 = pnand %p1402_p2, %p1396_p13 }
  0x1a   : > { %1406 = shalt.err (!%p1403_p3)
}
  0x1b   : > { %s1460_s12 = smov 64   ;;  %s1461_s18 = smov 4  }
  0x1c   : > { %1260 = dma.hbm_to_vmem [thread:$0]  (!%p1542_p9), %s172_s30, 8192, %s174_s5, %s161_s7, %s1460_s12, %s1460_s12, %s1461_s18  }
  0x1d   : > { %p1096_p4 = scmp.ge.s32.totalorder %s1457_s17, 1  ;;  %p187_p5 = scmp.lt.s32.totalorder %s1457_s17, 8 }
  0x1f   : > { %p188_p6 = pnand %p1096_p4, %p187_p5 }
  0x20   : > { %s193_s20 = sand.u32 (!%p188_p6), 1, %s1441_s13  }
  0x21   : > { %191 = sbr.rel (%p188_p6) target bundleno = 319 (0x13f), region = 32  ;;  %s1097_s21 = sshll.u32 (!%p188_p6), %s193_s20, 9 }
  0x22   : > { %s194_s22 = scalar_lea.sflag (!%p188_p6), [#allocation4], %s193_s20  ;;  %s1553_s25 = scalar_lea.vmem (!%p188_p6), [#allocation3], %s1097_s21 }
  0x26   : > { %1432 = dma.done.wait (%p1527_p7), %s194_s22, 8192  }
  0x27   : > { %1434 = vsyncadd (%p1527_p7), %s194_s22, 4294959104  ;;  %v1314_v0 = vld [vmem:[%s1553_s25 + $0x78] sm:$0xff]   ;;  %v1318_v4 = vld [vmem:[%s1553_s25 + $0x70] sm:$0xff]   ;;  %v1462_v22 = vmov 1966171168   ;;  %v379_v24 = vlaneseq  ;;  %p231_p7 = scmp.lt.s32.totalorder %s1449_s15, 6 }
  0x28   : > { %v1315_v1 = vld [vmem:[%s1553_s25 + $0xf8] sm:$0xff]   ;;  %1167 = vmatprep.subr.bf16.mxu0 %v1314_v0  ;;  %v1319_v5 = vld [vmem:[%s1553_s25 + $0xf0] sm:$0xff]   ;;  %v1322_v8 = vld [vmem:[%s1553_s25 + $0x68] sm:$0xff]   ;;  %v377_v23 = vunpack.c.l.s4 %v1462_v22 }
  0x29   : > { %v1316_v2 = vld [vmem:[%s1553_s25 + $0x38] sm:$0xff]   ;;  %1189 = vmatprep.subr.bf16.mxu1 %v1315_v1  ;;  %v1320_v6 = vld [vmem:[%s1553_s25 + $0x30] sm:$0xff]   ;;  %v1323_v9 = vld [vmem:[%s1553_s25 + $0xe8] sm:$0xff]   ;;  %v380_v30 = vshrl.u32 %v379_v24, 7  ;;  %s1680_s15 = smov (!%p231_p7, %s1449_s15), 6 }
  0x2a   : > { %v1317_v3 = vld [vmem:[%s1553_s25 + $0xb8] sm:$0xff]   ;;  %1168 = vmatpush3.bf16.msra.mxu0 %v1316_v2  ;;  %v1321_v7 = vld [vmem:[%s1553_s25 + $0xb0] sm:$0xff]   ;;  %v1324_v10 = vld [vmem:[%s1553_s25 + $0x28] sm:$0xff]   ;;  %v378_v29 = vunpack.c.0.s8 %v377_v23  ;;  %s233_s29 = scalar_lea.vmem %s1667_s2, %s1680_s15  ;;  %s1098_s30 = sshll.u32 %s1680_s15, 1 }
  0x2b   : > { %1190 = vmatpush3.bf16.msra.mxu1 %v1317_v3  ;;  %1169 = vmatprep.subr.bf16.mxu0 %v1318_v4  ;;  %v1325_v11 = vld [vmem:[%s1553_s25 + $0xa8] sm:$0xff]   ;;  %v1326_v12 = vld [vmem:[%s1553_s25 + $0x60] sm:$0xff]   ;;  %v1330_v16 = vld [vmem:[%s1553_s25 + $0x58] sm:$0xff]   ;;  %s237_s6 = scalar_lea.vmem %s1668_s3, %s1098_s30 }
  0x2c   : > { %1191 = vmatprep.subr.bf16.mxu1 %v1319_v5  ;;  %v1327_v13 = vld [vmem:[%s1553_s25 + $0xe0] sm:$0xff]   ;;  %v1331_v17 = vld [vmem:[%s1553_s25 + $0xd8] sm:$0xff]   ;;  %v1334_v20 = vld [vmem:[%s1553_s25 + $0x50] sm:$0xff]   ;;  %v1589_v35 = vsub.s32 %v378_v29, %v380_v30 }
  0x2d   : > { %v1328_v14 = vld [vmem:[%s1553_s25 + $0x20] sm:$0xff]   ;;  %v1332_v18 = vld [vmem:[%s1553_s25 + $0x18] sm:$0xff]   ;;  %v1335_v21 = vld [vmem:[%s1553_s25 + $0xd0] sm:$0xff]  }
  0x2e   : > { %1170 = vmatpush3.bf16.msra.mxu0 %v1320_v6  ;;  %v1329_v15 = vld [vmem:[%s1553_s25 + $0xa0] sm:$0xff]   ;;  %v1333_v19 = vld [vmem:[%s1553_s25 + $0x98] sm:$0xff]   ;;  %v1336_v25 = vld [vmem:[%s1553_s25 + $0x10] sm:$0xff]  }
  0x2f   : > { %1192 = vmatpush3.bf16.msra.mxu1 %v1321_v7  ;;  %1171 = vmatprep.subr.bf16.mxu0 %v1322_v8  ;;  %v1337_v26 = vld [vmem:[%s1553_s25 + $0x90] sm:$0xff]   ;;  %v1338_v27 = vld [vmem:[%s1553_s25 + $0x48] sm:$0xff]   ;;  %v1342_v33 = vld [vmem:[%s1553_s25 + $0x40] sm:$0xff]  }
  0x30   : > { %1193 = vmatprep.subr.bf16.mxu1 %v1323_v9  ;;  %v1339_v28 = vld [vmem:[%s1553_s25 + $0xc8] sm:$0xff]   ;;  %v1343_v34 = vld [vmem:[%s1553_s25 + $0xc0] sm:$0xff]   ;;  %v1347_v41 = vld [vmem:[%s1553_s25 + $0x178] sm:$0xff]  }
  0x31   : > { %v1340_v31 = vld [vmem:[%s1553_s25 + $0x8] sm:$0xff]   ;;  %v1344_v36 = vld [vmem:[%s1553_s25] sm:$0xff]   ;;  %v1348_v42 = vld [vmem:[%s1553_s25 + $0x1f8] sm:$0xff]  }
  0x32   : > { %1172 = vmatpush3.bf16.msra.mxu0 %v1324_v10  ;;  %v1341_v32 = vld [vmem:[%s1553_s25 + $0x88] sm:$0xff]   ;;  %v1345_v37 = vld [vmem:[%s1553_s25 + $0x80] sm:$0xff]   ;;  %v1349_v47 = vld [vmem:[%s1553_s25 + $0x138] sm:$0xff]  }
  0x33   : > { %1194 = vmatpush3.bf16.msra.mxu1 %v1325_v11  ;;  %1173 = vmatprep.subr.bf16.mxu0 %v1326_v12  ;;  %v245_v38 = vld [vmem:[%s1665_s0] sm:$0xff]  ;;  %v1351_v50 = vld [vmem:[%s1553_s25 + $0x170] sm:$0xff]   ;;  %v1355_v57 = vld [vmem:[%s1553_s25 + $0x168] sm:$0xff]  }
  0x34   : > { %1195 = vmatprep.subr.bf16.mxu1 %v1327_v13  ;;  %v375_v39 = vcombine.high %v245_v38, %v245_v38  ;;  %v382_v40 = vrot.slane %v245_v38, %v1589_v35  ;;  %v1350_v52 = vld [vmem:[%s1553_s25 + $0x1b8] sm:$0xff]   ;;  %v1352_v54 = vld [vmem:[%s1553_s25 + $0x1f0] sm:$0xff]   ;;  %v1356_v59 = vld [vmem:[%s1553_s25 + $0x1e8] sm:$0xff]  }
  0x35   : > { %v1353_v55 = vld [vmem:[%s1553_s25 + $0x130] sm:$0xff]   ;;  %v1357_v60 = vld [vmem:[%s1553_s25 + $0x128] sm:$0xff]   ;;  %v1359_v61 = vld [vmem:[%s1553_s25 + $0x160] sm:$0xff]  }
  0x36   : > { %1174 = vmatpush3.bf16.msra.mxu0 %v1328_v14  ;;  %v390_v43 = vcombine.high %v382_v40, %v382_v40  ;;  %v398_v44 = vrot.slane %v382_v40, %v1589_v35  ;;  %v1601_v45 = vrot.slane %v375_v39, %v1589_v35  ;;  %v1354_v58 = vld [vmem:[%s1553_s25 + $0x1b0] sm:$0xff]   ;;  %v1358_v62 = vld [vmem:[%s1553_s25 + $0x1a8] sm:$0xff]   ;;  %v1360_v63 = vld [vmem:[%s1553_s25 + $0x1e0] sm:$0xff]  }
  0x37   : > { %1196 = vmatpush3.bf16.msra.mxu1 %v1329_v15  ;;  %1175 = vmatprep.subr.bf16.mxu0 %v1330_v16  ;;  %v1361_v0 = vld [vmem:[%s1553_s25 + $0x120] sm:$0xff]   ;;  %v1363_v1 = vld [vmem:[%s1553_s25 + $0x158] sm:$0xff]   ;;  %v1367_v5 = vld [vmem:[%s1553_s25 + $0x150] sm:$0xff]  }
  0x38   : > { %1197 = vmatprep.subr.bf16.mxu1 %v1331_v17  ;;  %v412_v46 = vrot.slane %v390_v43, %v1589_v35  ;;  %v391_v48 = vcombine.high %v1601_v45, %v1601_v45  ;;  %v420_v49 = vcombine.high %v398_v44, %v398_v44  ;;  %v1362_v2 = vld [vmem:[%s1553_s25 + $0x1a0] sm:$0xff]   ;;  %v1364_v3 = vld [vmem:[%s1553_s25 + $0x1d8] sm:$0xff]   ;;  %v1368_v7 = vld [vmem:[%s1553_s25 + $0x1d0] sm:$0xff]   ;;  %v405_v17 = vrot.slane %v1601_v45, %v1589_v35 }
  0x39   : > { %v1365_v4 = vld [vmem:[%s1553_s25 + $0x118] sm:$0xff]   ;;  %v1369_v8 = vld [vmem:[%s1553_s25 + $0x110] sm:$0xff]   ;;  %v1371_v9 = vld [vmem:[%s1553_s25 + $0x148] sm:$0xff]  }
  0x3a   : > { %1176 = vmatpush3.bf16.msra.mxu0 %v1332_v18  ;;  %848 = vmatprep.mubr.bf16.mxu0 %v412_v46  ;;  %v422_v51 = vcombine.high %v412_v46, %v412_v46  ;;  %v419_v53 = vrot.slane %v391_v48, %v1589_v35  ;;  %v1366_v6 = vld [vmem:[%s1553_s25 + $0x198] sm:$0xff]   ;;  %v1370_v10 = vld [vmem:[%s1553_s25 + $0x190] sm:$0xff]   ;;  %v1372_v11 = vld [vmem:[%s1553_s25 + $0x1c8] sm:$0xff]  }
  0x3b   : > { %1198 = vmatpush3.bf16.msra.mxu1 %v1333_v19  ;;  %1177 = vmatprep.subr.bf16.mxu0 %v1334_v20  ;;  %v1373_v12 = vld [vmem:[%s1553_s25 + $0x108] sm:$0xff]   ;;  %v1375_v13 = vld [vmem:[%s1553_s25 + $0x140] sm:$0xff]   ;;  %v421_v19 = vcombine.high %v405_v17, %v405_v17  ;;  %v1463_v20 = vmov 0.0   ;;  %v1163_v46 = vld [vmem:[%s233_s29] ss:$0 sm:$0xff] }
  0x3c   : > { %1199 = vmatprep.subr.bf16.mxu1 %v1335_v21  ;;  %888 = vmatprep.mubr.bf16.mxu1 %v422_v51  ;;  %v423_v56 = vcombine.high %v419_v53, %v419_v53  ;;  %v1374_v14 = vld [vmem:[%s1553_s25 + $0x188] sm:$0xff]   ;;  %v1376_v15 = vld [vmem:[%s1553_s25 + $0x1c0] sm:$0xff]   ;;  %243 = vst [vmem:[#allocation2] sm:$0x3] %v1463_v20 }
  0x3d   : > { %v1377_v16 = vld [vmem:[%s1553_s25 + $0x100] sm:$0xff]  }
  0x3e   : > { %1178 = vmatpush3.bf16.msra.mxu0 %v1336_v25  ;;  %v1378_v18 = vld [vmem:[%s1553_s25 + $0x180] sm:$0xff]  }
  0x3f   : > { %1200 = vmatpush3.bf16.msra.mxu1 %v1337_v26  ;;  %1179 = vmatprep.subr.bf16.mxu0 %v1338_v27 }
  0x40   : > { %1201 = vmatprep.subr.bf16.mxu1 %v1339_v28 }
  0x42   : > { %1180 = vmatpush3.bf16.msra.mxu0 %v1340_v31 }
  0x43   : > { %1202 = vmatpush3.bf16.msra.mxu1 %v1341_v32  ;;  %1181 = vmatprep.subr.bf16.mxu0 %v1342_v33  ;;  %v244_v40 = vld [vmem:[#allocation2] sm:$0x3] }
  0x44   : > { %1203 = vmatprep.subr.bf16.mxu1 %v1343_v34 }
  0x46   : > { %1182 = vmatpush3.bf16.msra.mxu0 %v1344_v36 }
  0x47   : > { %1204 = vmatpush3.bf16.msra.mxu1 %v1345_v37  ;;  %1211 = vmatprep.subr.bf16.mxu0 %v1347_v41 }
  0x48   : > { %1233 = vmatprep.subr.bf16.mxu1 %v1348_v42 }
  0x49   : > { %849 = vmatmul.mubr.bf16.vlgmr.msra.gmra.mxu0 %v398_v44 }
  0x4a   : > { %1212 = vmatpush3.bf16.msra.mxu0 %v1349_v47  ;;  %889 = vmatmul.mubr.bf16.vlgmr.msra.gmra.mxu1 %v420_v49 }
  0x4b   : > { %1213 = vmatprep.subr.bf16.mxu0 %v1351_v50  ;;  %1234 = vmatpush3.bf16.msra.mxu1 %v1350_v52 }
  0x4c   : > { %928 = vmatprep.mubr.bf16.mxu0 %v419_v53  ;;  %1235 = vmatprep.subr.bf16.mxu1 %v1352_v54 }
  0x4d   : > { %968 = vmatprep.mubr.bf16.mxu1 %v423_v56 }
  0x4e   : > { %1214 = vmatpush3.bf16.msra.mxu0 %v1353_v55 }
  0x4f   : > { %1215 = vmatprep.subr.bf16.mxu0 %v1355_v57  ;;  %1236 = vmatpush3.bf16.msra.mxu1 %v1354_v58 }
  0x50   : > { %1237 = vmatprep.subr.bf16.mxu1 %v1356_v59 }
  0x52   : > { %1216 = vmatpush3.bf16.msra.mxu0 %v1357_v60 }
  0x53   : > { %1217 = vmatprep.subr.bf16.mxu0 %v1359_v61  ;;  %1238 = vmatpush3.bf16.msra.mxu1 %v1358_v62 }
  0x54   : > { %1239 = vmatprep.subr.bf16.mxu1 %v1360_v63 }
  0x56   : > { %1218 = vmatpush3.bf16.msra.mxu0 %v1361_v0 }
  0x57   : > { %1219 = vmatprep.subr.bf16.mxu0 %v1363_v1  ;;  %1240 = vmatpush3.bf16.msra.mxu1 %v1362_v2 }
  0x58   : > { %1241 = vmatprep.subr.bf16.mxu1 %v1364_v3 }
  0x5a   : > { %1220 = vmatpush3.bf16.msra.mxu0 %v1365_v4 }
  0x5b   : > { %1221 = vmatprep.subr.bf16.mxu0 %v1367_v5  ;;  %1242 = vmatpush3.bf16.msra.mxu1 %v1366_v6 }
  0x5c   : > { %1243 = vmatprep.subr.bf16.mxu1 %v1368_v7 }
  0x5e   : > { %1222 = vmatpush3.bf16.msra.mxu0 %v1369_v8 }
  0x5f   : > { %1223 = vmatprep.subr.bf16.mxu0 %v1371_v9  ;;  %1244 = vmatpush3.bf16.msra.mxu1 %v1370_v10 }
  0x60   : > { %1245 = vmatprep.subr.bf16.mxu1 %v1372_v11 }
  0x62   : > { %1224 = vmatpush3.bf16.msra.mxu0 %v1373_v12 }
  0x63   : > { %1225 = vmatprep.subr.bf16.mxu0 %v1375_v13  ;;  %1246 = vmatpush3.bf16.msra.mxu1 %v1374_v14 }
  0x64   : > { %1247 = vmatprep.subr.bf16.mxu1 %v1376_v15 }
  0x66   : > { %1226 = vmatpush3.bf16.msra.mxu0 %v1377_v16 }
  0x67   : > { %1248 = vmatpush3.bf16.msra.mxu1 %v1378_v18 }
  0x69   : > { %929 = vmatmul.mubr.bf16.vlgmr.msra.gmra.mxu0 %v405_v17 }
  0x6a   : > { %969 = vmatmul.mubr.bf16.vlgmr.msra.gmra.mxu1 %v421_v19 }
 0x109   : > { %v1183_v21 = vpop.f32.mrf.mxu0 }
 0x10a   : > { %v1205_v22 = vpop.f32.mrf.mxu1 }
 0x10b   : > { %v1184_v23 = vpop.f32.mrf.mxu0 }
 0x10c   : > { %v1206_v24 = vpop.f32.mrf.mxu1  ;;  %v1185_v29 = vadd.f32 %v1184_v23, %v1183_v21 }
 0x10d   : > { %v1186_v25 = vpop.f32.mrf.mxu0  ;;  %v1207_v30 = vadd.f32 %v1206_v24, %v1205_v22 }
 0x10e   : > { %v1208_v26 = vpop.f32.mrf.mxu1 }
 0x10f   : > { %v1187_v27 = vpop.f32.mrf.mxu0  ;;  %v891_v34 = vadd.f32 %v1207_v30, %v1185_v29 }
 0x110   : > { %v1209_v28 = vpop.f32.mrf.mxu1 }
 0x129   : > { %v1227_v31 = vpop.f32.mrf.mxu0 }
 0x12a   : > { %v1249_v32 = vpop.f32.mrf.mxu1 }
 0x12b   : > { %v1228_v33 = vpop.f32.mrf.mxu0 }
 0x12c   : > { %v1229_v35 = vadd.f32 %v1228_v33, %v1227_v31  ;;  %v1250_v36 = vpop.f32.mrf.mxu1 }
 0x12d   : > { %v1230_v37 = vpop.f32.mrf.mxu0  ;;  %v1251_v39 = vadd.f32 %v1250_v36, %v1249_v32 }
 0x12e   : > { %v931_v38 = vadd.f32 %v1229_v35, %v891_v34  ;;  %v1252_v41 = vpop.f32.mrf.mxu1 }
 0x12f   : > { %v1231_v42 = vpop.f32.mrf.mxu0 }
 0x130   : > { %v971_v43 = vadd.f32 %v1251_v39, %v931_v38  ;;  %v1253_v44 = vpop.f32.mrf.mxu1 }
 0x132   : > { %v976_v45 = vadd.f32 %v971_v43, %v244_v40 }
 0x134   : > { %977 = vst [vmem:[#allocation2] sm:$0x3] %v976_v45 }
 0x13b   : > { %v981_v47 = vld [vmem:[#allocation2] sm:$0x3] }
 0x13c   : > { %v989_v48 = vadd.f32 %v1163_v46, %v981_v47 }
 0x13e   : > { %990 = vst [vmem:[%s237_s6] sm:$0x3] %v989_v48 }
 0x13f PF: > { %s16_s17 = sadd.s32 1, %s1457_s17   ;;  %s1672_s12 = smov %s1441_s13 }
 0x140   : > { %p13_p8 = scmp.ge.s32.totalorder %s16_s17, 9   ;;  %s1673_s13 = smov %s1445_s14 }
 0x141   : > { %s1674_s14 = smov %s1533_s24  ;;  %s1675_s15 = smov %s1453_s16 }
 0x142   : > { %s1676_s16 = smov %s1678_s19  ;;  %15 = sbr.rel (!%p13_p8) target bundleno = 4 (0x4), region = 86 }
 0x147   :  { %1010 = vsyncpa [#allocation4], 1 }
 0x148   :  { %1012 = vsyncpa [#allocation4 + $0x1], 1 }

// kernel: pose_keypoint_dct_forward.3
= control target key start
LH: loop header
LB: loop body
LE: loop exit
PB: predicated region body
PF: predicated region fallthrough
CT: control target
= control target key end

     0   :  { %10 = vsyncpa [#allocation4], 0  ;;  %s11486_s0 = inlined_call_operand.vmem [shape: f32[2,16,16,3], index: 0, kind: input, shape index: {}]   ;;  %s11487_s1 = inlined_call_operand.hbm [shape: f32[9,3,16], index: 1, kind: input, shape index: {}]   ;;  %s11488_s2 = inlined_call_operand.hbm [shape: f32[1,16], index: 2, kind: input, shape index: {}]   ;;  %s11489_s3 = inlined_call_operand.hbm [shape: f32[9,16,32], index: 3, kind: input, shape index: {}]   ;;  %s11490_s4 = inlined_call_operand.hbm [shape: f32[1,32], index: 4, kind: input, shape index: {}]   ;;  %s11491_s5 = inlined_call_operand.vmem [shape: bf16[2,32,16], index: 5, kind: output, shape index: {}]  }
   0x1   :  { %11 = vsyncpa [#allocation6], 0 }
   0x2   :  { %12 = vsyncpa [#allocation9], 0  ;;  %s9310_s18 = smov 0  }
   0x3 LB: > { %s9269_s19 = smov [#allocation5]   ;;  %s9316_s21 = sadd.s32 4294967295, %s9267_s18   ;;  %s9267_s18 = sphi %s9310_s18, %s18_s18  }
   0x4   : > { %s185_s20 = sshll.u32 %s9269_s19, 4  ;;  %p7547_p0 = scmp.ge.s32.totalorder %s9267_s18, 1  ;;  %s186_s20 = int_to_ptr.vmem [resolvable:$true] %s185_s20 }
   0x5   : > { %p159_p1 = scmp.lt.s32.totalorder %s9267_s18, 3  ;;  %p9117_p2 = scmp.eq.s32.totalorder %s9316_s21, 0 }
   0x6   : > { %s9270_s23 = smov [#allocation3]   ;;  %s9271_s26 = smov [#allocation7]  }
   0x7   : > { %p9321_p3 = pnand %p7547_p0, %p159_p1  ;;  %s171_s24 = sshll.u32 %s9270_s23, 4  ;;  %s9327_s24 = int_to_ptr.vmem [resolvable:$true] %s171_s24 }
   0x8   : > { %s195_s27 = sshll.u32 %s9271_s26, 4  ;;  %s9156_s28 = scalar_lea.vmem %s186_s20, 16  ;;  %s9335_s27 = int_to_ptr.vmem [resolvable:$true] %s195_s27 }
   0x9   : > { %p9104_p4 = pneg %p9321_p3  ;;  %p9157_p7 = scmp.ne.s32.totalorder %s186_s20, %s9156_s28 }
   0xa   : > { %s9163_s29 = scalar_lea.vmem %s186_s20, 32  ;;  %p9164_p10 = scmp.lt.s32.totalorder %s186_s20, %s186_s20 }
   0xb   : > { %p9331_p5 = pnand %p9117_p2, %p9104_p4  ;;  %p9165_p11 = scmp.lt.s32.totalorder %s9163_s29, %s9156_s28 }
   0xd   : > { %p9147_p6 = pneg %p9331_p5  ;;  %p9166_p12 = por %p9165_p11, %p9164_p10 }
   0xf   : > { %p9159_p8 = pnand %p9157_p7, %p9147_p6 }
  0x11   : > { %p9160_p9 = pneg %p9159_p8 }
  0x13   : > { %p9167_p13 = pnand %p9166_p12, %p9160_p9 }
  0x15   : > { %9170 = shalt.err (!%p9167_p13)
}
  0x16   : > { %9110 = dma.hbm_to_vmem [thread:$0]  (!%p9331_p5), %s11488_s2, 16, %s186_s20, [#allocation6]  }
  0x17   : > { %s9182_s7 = scalar_lea.vmem %s9327_s24, 576  ;;  %p9190_p7 = scmp.lt.s32.totalorder %s9327_s24, %s9327_s24 }
  0x18   : > { %p9183_p0 = scmp.ne.s32.totalorder %s9327_s24, %s9182_s7  ;;  %p9191_p8 = scmp.lt.s32.totalorder %s9182_s7, %s9182_s7 }
  0x1a   : > { %p9185_p1 = pnand %p9183_p0, %p9147_p6  ;;  %p9192_p9 = por %p9191_p8, %p9190_p7 }
  0x1c   : > { %p9186_p4 = pneg %p9185_p1 }
  0x1e   : > { %p9193_p10 = pnand %p9192_p9, %p9186_p4 }
  0x20   : > { %9196 = shalt.err (!%p9193_p10)
}
  0x21   : > { %s9272_s8 = smov 64   ;;  %s9273_s9 = smov 4  }
  0x22   : > { %9107 = dma.hbm_to_vmem [thread:$0]  (!%p9331_p5), %s11487_s1, 576, %s9327_s24, [#allocation4], %s9272_s8, %s9272_s8, %s9273_s9  }
  0x23   : > { %s9208_s12 = scalar_lea.vmem %s9335_s27, 2304  ;;  %p9216_p0 = scmp.lt.s32.totalorder %s9335_s27, %s9335_s27 }
  0x24   : > { %p9209_p11 = scmp.ne.s32.totalorder %s9335_s27, %s9208_s12  ;;  %p9217_p1 = scmp.lt.s32.totalorder %s9208_s12, %s9208_s12 }
  0x26   : > { %p9211_p12 = pnand %p9209_p11, %p9147_p6  ;;  %p9218_p4 = por %p9217_p1, %p9216_p0 }
  0x28   : > { %p9212_p13 = pneg %p9211_p12 }
  0x2a   : > { %p9219_p7 = pnand %p9218_p4, %p9212_p13 }
  0x2c   : > { %9222 = shalt.err (!%p9219_p7)
}
  0x2d   : > { %s9274_s13 = smov 128   ;;  %s9275_s14 = smov 8  }
  0x2e   : > { %9113 = dma.hbm_to_vmem [thread:$0]  (!%p9331_p5), %s11489_s3, 2304, %s9335_s27, [#allocation6], %s9274_s13, %s9274_s13, %s9275_s14  }
  0x2f   : > { %s9276_s17 = smov [#allocation8]  }
  0x30   : > { %s209_s19 = sshll.u32 %s9276_s17, 4  ;;  %s210_s19 = int_to_ptr.vmem [resolvable:$true] %s209_s19 }
  0x31   : > { %s9234_s20 = scalar_lea.vmem %s210_s19, 16  ;;  %s9241_s23 = scalar_lea.vmem %s210_s19, 32 }
  0x32   : > { %p9235_p8 = scmp.ne.s32.totalorder %s210_s19, %s9234_s20  ;;  %p9242_p11 = scmp.lt.s32.totalorder %s210_s19, %s210_s19 }
  0x33   : > { %p9243_p12 = scmp.lt.s32.totalorder %s9241_s23, %s9234_s20 }
  0x34   : > { %p9237_p9 = pnand %p9235_p8, %p9147_p6 }
  0x35   : > { %p9244_p13 = por %p9243_p12, %p9242_p11 }
  0x36   : > { %p9238_p10 = pneg %p9237_p9 }
  0x38   : > { %p9245_p0 = pnand %p9244_p13, %p9238_p10 }
  0x3a   : > { %9248 = shalt.err (!%p9245_p0)
}
  0x3b   : > { %9116 = dma.hbm_to_vmem [thread:$0]  (!%p9331_p5), %s11490_s4, 16, %s210_s19, [#allocation9]  }
  0x3c   : > { %230 = sbr.rel (%p9321_p3) target bundleno = 1218 (0x4c2), region = 40 }
  0x41   : > { %9254 = dma.done.wait (%p9117_p2), [#allocation4], 576  }
  0x42   : > { %9256 = vsyncadd (%p9117_p2), [#allocation4], 4294966720 }
  0x43   : > { %9258 = dma.done.wait (%p9117_p2), [#allocation6], 2320  }
  0x44   : > { %9260 = vsyncadd (%p9117_p2), [#allocation6], 4294964976 }
  0x45   : > { %9262 = dma.done.wait (%p9117_p2), [#allocation9], 16  }
  0x46   : > { %9264 = vsyncadd (%p9117_p2), [#allocation9], 4294967280  ;;  %p270_p3 = scmp.lt.s32.totalorder %s9316_s21, 1 }
  0x48   : > { %s11643_s21 = smov (!%p270_p3, %s9316_s21), 1 }
  0x49   : > { %s8099_s22 = sshll.u32 %s11643_s21, 8  ;;  %s8100_s25 = sshll.u32 %s11643_s21, 4 }
  0x4a   : > { %s9400_s29 = scalar_lea.vmem %s11486_s0, %s8099_s22  ;;  %s9405_s7 = scalar_lea.vmem %s11491_s5, %s8100_s25 }
  0x4b   : > { %v457_v0 = vld [vmem:[#allocation3 + $0x4] sm:$0x7]  ;;  %vm554_vm0 = vcmask 1042432   ;;  %vm312_vm1 = vcmask 23552   ;;  %v306_v1 = vld [vmem:[%s9400_s29 + $0xd0] sm:$0xff]  ;;  %v9277_v2 = vmov 0.0  }
  0x4c   : > { %8492 = vmatprep.subr.msk.mxu0 %vm554_vm0, %v457_v0  ;;  %9086 = vmatprep.subr.msk.mxu1 %vm554_vm0, %v457_v0  ;;  %313 = vst.msk [vmem:[#allocation10] sm:$0xff] %vm312_vm1, %v9277_v2  ;;  %314 = vst.msk [vmem:[#allocation10 + $0x8] sm:$0xff] %vm312_vm1, %v9277_v2  ;;  %v9415_v3 = vld [vmem:[#allocation3 + $0x8] sm:$0x7]  ;;  %vm315_vm2 = vcmask 17408   ;;  %vm321_vm3 = vcmask 16384  }
  0x4d   : > { %318 = vst.msk [vmem:[#allocation10 + $0x132] sm:$0xff] %vm312_vm1, %v9277_v2  ;;  %319 = vst.msk [vmem:[#allocation10 + $0x13a] sm:$0xff] %vm312_vm1, %v9277_v2  ;;  %v307_v4 = vld [vmem:[%s9400_s29 + $0xd8] sm:$0xff]  ;;  %v280_v5 = vld [vmem:[%s9400_s29] sm:$0xff]  ;;  %8493 = vmatpush3.msk.msra.mxu0 %vm554_vm0, %v457_v0  ;;  %9087 = vmatpush3.msk.msra.mxu1 %vm554_vm0, %v457_v0  ;;  %vm5509_vm4 = vcmask 1041409   ;;  %vm5511_vm5 = vcmask 1042434  }
  0x4e   : > { %385 = vst.msk [vmem:[#allocation10 + $0xfd] sm:$0xff] %vm312_vm1, %v306_v1  ;;  %386 = vst.msk [vmem:[#allocation10 + $0x105] sm:$0xff] %vm312_vm1, %v307_v4  ;;  %v308_v6 = vld [vmem:[%s9400_s29 + $0xe0] sm:$0xff]  ;;  %v281_v7 = vld [vmem:[%s9400_s29 + $0x8] sm:$0xff]  ;;  %8592 = vmatprep.subr.msk.mxu0 %vm554_vm0, %v9415_v3  ;;  %vm5513_vm6 = vcmask 1043459   ;;  %vm5515_vm7 = vcmask 1044484  }
  0x4f   : > { %316 = vst.msk [vmem:[#allocation10 + $0x10] sm:$0x3] %vm315_vm2, %v9277_v2  ;;  %320 = vst.msk [vmem:[#allocation10 + $0x142] sm:$0x3] %vm315_vm2, %v9277_v2  ;;  %v309_v8 = vld [vmem:[%s9400_s29 + $0xe8] sm:$0xff]  ;;  %v282_v10 = vld [vmem:[%s9400_s29 + $0x10] sm:$0xff] }
  0x50   : > { %322 = vst.msk [vmem:[#allocation10] sm:$0x1] %vm321_vm3, %v9277_v2  ;;  %323 = vst.msk [vmem:[#allocation10 + $0x12] sm:$0x1] %vm321_vm3, %v9277_v2  ;;  %v423_v9 = vld [vmem:[#allocation3] sm:$0x7] }
  0x51   : > { %324 = vst.msk [vmem:[#allocation10 + $0x24] sm:$0x1] %vm321_vm3, %v9277_v2  ;;  %325 = vst.msk [vmem:[#allocation10 + $0x36] sm:$0x1] %vm321_vm3, %v9277_v2  ;;  %v283_v11 = vld [vmem:[%s9400_s29 + $0x18] sm:$0xff]  ;;  %8542 = vmatprep.subr.msk.mxu1 %vm554_vm0, %v423_v9  ;;  %v284_v12 = vld [vmem:[%s9400_s29 + $0x20] sm:$0xff] }
  0x52   : > { %326 = vst.msk [vmem:[#allocation10 + $0x48] sm:$0x1] %vm321_vm3, %v9277_v2  ;;  %327 = vst.msk [vmem:[#allocation10 + $0x5a] sm:$0x1] %vm321_vm3, %v9277_v2  ;;  %v285_v13 = vld [vmem:[%s9400_s29 + $0x28] sm:$0xff]  ;;  %v286_v14 = vld [vmem:[%s9400_s29 + $0x30] sm:$0xff] }
  0x53   : > { %328 = vst.msk [vmem:[#allocation10 + $0x6c] sm:$0x1] %vm321_vm3, %v9277_v2  ;;  %329 = vst.msk [vmem:[#allocation10 + $0x7e] sm:$0x1] %vm321_vm3, %v9277_v2  ;;  %v287_v15 = vld [vmem:[%s9400_s29 + $0x38] sm:$0xff]  ;;  %v288_v16 = vld [vmem:[%s9400_s29 + $0x40] sm:$0xff] }
  0x54   : > { %330 = vst.msk [vmem:[#allocation10 + $0x90] sm:$0x1] %vm321_vm3, %v9277_v2  ;;  %331 = vst.msk [vmem:[#allocation10 + $0xa2] sm:$0x1] %vm321_vm3, %v9277_v2  ;;  %v289_v17 = vld [vmem:[%s9400_s29 + $0x48] sm:$0xff]  ;;  %v290_v18 = vld [vmem:[%s9400_s29 + $0x50] sm:$0xff] }
  0x55   : > { %332 = vst.msk [vmem:[#allocation10 + $0xb4] sm:$0x1] %vm321_vm3, %v9277_v2  ;;  %333 = vst.msk [vmem:[#allocation10 + $0xc6] sm:$0x1] %vm321_vm3, %v9277_v2  ;;  %v291_v19 = vld [vmem:[%s9400_s29 + $0x58] sm:$0xff]  ;;  %v292_v20 = vld [vmem:[%s9400_s29 + $0x60] sm:$0xff] }
  0x56   : > { %334 = vst.msk [vmem:[#allocation10 + $0xd8] sm:$0x1] %vm321_vm3, %v9277_v2  ;;  %335 = vst.msk [vmem:[#allocation10 + $0xea] sm:$0x1] %vm321_vm3, %v9277_v2  ;;  %v293_v21 = vld [vmem:[%s9400_s29 + $0x68] sm:$0xff]  ;;  %v294_v22 = vld [vmem:[%s9400_s29 + $0x70] sm:$0xff] }
  0x57   : > { %336 = vst.msk [vmem:[#allocation10 + $0xfc] sm:$0x1] %vm321_vm3, %v9277_v2  ;;  %337 = vst.msk [vmem:[#allocation10 + $0x10e] sm:$0x1] %vm321_vm3, %v9277_v2  ;;  %v295_v23 = vld [vmem:[%s9400_s29 + $0x78] sm:$0xff]  ;;  %v424_v24 = vld [vmem:[#allocation10 + $0x1] sm:$0xff] }
  0x58   : > { %338 = vst.msk [vmem:[#allocation10 + $0x120] sm:$0x1] %vm321_vm3, %v9277_v2  ;;  %339 = vst.msk [vmem:[#allocation10 + $0x132] sm:$0x1] %vm321_vm3, %v9277_v2  ;;  %v9493_v25 = vld [vmem:[#allocation10 + $0xfd] sm:$0xff]  ;;  %8494 = vmatprep.mubr.msk.f32.mxu0 %vm312_vm1, %v424_v24  ;;  %v425_v26 = vld [vmem:[#allocation10 + $0x9] sm:$0xff] }
  0x59   : > { %341 = vst.msk [vmem:[#allocation10 + $0x23] sm:$0x1] %vm321_vm3, %v9277_v2  ;;  %342 = vst.msk [vmem:[#allocation10 + $0x35] sm:$0x1] %vm321_vm3, %v9277_v2  ;;  %8536 = vmatprep.mubr.msk.f32.mxu1 %vm312_vm1, %v9493_v25  ;;  %v9501_v27 = vld [vmem:[#allocation10 + $0x105] sm:$0xff]  ;;  %8495 = vmatmul.mubr.msk.f32.vlgmr.msra.gmra.mxu0 %vm312_vm1, %v425_v26  ;;  %v296_v42 = vld [vmem:[%s9400_s29 + $0x80] sm:$0xff] }
  0x5a   : > { %343 = vst.msk [vmem:[#allocation10 + $0x47] sm:$0x1] %vm321_vm3, %v9277_v2  ;;  %344 = vst.msk [vmem:[#allocation10 + $0x59] sm:$0x1] %vm321_vm3, %v9277_v2  ;;  %8537 = vmatmul.mubr.msk.f32.vlgmr.msra.gmra.mxu1 %vm312_vm1, %v9501_v27  ;;  %8593 = vmatpush3.msk.msra.mxu0 %vm554_vm0, %v9415_v3  ;;  %v391_v33 = vld [vmem:[#allocation10] sm:$0xff]  ;;  %v392_v35 = vld [vmem:[#allocation10 + $0x8] sm:$0xff] }
  0x5b   : > { %345 = vst.msk [vmem:[#allocation10 + $0x6b] sm:$0x1] %vm321_vm3, %v9277_v2  ;;  %346 = vst.msk [vmem:[#allocation10 + $0x7d] sm:$0x1] %vm321_vm3, %v9277_v2  ;;  %8543 = vmatpush3.msk.msra.mxu1 %vm554_vm0, %v423_v9  ;;  %v297_v43 = vld [vmem:[%s9400_s29 + $0x88] sm:$0xff]  ;;  %v298_v46 = vld [vmem:[%s9400_s29 + $0x90] sm:$0xff] }
  0x5c   : > { %347 = vst.msk [vmem:[#allocation10 + $0x8f] sm:$0x1] %vm321_vm3, %v9277_v2  ;;  %348 = vst.msk [vmem:[#allocation10 + $0xa1] sm:$0x1] %vm321_vm3, %v9277_v2  ;;  %v299_v49 = vld [vmem:[%s9400_s29 + $0x98] sm:$0xff]  ;;  %v300_v50 = vld [vmem:[%s9400_s29 + $0xa0] sm:$0xff] }
  0x5d   : > { %349 = vst.msk [vmem:[#allocation10 + $0xb3] sm:$0x1] %vm321_vm3, %v9277_v2  ;;  %350 = vst.msk [vmem:[#allocation10 + $0xc5] sm:$0x1] %vm321_vm3, %v9277_v2  ;;  %v301_v51 = vld [vmem:[%s9400_s29 + $0xa8] sm:$0xff]  ;;  %v302_v52 = vld [vmem:[%s9400_s29 + $0xb0] sm:$0xff] }
  0x5e   : > { %351 = vst.msk [vmem:[#allocation10 + $0xd7] sm:$0x1] %vm321_vm3, %v9277_v2  ;;  %352 = vst.msk [vmem:[#allocation10 + $0xe9] sm:$0x1] %vm321_vm3, %v9277_v2  ;;  %v303_v53 = vld [vmem:[%s9400_s29 + $0xb8] sm:$0xff]  ;;  %v304_v54 = vld [vmem:[%s9400_s29 + $0xc0] sm:$0xff] }
  0x5f   : > { %353 = vst.msk [vmem:[#allocation10 + $0xfb] sm:$0x1] %vm321_vm3, %v9277_v2  ;;  %354 = vst.msk [vmem:[#allocation10 + $0x10d] sm:$0x1] %vm321_vm3, %v9277_v2  ;;  %v305_v55 = vld [vmem:[%s9400_s29 + $0xc8] sm:$0xff]  ;;  %vm5517_vm8 = vcmask 1045509  }
  0x60   : > { %355 = vst.msk [vmem:[#allocation10 + $0x11f] sm:$0x1] %vm321_vm3, %v9277_v2  ;;  %356 = vst.msk [vmem:[#allocation10 + $0x131] sm:$0x1] %vm321_vm3, %v9277_v2  ;;  %v1530_v56 = vld [vmem:[#allocation3 + $0xc] sm:$0x7] }
  0x61   : > { %359 = vst.msk [vmem:[#allocation10 + $0x13] sm:$0xff] %vm312_vm1, %v280_v5  ;;  %387 = vst.msk [vmem:[#allocation10 + $0x10f] sm:$0xff] %vm312_vm1, %v308_v6  ;;  %8642 = vmatprep.subr.msk.mxu1 %vm554_vm0, %v1530_v56  ;;  %v9588_v57 = vld [vmem:[#allocation3 + $0x10] sm:$0x7]  ;;  %vm5519_vm9 = vcmask 1046534   ;;  %vm5521_vm10 = vcmask 1047559  }
  0x62   : > { %340 = vst.msk [vmem:[#allocation10 + $0x11] sm:$0x1] %vm321_vm3, %v9277_v2  ;;  %357 = vst.msk [vmem:[#allocation10 + $0x143] sm:$0x1] %vm321_vm3, %v9277_v2  ;;  %8692 = vmatprep.subr.msk.mxu0 %vm554_vm0, %v9588_v57  ;;  %vm5580_vm11 = vcmask 130048  }
  0x63   : > { %360 = vst.msk [vmem:[#allocation10 + $0x1b] sm:$0xff] %vm312_vm1, %v281_v7  ;;  %388 = vst.msk [vmem:[#allocation10 + $0x117] sm:$0xff] %vm312_vm1, %v309_v8 }
  0x64   : > { %361 = vst.msk [vmem:[#allocation10 + $0x25] sm:$0xff] %vm312_vm1, %v282_v10  ;;  %362 = vst.msk [vmem:[#allocation10 + $0x2d] sm:$0xff] %vm312_vm1, %v283_v11 }
  0x65   : > { %363 = vst.msk [vmem:[#allocation10 + $0x37] sm:$0xff] %vm312_vm1, %v284_v12  ;;  %364 = vst.msk [vmem:[#allocation10 + $0x3f] sm:$0xff] %vm312_vm1, %v285_v13 }
  0x66   : > { %365 = vst.msk [vmem:[#allocation10 + $0x49] sm:$0xff] %vm312_vm1, %v286_v14  ;;  %366 = vst.msk [vmem:[#allocation10 + $0x51] sm:$0xff] %vm312_vm1, %v287_v15  ;;  %v9673_v14 = vld [vmem:[#allocation3 + $0x14] sm:$0x7] }
  0x67   : > { %367 = vst.msk [vmem:[#allocation10 + $0x5b] sm:$0xff] %vm312_vm1, %v288_v16  ;;  %368 = vst.msk [vmem:[#allocation10 + $0x63] sm:$0xff] %vm312_vm1, %v289_v17  ;;  %v310_v15 = vld [vmem:[%s9400_s29 + $0xf0] sm:$0xff]  ;;  %v311_v16 = vld [vmem:[%s9400_s29 + $0xf8] sm:$0xff] }
  0x68   : > { %369 = vst.msk [vmem:[#allocation10 + $0x6d] sm:$0xff] %vm312_vm1, %v290_v18  ;;  %370 = vst.msk [vmem:[#allocation10 + $0x75] sm:$0xff] %vm312_vm1, %v291_v19  ;;  %v9503_v28 = vld [vmem:[#allocation10 + $0x13] sm:$0xff] }
  0x69   : > { %371 = vst.msk [vmem:[#allocation10 + $0x7f] sm:$0xff] %vm312_vm1, %v292_v20  ;;  %11540 = vst [vmem:[#allocation15_spill] sm:$0xff] %v9493_v25  ;;  %v9508_v29 = vld [vmem:[#allocation10 + $0x10f] sm:$0xff]  ;;  %8497 = vmatprep.mubr.msk.f32.mxu0 %vm312_vm1, %v9503_v28 }
  0x6a   : > { %372 = vst.msk [vmem:[#allocation10 + $0x87] sm:$0xff] %vm312_vm1, %v293_v21  ;;  %373 = vst.msk [vmem:[#allocation10 + $0x91] sm:$0xff] %vm312_vm1, %v294_v22  ;;  %v9514_v30 = vld [vmem:[#allocation10 + $0x1b] sm:$0xff]  ;;  %8539 = vmatprep.mubr.msk.f32.mxu1 %vm312_vm1, %v9508_v29  ;;  %v9534_v37 = vld [vmem:[#allocation10 + $0x12] sm:$0xff] }
  0x6b   : > { %374 = vst.msk [vmem:[#allocation10 + $0x99] sm:$0xff] %vm312_vm1, %v295_v23  ;;  %11541 = vst [vmem:[#allocation16_spill] sm:$0xff] %v9501_v27  ;;  %v9516_v31 = vld [vmem:[#allocation10 + $0x117] sm:$0xff]  ;;  %v9520_v32 = vld [vmem:[#allocation10 + $0x25] sm:$0xff]  ;;  %8498 = vmatmul.mubr.msk.f32.gmra.mxu0 %vm312_vm1, %v9514_v30 }
  0x6c   : > { %11542 = vst [vmem:[#allocation17_spill] sm:$0xff] %v9508_v29  ;;  %11543 = vst [vmem:[#allocation18_spill] sm:$0xff] %v9516_v31  ;;  %8540 = vmatmul.mubr.msk.f32.gmra.mxu1 %vm312_vm1, %v9516_v31  ;;  %8500 = vmatprep.mubr.msk.f32.mxu0 %vm312_vm1, %v9520_v32  ;;  %v9530_v34 = vld [vmem:[#allocation10 + $0x2d] sm:$0xff]  ;;  %v9532_v36 = vld [vmem:[#allocation10 + $0x37] sm:$0xff] }
  0x6d   : > { %8544 = vmatprep.mubr.msk.f32.mxu1 %vm312_vm1, %v391_v33  ;;  %v9543_v38 = vld [vmem:[#allocation10 + $0x3f] sm:$0xff]  ;;  %v9547_v40 = vld [vmem:[#allocation10 + $0x49] sm:$0xff]  ;;  %v9553_v44 = vld [vmem:[#allocation10 + $0x51] sm:$0xff]  ;;  %375 = vst.msk [vmem:[#allocation10 + $0xa3] sm:$0xff] %vm312_vm1, %v296_v42 }
  0x6e   : > { %v9545_v39 = vld [vmem:[#allocation10 + $0x1a] sm:$0xff]  ;;  %v9549_v41 = vld [vmem:[#allocation10 + $0x24] sm:$0xff]  ;;  %v9555_v45 = vld [vmem:[#allocation10 + $0x2c] sm:$0xff]  ;;  %376 = vst.msk [vmem:[#allocation10 + $0xab] sm:$0xff] %vm312_vm1, %v297_v43 }
  0x6f   : > { %8501 = vmatmul.mubr.msk.f32.gmra.mxu0 %vm312_vm1, %v9530_v34  ;;  %11544 = vst [vmem:[#allocation19_spill] sm:$0xff] %v9549_v41  ;;  %11545 = vst [vmem:[#allocation20_spill] sm:$0xff] %v9555_v45  ;;  %v9564_v47 = vld [vmem:[#allocation10 + $0x5b] sm:$0xff]  ;;  %v9598_v58 = vld [vmem:[#allocation10 + $0x63] sm:$0xff] }
  0x70   : > { %8545 = vmatmul.mubr.msk.f32.vlgmr.msra.gmra.mxu1 %vm312_vm1, %v392_v35  ;;  %8503 = vmatprep.mubr.msk.f32.mxu0 %vm312_vm1, %v9532_v36  ;;  %v9566_v48 = vld [vmem:[#allocation10 + $0x36] sm:$0xff]  ;;  %377 = vst.msk [vmem:[#allocation10 + $0xb5] sm:$0xff] %vm312_vm1, %v298_v46  ;;  %378 = vst.msk [vmem:[#allocation10 + $0xbd] sm:$0xff] %vm312_vm1, %v299_v49  ;;  %v9600_v59 = vld [vmem:[#allocation10 + $0x3e] sm:$0xff] }
  0x71   : > { %8547 = vmatprep.mubr.msk.f32.mxu1 %vm312_vm1, %v9534_v37  ;;  %11546 = vst [vmem:[#allocation21_spill] sm:$0xff] %v9566_v48  ;;  %379 = vst.msk [vmem:[#allocation10 + $0xc7] sm:$0xff] %vm312_vm1, %v300_v50  ;;  %v9602_v60 = vld [vmem:[#allocation10 + $0x6d] sm:$0xff]  ;;  %8643 = vmatpush3.msk.msra.mxu1 %vm554_vm0, %v1530_v56  ;;  %v9617_v62 = vld [vmem:[#allocation10 + $0x75] sm:$0xff] }
  0x72   : > { %380 = vst.msk [vmem:[#allocation10 + $0xcf] sm:$0xff] %vm312_vm1, %v301_v51  ;;  %381 = vst.msk [vmem:[#allocation10 + $0xd9] sm:$0xff] %vm312_vm1, %v302_v52  ;;  %v9604_v61 = vld [vmem:[#allocation10 + $0x48] sm:$0xff]  ;;  %v9619_v63 = vld [vmem:[#allocation10 + $0x50] sm:$0xff]  ;;  %8742 = vmatprep.subr.msk.mxu1 %vm554_vm0, %v9673_v14 }
  0x73   : > { %8504 = vmatmul.mubr.msk.f32.gmra.mxu0 %vm312_vm1, %v9543_v38  ;;  %382 = vst.msk [vmem:[#allocation10 + $0xe1] sm:$0xff] %vm312_vm1, %v303_v53  ;;  %383 = vst.msk [vmem:[#allocation10 + $0xeb] sm:$0xff] %vm312_vm1, %v304_v54  ;;  %v9621_v0 = vld [vmem:[#allocation10 + $0x7f] sm:$0xff]  ;;  %v9633_v2 = vld [vmem:[#allocation10 + $0x87] sm:$0xff] }
  0x74   : > { %8548 = vmatmul.mubr.msk.f32.gmra.mxu1 %vm312_vm1, %v9545_v39  ;;  %8506 = vmatprep.mubr.msk.f32.mxu0 %vm312_vm1, %v9547_v40  ;;  %384 = vst.msk [vmem:[#allocation10 + $0xf3] sm:$0xff] %vm312_vm1, %v305_v55  ;;  %11547 = vst [vmem:[#allocation22_spill] sm:$0xff] %v9600_v59  ;;  %v9623_v1 = vld [vmem:[#allocation10 + $0x5a] sm:$0xff]  ;;  %v9635_v3 = vld [vmem:[#allocation10 + $0x62] sm:$0xff] }
  0x75   : > { %8550 = vmatprep.mubr.msk.f32.mxu1 %vm312_vm1, %v9549_v41  ;;  %11548 = vst [vmem:[#allocation23_spill] sm:$0xff] %v9604_v61  ;;  %11549 = vst [vmem:[#allocation24_spill] sm:$0xff] %v9619_v63  ;;  %v9637_v4 = vld [vmem:[#allocation10 + $0x91] sm:$0xff]  ;;  %v9649_v6 = vld [vmem:[#allocation10 + $0x99] sm:$0xff] }
  0x76   : > { %11550 = vst [vmem:[#allocation25_spill] sm:$0xff] %v9623_v1  ;;  %11551 = vst [vmem:[#allocation26_spill] sm:$0xff] %v9635_v3  ;;  %v9639_v5 = vld [vmem:[#allocation10 + $0x6c] sm:$0xff]  ;;  %v9651_v7 = vld [vmem:[#allocation10 + $0x74] sm:$0xff] }
  0x77   : > { %8507 = vmatmul.mubr.msk.f32.gmra.mxu0 %vm312_vm1, %v9553_v44  ;;  %11552 = vst [vmem:[#allocation27_spill] sm:$0xff] %v9639_v5  ;;  %11553 = vst [vmem:[#allocation28_spill] sm:$0xff] %v9651_v7  ;;  %v9653_v8 = vld [vmem:[#allocation10 + $0xa3] sm:$0xff]  ;;  %v9665_v10 = vld [vmem:[#allocation10 + $0xab] sm:$0xff] }
  0x78   : > { %8551 = vmatmul.mubr.msk.f32.gmra.mxu1 %vm312_vm1, %v9555_v45  ;;  %8509 = vmatprep.mubr.msk.f32.mxu0 %vm312_vm1, %v9564_v47  ;;  %v9655_v9 = vld [vmem:[#allocation10 + $0x7e] sm:$0xff]  ;;  %v9667_v11 = vld [vmem:[#allocation10 + $0x86] sm:$0xff]  ;;  %v9669_v12 = vld [vmem:[#allocation10 + $0x90] sm:$0xff]  ;;  %389 = vst.msk [vmem:[#allocation10 + $0x121] sm:$0xff] %vm312_vm1, %v310_v15 }
  0x79   : > { %8553 = vmatprep.mubr.msk.f32.mxu1 %vm312_vm1, %v9566_v48  ;;  %11554 = vst [vmem:[#allocation29_spill] sm:$0xff] %v9655_v9  ;;  %11555 = vst [vmem:[#allocation30_spill] sm:$0xff] %v9667_v11  ;;  %v9671_v13 = vld [vmem:[#allocation10 + $0xb5] sm:$0xff]  ;;  %v9689_v17 = vld [vmem:[#allocation10 + $0xbd] sm:$0xff] }
  0x7a   : > { %11556 = vst [vmem:[#allocation31_spill] sm:$0xff] %v9669_v12  ;;  %390 = vst.msk [vmem:[#allocation10 + $0x129] sm:$0xff] %vm312_vm1, %v311_v16  ;;  %v9691_v18 = vld [vmem:[#allocation10 + $0x98] sm:$0xff]  ;;  %v9693_v19 = vld [vmem:[#allocation10 + $0xc7] sm:$0xff] }
  0x7b   : > { %8510 = vmatmul.mubr.msk.f32.gmra.mxu0 %vm312_vm1, %v9598_v58  ;;  %11557 = vst [vmem:[#allocation32_spill] sm:$0xff] %v9691_v18  ;;  %v9695_v20 = vld [vmem:[#allocation10 + $0xa2] sm:$0xff]  ;;  %v9705_v21 = vld [vmem:[#allocation10 + $0xcf] sm:$0xff]  ;;  %v9709_v23 = vld [vmem:[#allocation10 + $0xd9] sm:$0xff] }
  0x7c   : > { %8554 = vmatmul.mubr.msk.f32.gmra.mxu1 %vm312_vm1, %v9600_v59  ;;  %8512 = vmatprep.mubr.msk.f32.mxu0 %vm312_vm1, %v9602_v60  ;;  %11558 = vst [vmem:[#allocation33_spill] sm:$0xff] %v9695_v20  ;;  %11559 = vst [vmem:[#allocation34_spill] sm:$0xff] %v9705_v21  ;;  %v9707_v22 = vld [vmem:[#allocation10 + $0xaa] sm:$0xff]  ;;  %v9711_v24 = vld [vmem:[#allocation10 + $0xb4] sm:$0xff] }
  0x7d   : > { %8556 = vmatprep.mubr.msk.f32.mxu1 %vm312_vm1, %v9604_v61  ;;  %11560 = vst [vmem:[#allocation35_spill] sm:$0xff] %v9707_v22  ;;  %11561 = vst [vmem:[#allocation36_spill] sm:$0xff] %v9709_v23  ;;  %v9721_v26 = vld [vmem:[#allocation10 + $0xe1] sm:$0xff]  ;;  %v9725_v35 = vld [vmem:[#allocation10 + $0xeb] sm:$0xff] }
  0x7e   : > { %11562 = vst [vmem:[#allocation37_spill] sm:$0xff] %v9721_v26  ;;  %v9723_v33 = vld [vmem:[#allocation10 + $0xbc] sm:$0xff]  ;;  %11564 = vst [vmem:[#allocation39_spill] sm:$0xff] %v9725_v35  ;;  %v9727_v42 = vld [vmem:[#allocation10 + $0xc6] sm:$0xff] }
  0x7f   : > { %8513 = vmatmul.mubr.msk.f32.gmra.mxu0 %vm312_vm1, %v9617_v62  ;;  %11563 = vst [vmem:[#allocation38_spill] sm:$0xff] %v9723_v33  ;;  %v9737_v43 = vld [vmem:[#allocation10 + $0xf3] sm:$0xff]  ;;  %v1107_v50 = vld [vmem:[#allocation10 + $0x2] sm:$0xff]  ;;  %v1108_v52 = vld [vmem:[#allocation10 + $0xa] sm:$0xff] }
  0x80   : > { %8557 = vmatmul.mubr.msk.f32.gmra.mxu1 %vm312_vm1, %v9619_v63  ;;  %8515 = vmatprep.mubr.msk.f32.mxu0 %vm312_vm1, %v9621_v0  ;;  %11565 = vst [vmem:[#allocation40_spill] sm:$0xff] %v9737_v43  ;;  %v9739_v46 = vld [vmem:[#allocation10 + $0xce] sm:$0xff]  ;;  %v9741_v49 = vld [vmem:[#allocation10 + $0xd8] sm:$0xff]  ;;  %v9750_v51 = vld [vmem:[#allocation10 + $0xe0] sm:$0xff] }
  0x81   : > { %8559 = vmatprep.mubr.msk.f32.mxu1 %vm312_vm1, %v9623_v1  ;;  %11566 = vst [vmem:[#allocation41_spill] sm:$0xff] %v9739_v46  ;;  %v9752_v53 = vld [vmem:[#allocation10 + $0xea] sm:$0xff]  ;;  %v9754_v54 = vld [vmem:[#allocation10 + $0x14] sm:$0xff]  ;;  %v9767_v15 = vld [vmem:[#allocation10 + $0x1c] sm:$0xff] }
  0x82   : > { %v9756_v55 = vld [vmem:[#allocation3 + $0x18] sm:$0x7]  ;;  %v9771_v16 = vld [vmem:[#allocation10 + $0xfc] sm:$0xff] }
  0x83   : > { %8516 = vmatmul.mubr.msk.f32.gmra.mxu0 %vm312_vm1, %v9633_v2  ;;  %v9765_v56 = vld [vmem:[#allocation10 + $0xf2] sm:$0xff]  ;;  %v9803_v25 = vld [vmem:[#allocation10 + $0x40] sm:$0xff] }
  0x84   : > { %8560 = vmatmul.mubr.msk.f32.gmra.mxu1 %vm312_vm1, %v9635_v3  ;;  %8518 = vmatprep.mubr.msk.f32.mxu0 %vm312_vm1, %v9637_v4  ;;  %v9789_v31 = vld [vmem:[#allocation10 + $0x10e] sm:$0xff]  ;;  %v9791_v29 = vld [vmem:[#allocation10 + $0x38] sm:$0xff] }
  0x85   : > { %8562 = vmatprep.mubr.msk.f32.mxu1 %vm312_vm1, %v9639_v5  ;;  %v9801_v27 = vld [vmem:[#allocation10 + $0x116] sm:$0xff] }
  0x87   : > { %8519 = vmatmul.mubr.msk.f32.gmra.mxu0 %vm312_vm1, %v9649_v6 }
  0x88   : > { %8563 = vmatmul.mubr.msk.f32.gmra.mxu1 %vm312_vm1, %v9651_v7  ;;  %8521 = vmatprep.mubr.msk.f32.mxu0 %vm312_vm1, %v9653_v8 }
  0x89   : > { %8565 = vmatprep.mubr.msk.f32.mxu1 %vm312_vm1, %v9655_v9 }
  0x8b   : > { %8522 = vmatmul.mubr.msk.f32.gmra.mxu0 %vm312_vm1, %v9665_v10 }
  0x8c   : > { %8566 = vmatmul.mubr.msk.f32.gmra.mxu1 %vm312_vm1, %v9667_v11  ;;  %8524 = vmatprep.mubr.msk.f32.mxu0 %vm312_vm1, %v9671_v13 }
  0x8d   : > { %8568 = vmatprep.mubr.msk.f32.mxu1 %vm312_vm1, %v9669_v12 }
  0x8f   : > { %8525 = vmatmul.mubr.msk.f32.gmra.mxu0 %vm312_vm1, %v9689_v17 }
  0x90   : > { %8569 = vmatmul.mubr.msk.f32.gmra.mxu1 %vm312_vm1, %v9691_v18  ;;  %8527 = vmatprep.mubr.msk.f32.mxu0 %vm312_vm1, %v9693_v19 }
  0x91   : > { %8571 = vmatprep.mubr.msk.f32.mxu1 %vm312_vm1, %v9695_v20 }
  0x93   : > { %8528 = vmatmul.mubr.msk.f32.gmra.mxu0 %vm312_vm1, %v9705_v21  ;;  %v9829_v21 = vld [vmem:[#allocation10 + $0x64] sm:$0xff] }
  0x94   : > { %8572 = vmatmul.mubr.msk.f32.gmra.mxu1 %vm312_vm1, %v9707_v22  ;;  %8530 = vmatprep.mubr.msk.f32.mxu0 %vm312_vm1, %v9709_v23  ;;  %v9823_v23 = vld [vmem:[#allocation3 + $0x1c] sm:$0x7] }
  0x95   : > { %8574 = vmatprep.mubr.msk.f32.mxu1 %vm312_vm1, %v9711_v24 }
  0x97   : > { %8531 = vmatmul.mubr.msk.f32.gmra.mxu0 %vm312_vm1, %v9721_v26  ;;  %v9817_v26 = vld [vmem:[#allocation10 + $0x5c] sm:$0xff] }
  0x98   : > { %8575 = vmatmul.mubr.msk.f32.gmra.mxu1 %vm312_vm1, %v9723_v33  ;;  %8533 = vmatprep.mubr.msk.f32.mxu0 %vm312_vm1, %v9725_v35  ;;  %v9815_v35 = vld [vmem:[#allocation10 + $0x52] sm:$0xff] }
  0x99   : > { %8577 = vmatprep.mubr.msk.f32.mxu1 %vm312_vm1, %v9727_v42 }
  0x9b   : > { %8534 = vmatmul.mubr.msk.f32.gmra.mxu0 %vm312_vm1, %v9737_v43  ;;  %v9805_v43 = vld [vmem:[#allocation10 + $0x4a] sm:$0xff] }
  0x9c   : > { %8578 = vmatmul.mubr.msk.f32.gmra.mxu1 %vm312_vm1, %v9739_v46  ;;  %8594 = vmatprep.mubr.msk.f32.mxu0 %vm312_vm1, %v1107_v50  ;;  %v9773_v50 = vld [vmem:[#allocation10 + $0x26] sm:$0xff] }
  0x9d   : > { %8580 = vmatprep.mubr.msk.f32.mxu1 %vm312_vm1, %v9741_v49 }
  0x9f   : > { %8595 = vmatmul.mubr.msk.f32.vlgmr.msra.gmra.mxu0 %vm312_vm1, %v1108_v52  ;;  %v9787_v52 = vld [vmem:[#allocation10 + $0x2e] sm:$0xff] }
  0xa0   : > { %8581 = vmatmul.mubr.msk.f32.gmra.mxu1 %vm312_vm1, %v9750_v51  ;;  %8693 = vmatpush3.msk.msra.mxu0 %vm554_vm0, %v9588_v57  ;;  %v9785_v57 = vld [vmem:[#allocation10 + $0x104] sm:$0xff] }
  0xa1   : > { %8583 = vmatprep.mubr.msk.f32.mxu1 %vm312_vm1, %v9752_v53  ;;  %8597 = vmatprep.mubr.msk.f32.mxu0 %vm312_vm1, %v9754_v54 }
  0xa2   : > { %8792 = vmatprep.subr.msk.mxu0 %vm554_vm0, %v9756_v55 }
  0xa3   : > { %8598 = vmatmul.mubr.msk.f32.gmra.mxu0 %vm312_vm1, %v9767_v15 }
  0xa4   : > { %8584 = vmatmul.mubr.msk.f32.gmra.mxu1 %vm312_vm1, %v9765_v56  ;;  %8600 = vmatprep.mubr.msk.f32.mxu0 %vm312_vm1, %v9773_v50 }
  0xa5   : > { %8586 = vmatprep.mubr.msk.f32.mxu1 %vm312_vm1, %v9771_v16 }
  0xa7   : > { %8601 = vmatmul.mubr.msk.f32.gmra.mxu0 %vm312_vm1, %v9787_v52 }
  0xa8   : > { %8587 = vmatmul.mubr.msk.f32.gmra.mxu1 %vm312_vm1, %v9785_v57  ;;  %8603 = vmatprep.mubr.msk.f32.mxu0 %vm312_vm1, %v9791_v29 }
  0xa9   : > { %8589 = vmatprep.mubr.msk.f32.mxu1 %vm312_vm1, %v9789_v31 }
  0xab   : > { %8604 = vmatmul.mubr.msk.f32.gmra.mxu0 %vm312_vm1, %v9803_v25 }
  0xac   : > { %8590 = vmatmul.mubr.msk.f32.gmra.mxu1 %vm312_vm1, %v9801_v27  ;;  %8606 = vmatprep.mubr.msk.f32.mxu0 %vm312_vm1, %v9805_v43 }
  0xad   : > { %8644 = vmatprep.mubr.msk.f32.mxu1 %vm312_vm1, %v9534_v37  ;;  %v9831_v37 = vld [vmem:[#allocation10 + $0x6e] sm:$0xff] }
  0xaf   : > { %8607 = vmatmul.mubr.msk.f32.gmra.mxu0 %vm312_vm1, %v9815_v35 }
  0xb0   : > { %8645 = vmatmul.mubr.msk.f32.vlgmr.msra.gmra.mxu1 %vm312_vm1, %v9545_v39  ;;  %8609 = vmatprep.mubr.msk.f32.mxu0 %vm312_vm1, %v9817_v26  ;;  %v9845_v39 = vld [vmem:[#allocation10 + $0x76] sm:$0xff] }
  0xb1   : > { %8647 = vmatprep.mubr.msk.f32.mxu1 %vm312_vm1, %v9549_v41  ;;  %8743 = vmatpush3.msk.msra.mxu1 %vm554_vm0, %v9673_v14  ;;  %11567 = vst [vmem:[#allocation42_spill] sm:$0xff] %v9845_v39  ;;  %v9847_v41 = vld [vmem:[#allocation10 + $0x80] sm:$0xff]  ;;  %v9857_v14 = vld [vmem:[#allocation10 + $0x88] sm:$0xff] }
  0xb2   : > { %8842 = vmatprep.subr.msk.mxu1 %vm554_vm0, %v9823_v23  ;;  %11568 = vst [vmem:[#allocation43_spill] sm:$0xff] %v9847_v41  ;;  %11569 = vst [vmem:[#allocation44_spill] sm:$0xff] %v9857_v14 }
  0xb3   : > { %8610 = vmatmul.mubr.msk.f32.gmra.mxu0 %vm312_vm1, %v9829_v21 }
  0xb4   : > { %8648 = vmatmul.mubr.msk.f32.gmra.mxu1 %vm312_vm1, %v9555_v45  ;;  %8612 = vmatprep.mubr.msk.f32.mxu0 %vm312_vm1, %v9831_v37  ;;  %v9859_v45 = vld [vmem:[#allocation10 + $0x92] sm:$0xff] }
  0xb5   : > { %8650 = vmatprep.mubr.msk.f32.mxu1 %vm312_vm1, %v9566_v48  ;;  %11570 = vst [vmem:[#allocation45_spill] sm:$0xff] %v9859_v45  ;;  %v9871_v48 = vld [vmem:[#allocation10 + $0xa4] sm:$0xff] }
  0xb6   : > { %11572 = vst [vmem:[#allocation47_spill] sm:$0xff] %v9871_v48 }
  0xb7   : > { %8613 = vmatmul.mubr.msk.f32.gmra.mxu0 %vm312_vm1, %v9845_v39 }
  0xb8   : > { %8651 = vmatmul.mubr.msk.f32.gmra.mxu1 %vm312_vm1, %v9600_v59  ;;  %8615 = vmatprep.mubr.msk.f32.mxu0 %vm312_vm1, %v9847_v41  ;;  %v9869_v59 = vld [vmem:[#allocation10 + $0x9a] sm:$0xff] }
  0xb9   : > { %8653 = vmatprep.mubr.msk.f32.mxu1 %vm312_vm1, %v9604_v61  ;;  %11571 = vst [vmem:[#allocation46_spill] sm:$0xff] %v9869_v59  ;;  %v9883_v61 = vld [vmem:[#allocation10 + $0xb6] sm:$0xff] }
  0xba   : > { %11574 = vst [vmem:[#allocation49_spill] sm:$0xff] %v9883_v61 }
  0xbb   : > { %8616 = vmatmul.mubr.msk.f32.gmra.mxu0 %vm312_vm1, %v9857_v14 }
  0xbc   : > { %8654 = vmatmul.mubr.msk.f32.gmra.mxu1 %vm312_vm1, %v9619_v63  ;;  %8618 = vmatprep.mubr.msk.f32.mxu0 %vm312_vm1, %v9859_v45  ;;  %v9881_v63 = vld [vmem:[#allocation10 + $0xac] sm:$0xff] }
  0xbd   : > { %8656 = vmatprep.mubr.msk.f32.mxu1 %vm312_vm1, %v9623_v1  ;;  %11573 = vst [vmem:[#allocation48_spill] sm:$0xff] %v9881_v63  ;;  %v9895_v1 = vld [vmem:[#allocation10 + $0xc8] sm:$0xff] }
  0xbf   : > { %8619 = vmatmul.mubr.msk.f32.gmra.mxu0 %vm312_vm1, %v9869_v59 }
  0xc0   : > { %8657 = vmatmul.mubr.msk.f32.gmra.mxu1 %vm312_vm1, %v9635_v3  ;;  %8621 = vmatprep.mubr.msk.f32.mxu0 %vm312_vm1, %v9871_v48  ;;  %v9893_v3 = vld [vmem:[#allocation10 + $0xbe] sm:$0xff] }
  0xc1   : > { %8659 = vmatprep.mubr.msk.f32.mxu1 %vm312_vm1, %v9639_v5  ;;  %v9907_v5 = vld [vmem:[#allocation10 + $0xda] sm:$0xff] }
  0xc3   : > { %8622 = vmatmul.mubr.msk.f32.gmra.mxu0 %vm312_vm1, %v9881_v63 }
  0xc4   : > { %8660 = vmatmul.mubr.msk.f32.gmra.mxu1 %vm312_vm1, %v9651_v7  ;;  %8624 = vmatprep.mubr.msk.f32.mxu0 %vm312_vm1, %v9883_v61  ;;  %v9905_v7 = vld [vmem:[#allocation10 + $0xd0] sm:$0xff] }
  0xc5   : > { %8662 = vmatprep.mubr.msk.f32.mxu1 %vm312_vm1, %v9655_v9  ;;  %v9919_v9 = vld [vmem:[#allocation10 + $0xec] sm:$0xff] }
  0xc7   : > { %8625 = vmatmul.mubr.msk.f32.gmra.mxu0 %vm312_vm1, %v9893_v3 }
  0xc8   : > { %8663 = vmatmul.mubr.msk.f32.gmra.mxu1 %vm312_vm1, %v9667_v11  ;;  %8627 = vmatprep.mubr.msk.f32.mxu0 %vm312_vm1, %v9895_v1  ;;  %v9917_v11 = vld [vmem:[#allocation10 + $0xe2] sm:$0xff] }
  0xc9   : > { %8665 = vmatprep.mubr.msk.f32.mxu1 %vm312_vm1, %v9669_v12  ;;  %v9931_v12 = vld [vmem:[#allocation10 + $0xfe] sm:$0xff] }
  0xcb   : > { %8628 = vmatmul.mubr.msk.f32.gmra.mxu0 %vm312_vm1, %v9905_v7 }
  0xcc   : > { %8666 = vmatmul.mubr.msk.f32.gmra.mxu1 %vm312_vm1, %v9691_v18  ;;  %8630 = vmatprep.mubr.msk.f32.mxu0 %vm312_vm1, %v9907_v5  ;;  %v9929_v18 = vld [vmem:[#allocation10 + $0xf4] sm:$0xff] }
  0xcd   : > { %8668 = vmatprep.mubr.msk.f32.mxu1 %vm312_vm1, %v9695_v20  ;;  %v9943_v20 = vld [vmem:[#allocation10 + $0x110] sm:$0xff] }
  0xcf   : > { %8631 = vmatmul.mubr.msk.f32.gmra.mxu0 %vm312_vm1, %v9917_v11 }
  0xd0   : > { %8669 = vmatmul.mubr.msk.f32.gmra.mxu1 %vm312_vm1, %v9707_v22  ;;  %8633 = vmatprep.mubr.msk.f32.mxu0 %vm312_vm1, %v9919_v9  ;;  %v9941_v22 = vld [vmem:[#allocation10 + $0x106] sm:$0xff] }
  0xd1   : > { %8671 = vmatprep.mubr.msk.f32.mxu1 %vm312_vm1, %v9711_v24 }
  0xd3   : > { %8634 = vmatmul.mubr.msk.f32.gmra.mxu0 %vm312_vm1, %v9929_v18 }
  0xd4   : > { %8672 = vmatmul.mubr.msk.f32.gmra.mxu1 %vm312_vm1, %v9723_v33  ;;  %8636 = vmatprep.mubr.msk.f32.mxu0 %vm312_vm1, %v9931_v12  ;;  %v9953_v33 = vld [vmem:[#allocation10 + $0x118] sm:$0xff] }
  0xd5   : > { %8674 = vmatprep.mubr.msk.f32.mxu1 %vm312_vm1, %v9727_v42 }
  0xd7   : > { %8637 = vmatmul.mubr.msk.f32.gmra.mxu0 %vm312_vm1, %v9941_v22 }
  0xd8   : > { %8675 = vmatmul.mubr.msk.f32.gmra.mxu1 %vm312_vm1, %v9739_v46  ;;  %8639 = vmatprep.mubr.msk.f32.mxu0 %vm312_vm1, %v9943_v20  ;;  %v9963_v46 = vld [vmem:[#allocation3 + $0x20] sm:$0x7] }
  0xd9   : > { %8677 = vmatprep.mubr.msk.f32.mxu1 %vm312_vm1, %v9741_v49 }
  0xdb   : > { %8640 = vmatmul.mubr.msk.f32.gmra.mxu0 %vm312_vm1, %v9953_v33 }
  0xdc   : > { %8678 = vmatmul.mubr.msk.f32.gmra.mxu1 %vm312_vm1, %v9750_v51  ;;  %8694 = vmatprep.mubr.msk.f32.mxu0 %vm312_vm1, %v9503_v28  ;;  %v9985_v28 = vld [vmem:[#allocation10 + $0x120] sm:$0xff] }
  0xdd   : > { %8680 = vmatprep.mubr.msk.f32.mxu1 %vm312_vm1, %v9752_v53 }
  0xdf   : > { %8695 = vmatmul.mubr.msk.f32.vlgmr.msra.gmra.mxu0 %vm312_vm1, %v9514_v30  ;;  %v9995_v30 = vld [vmem:[#allocation10 + $0x128] sm:$0xff] }
  0xe0   : > { %8681 = vmatmul.mubr.msk.f32.gmra.mxu1 %vm312_vm1, %v9765_v56  ;;  %8793 = vmatpush3.msk.msra.mxu0 %vm554_vm0, %v9756_v55  ;;  %v11577_v55 = vld [vmem:[#allocation37_spill] sm:$0xff] }
  0xe1   : > { %8683 = vmatprep.mubr.msk.f32.mxu1 %vm312_vm1, %v9771_v16  ;;  %8697 = vmatprep.mubr.msk.f32.mxu0 %vm312_vm1, %v9520_v32 }
  0xe2   : > { %8892 = vmatprep.subr.msk.mxu0 %vm554_vm0, %v9963_v46 }
  0xe3   : > { %8698 = vmatmul.mubr.msk.f32.gmra.mxu0 %vm312_vm1, %v9530_v34 }
  0xe4   : > { %8684 = vmatmul.mubr.msk.f32.gmra.mxu1 %vm312_vm1, %v9785_v57  ;;  %8700 = vmatprep.mubr.msk.f32.mxu0 %vm312_vm1, %v9532_v36 }
  0xe5   : > { %8686 = vmatprep.mubr.msk.f32.mxu1 %vm312_vm1, %v9789_v31 }
  0xe7   : > { %8701 = vmatmul.mubr.msk.f32.gmra.mxu0 %vm312_vm1, %v9543_v38 }
  0xe8   : > { %8687 = vmatmul.mubr.msk.f32.gmra.mxu1 %vm312_vm1, %v9801_v27  ;;  %8703 = vmatprep.mubr.msk.f32.mxu0 %vm312_vm1, %v9547_v40 }
  0xe9   : > { %8689 = vmatprep.mubr.msk.f32.mxu1 %vm312_vm1, %v9985_v28 }
  0xeb   : > { %8704 = vmatmul.mubr.msk.f32.gmra.mxu0 %vm312_vm1, %v9553_v44 }
  0xec   : > { %8690 = vmatmul.mubr.msk.f32.gmra.mxu1 %vm312_vm1, %v9995_v30  ;;  %8706 = vmatprep.mubr.msk.f32.mxu0 %vm312_vm1, %v9564_v47 }
  0xed   : > { %8744 = vmatprep.mubr.msk.f32.mxu1 %vm312_vm1, %v9754_v54  ;;  %v11576_v54 = vld [vmem:[#allocation36_spill] sm:$0xff] }
  0xef   : > { %8707 = vmatmul.mubr.msk.f32.gmra.mxu0 %vm312_vm1, %v9598_v58 }
  0xf0   : > { %8745 = vmatmul.mubr.msk.f32.vlgmr.msra.gmra.mxu1 %vm312_vm1, %v9767_v15  ;;  %8709 = vmatprep.mubr.msk.f32.mxu0 %vm312_vm1, %v9602_v60  ;;  %v11578_v15 = vld [vmem:[#allocation39_spill] sm:$0xff] }
  0xf1   : > { %8747 = vmatprep.mubr.msk.f32.mxu1 %vm312_vm1, %v9773_v50  ;;  %8843 = vmatpush3.msk.msra.mxu1 %vm554_vm0, %v9823_v23  ;;  %v11575_v23 = vld [vmem:[#allocation34_spill] sm:$0xff] }
  0xf3   : > { %8710 = vmatmul.mubr.msk.f32.gmra.mxu0 %vm312_vm1, %v9617_v62 }
  0xf4   : > { %8748 = vmatmul.mubr.msk.f32.gmra.mxu1 %vm312_vm1, %v9787_v52  ;;  %8712 = vmatprep.mubr.msk.f32.mxu0 %vm312_vm1, %v9621_v0 }
  0xf5   : > { %8750 = vmatprep.mubr.msk.f32.mxu1 %vm312_vm1, %v9791_v29 }
  0xf7   : > { %8713 = vmatmul.mubr.msk.f32.gmra.mxu0 %vm312_vm1, %v9633_v2 }
  0xf8   : > { %8751 = vmatmul.mubr.msk.f32.gmra.mxu1 %vm312_vm1, %v9803_v25  ;;  %8715 = vmatprep.mubr.msk.f32.mxu0 %vm312_vm1, %v9637_v4 }
  0xf9   : > { %8753 = vmatprep.mubr.msk.f32.mxu1 %vm312_vm1, %v9805_v43 }
  0xfb   : > { %8716 = vmatmul.mubr.msk.f32.gmra.mxu0 %vm312_vm1, %v9649_v6 }
  0xfc   : > { %8754 = vmatmul.mubr.msk.f32.gmra.mxu1 %vm312_vm1, %v9815_v35  ;;  %8718 = vmatprep.mubr.msk.f32.mxu0 %vm312_vm1, %v9653_v8 }
  0xfd   : > { %8756 = vmatprep.mubr.msk.f32.mxu1 %vm312_vm1, %v9817_v26 }
  0xff   : > { %8719 = vmatmul.mubr.msk.f32.gmra.mxu0 %vm312_vm1, %v9665_v10 }
 0x100   : > { %8757 = vmatmul.mubr.msk.f32.gmra.mxu1 %vm312_vm1, %v9829_v21  ;;  %8721 = vmatprep.mubr.msk.f32.mxu0 %vm312_vm1, %v9671_v13 }
 0x101   : > { %8759 = vmatprep.mubr.msk.f32.mxu1 %vm312_vm1, %v9831_v37 }
 0x103   : > { %8722 = vmatmul.mubr.msk.f32.gmra.mxu0 %vm312_vm1, %v9689_v17 }
 0x104   : > { %8760 = vmatmul.mubr.msk.f32.gmra.mxu1 %vm312_vm1, %v9845_v39  ;;  %8724 = vmatprep.mubr.msk.f32.mxu0 %vm312_vm1, %v9693_v19 }
 0x105   : > { %8762 = vmatprep.mubr.msk.f32.mxu1 %vm312_vm1, %v9847_v41  ;;  %v11579_v41 = vld [vmem:[#allocation40_spill] sm:$0xff] }
 0x107   : > { %8725 = vmatmul.mubr.msk.f32.gmra.mxu0 %vm312_vm1, %v11575_v23 }
 0x108   : > { %8763 = vmatmul.mubr.msk.f32.gmra.mxu1 %vm312_vm1, %v9857_v14  ;;  %8727 = vmatprep.mubr.msk.f32.mxu0 %vm312_vm1, %v11576_v54  ;;  %v11580_v14 = vld [vmem:[#allocation15_spill] sm:$0xff] }
 0x109   : > { %8765 = vmatprep.mubr.msk.f32.mxu1 %vm312_vm1, %v9859_v45  ;;  %v11581_v45 = vld [vmem:[#allocation16_spill] sm:$0xff] }
 0x10b   : > { %8728 = vmatmul.mubr.msk.f32.gmra.mxu0 %vm312_vm1, %v11577_v55 }
 0x10c   : > { %8766 = vmatmul.mubr.msk.f32.gmra.mxu1 %vm312_vm1, %v9869_v59  ;;  %8730 = vmatprep.mubr.msk.f32.mxu0 %vm312_vm1, %v11578_v15  ;;  %v11582_v59 = vld [vmem:[#allocation17_spill] sm:$0xff] }
 0x10d   : > { %8768 = vmatprep.mubr.msk.f32.mxu1 %vm312_vm1, %v9871_v48  ;;  %v10087_v48 = vld [vmem:[#allocation10 + $0x121] sm:$0xff] }
 0x10f   : > { %8731 = vmatmul.mubr.msk.f32.gmra.mxu0 %vm312_vm1, %v11579_v41 }
 0x110   : > { %8769 = vmatmul.mubr.msk.f32.gmra.mxu1 %vm312_vm1, %v9881_v63  ;;  %8733 = vmatprep.mubr.msk.f32.mxu0 %vm312_vm1, %v11580_v14  ;;  %v11583_v63 = vld [vmem:[#allocation18_spill] sm:$0xff] }
 0x111   : > { %8771 = vmatprep.mubr.msk.f32.mxu1 %vm312_vm1, %v9883_v61 }
 0x113   : > { %8734 = vmatmul.mubr.msk.f32.gmra.mxu0 %vm312_vm1, %v11581_v45  ;;  %v10097_v45 = vld [vmem:[#allocation10 + $0x129] sm:$0xff] }
 0x114   : > { %8772 = vmatmul.mubr.msk.f32.gmra.mxu1 %vm312_vm1, %v9893_v3  ;;  %8736 = vmatprep.mubr.msk.f32.mxu0 %vm312_vm1, %v11582_v59  ;;  %v11584_v59 = vld [vmem:[#allocation19_spill] sm:$0xff]  ;;  %v11587_v3 = vld [vmem:[#allocation22_spill] sm:$0xff] }
 0x115   : > { %8774 = vmatprep.mubr.msk.f32.mxu1 %vm312_vm1, %v9895_v1  ;;  %v11586_v1 = vld [vmem:[#allocation21_spill] sm:$0xff] }
 0x117   : > { %8737 = vmatmul.mubr.msk.f32.gmra.mxu0 %vm312_vm1, %v11583_v63  ;;  %v11585_v63 = vld [vmem:[#allocation20_spill] sm:$0xff] }
 0x118   : > { %8775 = vmatmul.mubr.msk.f32.gmra.mxu1 %vm312_vm1, %v9905_v7  ;;  %8739 = vmatprep.mubr.msk.f32.mxu0 %vm312_vm1, %v10087_v48  ;;  %v10125_v7 = vld [vmem:[#allocation10 + $0x122] sm:$0xff] }
 0x119   : > { %8777 = vmatprep.mubr.msk.f32.mxu1 %vm312_vm1, %v9907_v5  ;;  %v11588_v5 = vld [vmem:[#allocation23_spill] sm:$0xff]  ;;  %11589 = vst [vmem:[#allocation34_spill] sm:$0xff] %v10125_v7 }
 0x11b   : > { %8740 = vmatmul.mubr.msk.f32.gmra.mxu0 %vm312_vm1, %v10097_v45 }
 0x11c   : > { %8778 = vmatmul.mubr.msk.f32.gmra.mxu1 %vm312_vm1, %v9917_v11  ;;  %8794 = vmatprep.mubr.msk.f32.mxu0 %vm312_vm1, %v11584_v59  ;;  %v10127_v11 = vpop.f32.mrf.mxu1 }
 0x11d   : > { %8780 = vmatprep.mubr.msk.f32.mxu1 %vm312_vm1, %v9919_v9  ;;  %v8496_v9 = vpop.f32.mrf.mxu0 }
 0x11f   : > { %8795 = vmatmul.mubr.msk.f32.vlgmr.msra.gmra.mxu0 %vm312_vm1, %v11585_v63  ;;  %v11594_v63 = vld [vmem:[#allocation27_spill] sm:$0xff] }
 0x120   : > { %8781 = vmatmul.mubr.msk.f32.gmra.mxu1 %vm312_vm1, %v9929_v18  ;;  %8893 = vmatpush3.msk.msra.mxu0 %vm554_vm0, %v9963_v46  ;;  %v11591_v18 = vld [vmem:[#allocation25_spill] sm:$0xff]  ;;  %v10139_v46 = vpop.f32.mrf.mxu1 }
 0x121   : > { %8783 = vmatprep.mubr.msk.f32.mxu1 %vm312_vm1, %v9931_v12  ;;  %8797 = vmatprep.mubr.msk.f32.mxu0 %vm312_vm1, %v11586_v1  ;;  %v11590_v12 = vld [vmem:[#allocation24_spill] sm:$0xff] }
 0x123   : > { %8798 = vmatmul.mubr.msk.f32.gmra.mxu0 %vm312_vm1, %v11587_v3 }
 0x124   : > { %8784 = vmatmul.mubr.msk.f32.gmra.mxu1 %vm312_vm1, %v9941_v22  ;;  %8800 = vmatprep.mubr.msk.f32.mxu0 %vm312_vm1, %v11588_v5  ;;  %v624_v22 = vpop.f32.mrf.mxu0 }
 0x125   : > { %8786 = vmatprep.mubr.msk.f32.mxu1 %vm312_vm1, %v9943_v20  ;;  %v10137_v20 = vld [vmem:[#allocation10 + $0x12a] sm:$0xff] }
 0x126   : > { %11592 = vst [vmem:[#allocation36_spill] sm:$0xff] %v10137_v20 }
 0x127   : > { %8801 = vmatmul.mubr.msk.f32.gmra.mxu0 %vm312_vm1, %v11590_v12 }
 0x128   : > { %8787 = vmatmul.mubr.msk.f32.gmra.mxu1 %vm312_vm1, %v9953_v33  ;;  %8803 = vmatprep.mubr.msk.f32.mxu0 %vm312_vm1, %v11591_v18  ;;  %v11593_v33 = vld [vmem:[#allocation26_spill] sm:$0xff]  ;;  %v11596_v18 = vld [vmem:[#allocation28_spill] sm:$0xff] }
 0x129   : > { %8789 = vmatprep.mubr.msk.f32.mxu1 %vm312_vm1, %v10125_v7 }
 0x12b   : > { %v8499_v14 = vpop.f32.mrf.mxu0  ;;  %8804 = vmatmul.mubr.msk.f32.gmra.mxu0 %vm312_vm1, %v11593_v33  ;;  %v11597_v33 = vld [vmem:[#allocation29_spill] sm:$0xff] }
 0x12c   : > { %v10141_v59 = vpop.f32.mrf.mxu1  ;;  %8790 = vmatmul.mubr.msk.f32.gmra.mxu1 %vm312_vm1, %v10137_v20  ;;  %8806 = vmatprep.mubr.msk.f32.mxu0 %vm312_vm1, %v11594_v63 }
 0x12d   : > { %8844 = vmatprep.mubr.msk.f32.mxu1 %vm312_vm1, %v9520_v32  ;;  %v634_v1 = vpop.f32.mrf.mxu0 }
 0x12e   : > { %v10151_v3 = vpop.f32.mrf.mxu1 }
 0x12f   : > { %11595 = vst [vmem:[#allocation37_spill] sm:$0xff] %v10151_v3  ;;  %v8502_v5 = vpop.f32.mrf.mxu0  ;;  %8807 = vmatmul.mubr.msk.f32.gmra.mxu0 %vm312_vm1, %v11596_v18  ;;  %v11598_v3 = vld [vmem:[#allocation30_spill] sm:$0xff] }
 0x130   : > { %v8546_v12 = vpop.f32.mrf.mxu1  ;;  %8845 = vmatmul.mubr.msk.f32.vlgmr.msra.gmra.mxu1 %vm312_vm1, %v9530_v34  ;;  %8809 = vmatprep.mubr.msk.f32.mxu0 %vm312_vm1, %v11597_v33 }
 0x131   : > { %v10157_v20 = vadd.f32 %v8546_v12, %v8496_v9  ;;  %8847 = vmatprep.mubr.msk.f32.mxu1 %vm312_vm1, %v9532_v36  ;;  %v644_v32 = vpop.f32.mrf.mxu0  ;;  %v11599_v9 = vld [vmem:[#allocation31_spill] sm:$0xff] }
 0x132   : > { %v948_v63 = vpop.f32.mrf.mxu1 }
 0x133   : > { %v10163_v7 = vadd.f32 %v948_v63, %v624_v22  ;;  %v8505_v61 = vpop.f32.mrf.mxu0  ;;  %8810 = vmatmul.mubr.msk.f32.gmra.mxu0 %vm312_vm1, %v11598_v3  ;;  %v11600_v63 = vld [vmem:[#allocation32_spill] sm:$0xff] }
 0x134   : > { %v8549_v39 = vpop.f32.mrf.mxu1  ;;  %8848 = vmatmul.mubr.msk.f32.gmra.mxu1 %vm312_vm1, %v9543_v38  ;;  %8812 = vmatprep.mubr.msk.f32.mxu0 %vm312_vm1, %v11599_v9 }
 0x135   : > { %v10169_v34 = vadd.f32 %v8549_v39, %v8499_v14  ;;  %8850 = vmatprep.mubr.msk.f32.mxu1 %vm312_vm1, %v9547_v40  ;;  %v654_v36 = vpop.f32.mrf.mxu0  ;;  %v11601_v39 = vld [vmem:[#allocation33_spill] sm:$0xff] }
 0x136   : > { %v958_v12 = vpop.f32.mrf.mxu1 }
 0x137   : > { %v10175_v22 = vadd.f32 %v958_v12, %v634_v1  ;;  %v8508_v18 = vpop.f32.mrf.mxu0  ;;  %8813 = vmatmul.mubr.msk.f32.gmra.mxu0 %vm312_vm1, %v11600_v63  ;;  %v11602_v12 = vld [vmem:[#allocation35_spill] sm:$0xff] }
 0x138   : > { %v8552_v33 = vpop.f32.mrf.mxu1  ;;  %8851 = vmatmul.mubr.msk.f32.gmra.mxu1 %vm312_vm1, %v9553_v44  ;;  %8815 = vmatprep.mubr.msk.f32.mxu0 %vm312_vm1, %v11601_v39  ;;  %v11603_v39 = vld [vmem:[#allocation38_spill] sm:$0xff] }
 0x139   : > { %v10181_v38 = vadd.f32 %v8552_v33, %v8502_v5  ;;  %8853 = vmatprep.mubr.msk.f32.mxu1 %vm312_vm1, %v9564_v47  ;;  %v664_v40 = vpop.f32.mrf.mxu0 }
 0x13a   : > { %v968_v14 = vpop.f32.mrf.mxu1 }
 0x13b   : > { %v10187_v1 = vadd.f32 %v968_v14, %v644_v32  ;;  %v8511_v3 = vpop.f32.mrf.mxu0  ;;  %8816 = vmatmul.mubr.msk.f32.gmra.mxu0 %vm312_vm1, %v11602_v12 }
 0x13c   : > { %v8555_v9 = vpop.f32.mrf.mxu1  ;;  %8854 = vmatmul.mubr.msk.f32.gmra.mxu1 %vm312_vm1, %v9598_v58  ;;  %8818 = vmatprep.mubr.msk.f32.mxu0 %vm312_vm1, %v9711_v24 }
 0x13d   : > { %v10193_v44 = vadd.f32 %v8555_v9, %v8505_v61  ;;  %8856 = vmatprep.mubr.msk.f32.mxu1 %vm312_vm1, %v9602_v60  ;;  %v674_v47 = vpop.f32.mrf.mxu0  ;;  %v11604_v9 = vld [vmem:[#allocation41_spill] sm:$0xff] }
 0x13e   : > { %v978_v5 = vpop.f32.mrf.mxu1 }
 0x13f   : > { %v10199_v32 = vadd.f32 %v978_v5, %v654_v36  ;;  %v8514_v33 = vpop.f32.mrf.mxu0  ;;  %8819 = vmatmul.mubr.msk.f32.gmra.mxu0 %vm312_vm1, %v11603_v39 }
 0x140   : > { %v8558_v63 = vpop.f32.mrf.mxu1  ;;  %8857 = vmatmul.mubr.msk.f32.gmra.mxu1 %vm312_vm1, %v9617_v62  ;;  %8821 = vmatprep.mubr.msk.f32.mxu0 %vm312_vm1, %v9727_v42 }
 0x141   : > { %v10205_v58 = vadd.f32 %v8558_v63, %v8508_v18  ;;  %8859 = vmatprep.mubr.msk.f32.mxu1 %vm312_vm1, %v9621_v0  ;;  %v684_v60 = vpop.f32.mrf.mxu0 }
 0x142   : > { %v988_v61 = vpop.f32.mrf.mxu1 }
 0x143   : > { %v10211_v24 = vadd.f32 %v988_v61, %v664_v40  ;;  %v8517_v36 = vpop.f32.mrf.mxu0  ;;  %8822 = vmatmul.mubr.msk.f32.gmra.mxu0 %vm312_vm1, %v11604_v9  ;;  %v3082_v9 = vld [vmem:[#allocation10 + $0xfd] sm:$0xff] }
 0x144   : > { %v8561_v14 = vpop.f32.mrf.mxu1  ;;  %8860 = vmatmul.mubr.msk.f32.gmra.mxu1 %vm312_vm1, %v9633_v2  ;;  %8824 = vmatprep.mubr.msk.f32.mxu0 %vm312_vm1, %v9741_v49 }
 0x145   : > { %v10217_v62 = vadd.f32 %v8561_v14, %v8511_v3  ;;  %8862 = vmatprep.mubr.msk.f32.mxu1 %vm312_vm1, %v9637_v4  ;;  %v694_v0 = vpop.f32.mrf.mxu0 }
 0x146   : > { %v998_v42 = vpop.f32.mrf.mxu1 }
 0x147   : > { %v10223_v18 = vadd.f32 %v998_v42, %v674_v47  ;;  %v8520_v40 = vpop.f32.mrf.mxu0  ;;  %8825 = vmatmul.mubr.msk.f32.gmra.mxu0 %vm312_vm1, %v9750_v51 }
 0x148   : > { %v8564_v12 = vpop.f32.mrf.mxu1  ;;  %8863 = vmatmul.mubr.msk.f32.gmra.mxu1 %vm312_vm1, %v9649_v6  ;;  %8827 = vmatprep.mubr.msk.f32.mxu0 %vm312_vm1, %v9752_v53 }
 0x149   : > { %v10229_v2 = vadd.f32 %v8564_v12, %v8514_v33  ;;  %8865 = vmatprep.mubr.msk.f32.mxu1 %vm312_vm1, %v9653_v8  ;;  %v704_v4 = vpop.f32.mrf.mxu0 }
 0x14a   : > { %v1008_v49 = vpop.f32.mrf.mxu1 }
 0x14b   : > { %v10235_v3 = vadd.f32 %v1008_v49, %v684_v60  ;;  %v8523_v47 = vpop.f32.mrf.mxu0  ;;  %8828 = vmatmul.mubr.msk.f32.gmra.mxu0 %vm312_vm1, %v9765_v56 }
 0x14c   : > { %v8567_v5 = vpop.f32.mrf.mxu1  ;;  %8866 = vmatmul.mubr.msk.f32.gmra.mxu1 %vm312_vm1, %v9665_v10  ;;  %8830 = vmatprep.mubr.msk.f32.mxu0 %vm312_vm1, %v9771_v16 }
 0x14d   : > { %v10241_v6 = vadd.f32 %v8567_v5, %v8517_v36  ;;  %8868 = vmatprep.mubr.msk.f32.mxu1 %vm312_vm1, %v9671_v13  ;;  %v714_v8 = vpop.f32.mrf.mxu0 }
 0x14e   : > { %v1018_v51 = vpop.f32.mrf.mxu1 }
 0x14f   : > { %v10247_v53 = vadd.f32 %v1018_v51, %v694_v0  ;;  %v8526_v33 = vpop.f32.mrf.mxu0  ;;  %8831 = vmatmul.mubr.msk.f32.gmra.mxu0 %vm312_vm1, %v9785_v57  ;;  %v2698_v57 = vld [vmem:[#allocation10 + $0x132] sm:$0xff] }
 0x150   : > { %v8570_v63 = vpop.f32.mrf.mxu1  ;;  %8869 = vmatmul.mubr.msk.f32.gmra.mxu1 %vm312_vm1, %v9689_v17  ;;  %8833 = vmatprep.mubr.msk.f32.mxu0 %vm312_vm1, %v9789_v31 }
 0x151   : > { %v10253_v10 = vadd.f32 %v8570_v63, %v8520_v40  ;;  %8871 = vmatprep.mubr.msk.f32.mxu1 %vm312_vm1, %v9693_v19  ;;  %v724_v13 = vpop.f32.mrf.mxu0 }
 0x152   : > { %v1028_v56 = vpop.f32.mrf.mxu1 }
 0x153   : > { %v10259_v16 = vadd.f32 %v1028_v56, %v704_v4  ;;  %v8529_v39 = vpop.f32.mrf.mxu0  ;;  %8834 = vmatmul.mubr.msk.f32.gmra.mxu0 %vm312_vm1, %v9801_v27  ;;  %v3084_v4 = vld [vmem:[#allocation10 + $0x10f] sm:$0xff] }
 0x154   : > { %v8573_v60 = vpop.f32.mrf.mxu1  ;;  %8872 = vmatmul.mubr.msk.f32.gmra.mxu1 %vm312_vm1, %v11575_v23  ;;  %8836 = vmatprep.mubr.msk.f32.mxu0 %vm312_vm1, %v9985_v28  ;;  %v2699_v28 = vld [vmem:[#allocation10 + $0x13a] sm:$0xff] }
 0x155   : > { %v10265_v17 = vadd.f32 %v8573_v60, %v8523_v47  ;;  %8874 = vmatprep.mubr.msk.f32.mxu1 %vm312_vm1, %v11576_v54  ;;  %v734_v31 = vpop.f32.mrf.mxu0 }
 0x156   : > { %v1038_v19 = vpop.f32.mrf.mxu1 }
 0x157   : > { %v10271_v61 = vadd.f32 %v1038_v19, %v714_v8  ;;  %v8532_v36 = vpop.f32.mrf.mxu0  ;;  %8837 = vmatmul.mubr.msk.f32.gmra.mxu0 %vm312_vm1, %v9995_v30 }
 0x158   : > { %v8576_v14 = vpop.f32.mrf.mxu1  ;;  %8875 = vmatmul.mubr.msk.f32.gmra.mxu1 %vm312_vm1, %v11577_v55  ;;  %8839 = vmatprep.mubr.msk.f32.mxu0 %vm312_vm1, %v2698_v57  ;;  %v3083_v55 = vld [vmem:[#allocation10 + $0x105] sm:$0xff] }
 0x159   : > { %v10277_v27 = vadd.f32 %v8576_v14, %v8526_v33  ;;  %8877 = vmatprep.mubr.msk.f32.mxu1 %vm312_vm1, %v11578_v15  ;;  %v744_v23 = vpop.f32.mrf.mxu0 }
 0x15a   : > { %v1048_v54 = vpop.f32.mrf.mxu1 }
 0x15b   : > { %v10282_v0 = vadd.f32 %v1048_v54, %v724_v13  ;;  %v8535_v42 = vpop.f32.mrf.mxu0  ;;  %8840 = vmatmul.mubr.msk.f32.gmra.mxu0 %vm312_vm1, %v2699_v28 }
 0x15c   : > { %v8579_v40 = vpop.f32.mrf.mxu1  ;;  %8878 = vmatmul.mubr.msk.f32.gmra.mxu1 %vm312_vm1, %v11579_v41  ;;  %8894 = vmatprep.mubr.msk.f32.mxu0 %vm312_vm1, %v9773_v50  ;;  %v3085_v50 = vld [vmem:[#allocation10 + $0x117] sm:$0xff] }
 0x15d   : > { %v10287_v30 = vadd.f32 %v8579_v40, %v8529_v39  ;;  %8880 = vmatprep.mubr.msk.f32.mxu1 %vm312_vm1, %v3082_v9  ;;  %v754_v15 = vpop.f32.mrf.mxu0  ;;  %v11606_v40 = vld [vmem:[#allocation42_spill] sm:$0xff] }
 0x15e   : > { %v1058_v12 = vpop.f32.mrf.mxu1 }
 0x15f   : > { %v10292_v49 = vadd.f32 %v1058_v12, %v734_v31  ;;  %v8596_v5 = vpop.f32.mrf.mxu0  ;;  %8895 = vmatmul.mubr.msk.f32.vlgmr.msra.gmra.mxu0 %vm312_vm1, %v9787_v52 }
 0x160   : > { %v8582_v47 = vpop.f32.mrf.mxu1  ;;  %8881 = vmatmul.mubr.msk.f32.gmra.mxu1 %vm312_vm1, %v3083_v55  ;;  %v1466_v8 = vadd.f32 %v8596_v5, %v10157_v20  ;;  %8897 = vmatprep.mubr.msk.f32.mxu0 %vm312_vm1, %v9791_v29 }
 0x161   : > { %v10297_v41 = vadd.f32 %v8582_v47, %v8532_v36  ;;  %8883 = vmatprep.mubr.msk.f32.mxu1 %vm312_vm1, %v3084_v4  ;;  %v1306_v33 = vpop.f32.mrf.mxu0  ;;  %v11608_v47 = vld [vmem:[#allocation44_spill] sm:$0xff] }
 0x162   : > { %v1068_v51 = vpop.f32.mrf.mxu1  ;;  %v1465_v13 = vadd.f32 %v1306_v33, %v10163_v7  ;;  %v3088_v7 = vld [vmem:[#allocation10 + $0x133] sm:$0xff] }
 0x163   : > { %v10303_v63 = vadd.f32 %v1068_v51, %v744_v23  ;;  %v8599_v39 = vpop.f32.mrf.mxu0  ;;  %8898 = vmatmul.mubr.msk.f32.gmra.mxu0 %vm312_vm1, %v9803_v25  ;;  %v11605_v23 = vld [vmem:[#allocation37_spill] sm:$0xff] }
 0x164   : > { %v8585_v56 = vpop.f32.mrf.mxu1  ;;  %8884 = vmatmul.mubr.msk.f32.gmra.mxu1 %vm312_vm1, %v3085_v50  ;;  %v1468_v20 = vadd.f32 %v8599_v39, %v10169_v34  ;;  %8900 = vmatprep.mubr.msk.f32.mxu0 %vm312_vm1, %v9805_v43  ;;  %v3089_v43 = vld [vmem:[#allocation10 + $0x13b] sm:$0xff] }
 0x165   : > { %v10309_v52 = vadd.f32 %v8585_v56, %v8535_v42  ;;  %8886 = vmatprep.mubr.msk.f32.mxu1 %vm312_vm1, %v10087_v48  ;;  %v1316_v60 = vpop.f32.mrf.mxu0  ;;  %v11610_v39 = vld [vmem:[#allocation46_spill] sm:$0xff] }
 0x166   : > { %v1078_v29 = vpop.f32.mrf.mxu1  ;;  %v1467_v19 = vadd.f32 %v1316_v60, %v10175_v22 }
 0x167   : > { %v10316_v31 = vadd.f32 %v1078_v29, %v754_v15  ;;  %v8602_v36 = vpop.f32.mrf.mxu0  ;;  %8901 = vmatmul.mubr.msk.f32.gmra.mxu0 %vm312_vm1, %v9815_v35 }
 0x168   : > { %v8588_v57 = vpop.f32.mrf.mxu1  ;;  %8887 = vmatmul.mubr.msk.f32.gmra.mxu1 %vm312_vm1, %v10097_v45  ;;  %v1470_v48 = vadd.f32 %v8602_v36, %v10181_v38  ;;  %8903 = vmatprep.mubr.msk.f32.mxu0 %vm312_vm1, %v9817_v26 }
 0x169   : > { %v10324_v25 = vadd.f32 %v8588_v57, %v10127_v11  ;;  %8889 = vmatprep.mubr.msk.f32.mxu1 %vm312_vm1, %v3088_v7  ;;  %v1326_v22 = vpop.f32.mrf.mxu0 }
 0x16a   : > { %v1088_v34 = vpop.f32.mrf.mxu1  ;;  %v1469_v45 = vadd.f32 %v1326_v22, %v10187_v1 }
 0x16b   : > { %v10331_v14 = vadd.f32 %v1088_v34, %v10139_v46  ;;  %v8605_v35 = vpop.f32.mrf.mxu0  ;;  %8904 = vmatmul.mubr.msk.f32.gmra.mxu0 %vm312_vm1, %v9829_v21 }
 0x16c   : > { %v8591_v28 = vpop.f32.mrf.mxu1  ;;  %8890 = vmatmul.mubr.msk.f32.gmra.mxu1 %vm312_vm1, %v3089_v43  ;;  %v1472_v26 = vadd.f32 %v8605_v35, %v10193_v44  ;;  %8906 = vmatprep.mubr.msk.f32.mxu0 %vm312_vm1, %v9831_v37  ;;  %v11607_v44 = vld [vmem:[#allocation43_spill] sm:$0xff]  ;;  %v11612_v43 = vld [vmem:[#allocation48_spill] sm:$0xff] }
 0x16d   : > { %v10338_v11 = vadd.f32 %v8591_v28, %v10141_v59  ;;  %v1336_v46 = vpop.f32.mrf.mxu0 }
 0x16e   : > { %v1098_v38 = vpop.f32.mrf.mxu1  ;;  %v1471_v1 = vadd.f32 %v1336_v46, %v10199_v32 }
 0x16f   : > { %v10344_v54 = vadd.f32 %v1098_v38, %v11605_v23  ;;  %v8608_v9 = vpop.f32.mrf.mxu0  ;;  %8907 = vmatmul.mubr.msk.f32.gmra.mxu0 %vm312_vm1, %v11606_v40  ;;  %v3466_v38 = vld [vmem:[#allocation10 + $0xc8] sm:$0xff] }
 0x170   : > { %v8646_v42 = vpop.f32.mrf.mxu1  ;;  %v1474_v21 = vadd.f32 %v8608_v9, %v10205_v58  ;;  %8909 = vmatprep.mubr.msk.f32.mxu0 %vm312_vm1, %v11607_v44  ;;  %v11609_v58 = vld [vmem:[#allocation45_spill] sm:$0xff] }
 0x171   : > { %v10350_v59 = vadd.f32 %v8646_v42, %v1466_v8  ;;  %v1346_v37 = vpop.f32.mrf.mxu0  ;;  %v3468_v44 = vld [vmem:[#allocation10 + $0xda] sm:$0xff] }
 0x172   : > { %v1696_v55 = vpop.f32.mrf.mxu1  ;;  %v1473_v15 = vadd.f32 %v1346_v37, %v10211_v24 }
 0x173   : > { %v10355_v12 = vadd.f32 %v1696_v55, %v1465_v13  ;;  %v8611_v4 = vpop.f32.mrf.mxu0  ;;  %8910 = vmatmul.mubr.msk.f32.gmra.mxu0 %vm312_vm1, %v11608_v47 }
 0x174   : > { %v8649_v32 = vpop.f32.mrf.mxu1  ;;  %v1476_v5 = vadd.f32 %v8611_v4, %v10217_v62  ;;  %8912 = vmatprep.mubr.msk.f32.mxu0 %vm312_vm1, %v11609_v58  ;;  %v11611_v62 = vld [vmem:[#allocation47_spill] sm:$0xff]  ;;  %v3470_v58 = vld [vmem:[#allocation10 + $0xec] sm:$0xff] }
 0x175   : > { %v10360_v50 = vadd.f32 %v8649_v32, %v1468_v20  ;;  %v1356_v8 = vpop.f32.mrf.mxu0 }
 0x176   : > { %v1706_v51 = vpop.f32.mrf.mxu1  ;;  %v1475_v33 = vadd.f32 %v1356_v8, %v10223_v18 }
 0x177   : > { %v10365_v56 = vadd.f32 %v1706_v51, %v1467_v19  ;;  %v8614_v24 = vpop.f32.mrf.mxu0  ;;  %8913 = vmatmul.mubr.msk.f32.gmra.mxu0 %vm312_vm1, %v11610_v39 }
 0x178   : > { %v8652_v13 = vpop.f32.mrf.mxu1  ;;  %v1478_v29 = vadd.f32 %v8614_v24, %v10229_v2  ;;  %8915 = vmatprep.mubr.msk.f32.mxu0 %vm312_vm1, %v11611_v62  ;;  %v11613_v2 = vld [vmem:[#allocation49_spill] sm:$0xff]  ;;  %v3472_v62 = vld [vmem:[#allocation10 + $0xfe] sm:$0xff] }
 0x179   : > { %v10370_v60 = vadd.f32 %v8652_v13, %v1470_v48  ;;  %v1366_v20 = vpop.f32.mrf.mxu0  ;;  %v3465_v48 = vld [vmem:[#allocation10 + $0xbe] sm:$0xff] }
 0x17a   : > { %v1716_v7 = vpop.f32.mrf.mxu1  ;;  %v1477_v57 = vadd.f32 %v1366_v20, %v10235_v3 }
 0x17b   : > { %v10375_v36 = vadd.f32 %v1716_v7, %v1469_v45  ;;  %v8617_v18 = vpop.f32.mrf.mxu0  ;;  %8916 = vmatmul.mubr.msk.f32.gmra.mxu0 %vm312_vm1, %v11612_v43 }
 0x17c   : > { %v8655_v19 = vpop.f32.mrf.mxu1  ;;  %v1480_v34 = vadd.f32 %v8617_v18, %v10241_v6  ;;  %8918 = vmatprep.mubr.msk.f32.mxu0 %vm312_vm1, %v11613_v2  ;;  %v3474_v2 = vld [vmem:[#allocation10 + $0x110] sm:$0xff] }
 0x17d   : > { %v10380_v22 = vadd.f32 %v8655_v19, %v1472_v26  ;;  %v1376_v28 = vpop.f32.mrf.mxu0  ;;  %v3467_v26 = vld [vmem:[#allocation10 + $0xd0] sm:$0xff] }
 0x17e   : > { %v1726_v35 = vpop.f32.mrf.mxu1  ;;  %v1479_v3 = vadd.f32 %v1376_v28, %v10247_v53 }
 0x17f   : > { %v10385_v45 = vadd.f32 %v1726_v35, %v1471_v1  ;;  %v8620_v46 = vpop.f32.mrf.mxu0  ;;  %8919 = vmatmul.mubr.msk.f32.gmra.mxu0 %vm312_vm1, %v3465_v48 }
 0x180   : > { %v8658_v23 = vpop.f32.mrf.mxu1  ;;  %v1482_v9 = vadd.f32 %v8620_v46, %v10253_v10  ;;  %8921 = vmatprep.mubr.msk.f32.mxu0 %vm312_vm1, %v3466_v38  ;;  %v3469_v10 = vld [vmem:[#allocation10 + $0xe2] sm:$0xff] }
 0x181   : > { %v10389_v6 = vadd.f32 %v8658_v23, %v1474_v21  ;;  %v1386_v42 = vpop.f32.mrf.mxu0 }
 0x182   : > { %v1736_v40 = vpop.f32.mrf.mxu1  ;;  %v1481_v37 = vadd.f32 %v1386_v42, %v10259_v16 }
 0x183   : > { %v10393_v55 = vadd.f32 %v1736_v40, %v1473_v15  ;;  %v8623_v53 = vpop.f32.mrf.mxu0  ;;  %8922 = vmatmul.mubr.msk.f32.gmra.mxu0 %vm312_vm1, %v3467_v26 }
 0x184   : > { %v8661_v1 = vpop.f32.mrf.mxu1  ;;  %v1484_v4 = vadd.f32 %v8623_v53, %v10265_v17  ;;  %8924 = vmatprep.mubr.msk.f32.mxu0 %vm312_vm1, %v3468_v44  ;;  %v3471_v17 = vld [vmem:[#allocation10 + $0xf4] sm:$0xff] }
 0x185   : > { %v10397_v32 = vadd.f32 %v8661_v1, %v1476_v5  ;;  %v1396_v21 = vpop.f32.mrf.mxu0  ;;  %v3478_v53 = vld [vmem:[#allocation10 + $0x134] sm:$0xff] }
 0x186   : > { %v1746_v47 = vpop.f32.mrf.mxu1  ;;  %v1483_v8 = vadd.f32 %v1396_v21, %v10271_v61  ;;  %v11615_v21 = vld [vmem:[#allocation36_spill] sm:$0xff] }
 0x187   : > { %v10401_v51 = vadd.f32 %v1746_v47, %v1475_v33  ;;  %v8626_v16 = vpop.f32.mrf.mxu0  ;;  %8925 = vmatmul.mubr.msk.f32.gmra.mxu0 %vm312_vm1, %v3469_v10 }
 0x188   : > { %v8664_v15 = vpop.f32.mrf.mxu1  ;;  %v1486_v24 = vadd.f32 %v8626_v16, %v10277_v27  ;;  %8927 = vmatprep.mubr.msk.f32.mxu0 %vm312_vm1, %v3470_v58  ;;  %v3473_v27 = vld [vmem:[#allocation10 + $0x106] sm:$0xff] }
 0x189   : > { %v10405_v13 = vadd.f32 %v8664_v15, %v1478_v29  ;;  %v1406_v5 = vpop.f32.mrf.mxu0 }
 0x18a   : > { %v1756_v39 = vpop.f32.mrf.mxu1  ;;  %v1485_v20 = vadd.f32 %v1406_v5, %v10282_v0 }
 0x18b   : > { %v10409_v7 = vadd.f32 %v1756_v39, %v1477_v57  ;;  %v8629_v61 = vpop.f32.mrf.mxu0  ;;  %8928 = vmatmul.mubr.msk.f32.gmra.mxu0 %vm312_vm1, %v3471_v17 }
 0x18c   : > { %v8667_v33 = vpop.f32.mrf.mxu1  ;;  %v1488_v18 = vadd.f32 %v8629_v61, %v10287_v30  ;;  %8930 = vmatprep.mubr.msk.f32.mxu0 %vm312_vm1, %v3472_v62  ;;  %v3475_v30 = vld [vmem:[#allocation10 + $0x118] sm:$0xff] }
 0x18d   : > { %v10413_v19 = vadd.f32 %v8667_v33, %v1480_v34  ;;  %v1416_v29 = vpop.f32.mrf.mxu0 }
 0x18e   : > { %v1766_v43 = vpop.f32.mrf.mxu1  ;;  %v1487_v48 = vadd.f32 %v1416_v29, %v10292_v49 }
 0x18f   : > { %v10417_v28 = vadd.f32 %v1766_v43, %v1479_v3  ;;  %v8632_v0 = vpop.f32.mrf.mxu0  ;;  %8931 = vmatmul.mubr.msk.f32.gmra.mxu0 %vm312_vm1, %v3473_v27 }
 0x190   : > { %v8670_v57 = vpop.f32.mrf.mxu1  ;;  %v1490_v35 = vadd.f32 %v8632_v0, %v10297_v41  ;;  %8933 = vmatprep.mubr.msk.f32.mxu0 %vm312_vm1, %v3474_v2  ;;  %v11614_v41 = vld [vmem:[#allocation34_spill] sm:$0xff] }
 0x191   : > { %v10421_v38 = vadd.f32 %v8670_v57, %v1482_v9  ;;  %v1426_v34 = vpop.f32.mrf.mxu0 }
 0x192   : > { %v1776_v46 = vpop.f32.mrf.mxu1  ;;  %v1489_v23 = vadd.f32 %v1426_v34, %v10303_v63 }
 0x193   : > { %v10425_v26 = vadd.f32 %v1776_v46, %v1481_v37  ;;  %v8635_v49 = vpop.f32.mrf.mxu0  ;;  %8934 = vmatmul.mubr.msk.f32.gmra.mxu0 %vm312_vm1, %v3475_v30 }
 0x194   : > { %v8673_v3 = vpop.f32.mrf.mxu1  ;;  %v1492_v42 = vadd.f32 %v8635_v49, %v10309_v52  ;;  %8936 = vmatprep.mubr.msk.f32.mxu0 %vm312_vm1, %v11614_v41 }
 0x195   : > { %v10429_v40 = vadd.f32 %v8673_v3, %v1484_v4  ;;  %v1436_v9 = vpop.f32.mrf.mxu0  ;;  %v3479_v4 = vld [vmem:[#allocation10 + $0x13c] sm:$0xff] }
 0x196   : > { %v1786_v44 = vpop.f32.mrf.mxu1  ;;  %v1491_v1 = vadd.f32 %v1436_v9, %v10316_v31 }
 0x197   : > { %v10434_v10 = vadd.f32 %v1786_v44, %v1483_v8  ;;  %v8638_v63 = vpop.f32.mrf.mxu0  ;;  %8937 = vmatmul.mubr.msk.f32.gmra.mxu0 %vm312_vm1, %v11615_v21 }
 0x198   : > { %v8676_v37 = vpop.f32.mrf.mxu1  ;;  %v1494_v47 = vadd.f32 %v8638_v63, %v10324_v25  ;;  %8939 = vmatprep.mubr.msk.f32.mxu0 %vm312_vm1, %v3478_v53 }
 0x199   : > { %v10439_v52 = vadd.f32 %v8676_v37, %v1486_v24  ;;  %v1446_v58 = vpop.f32.mrf.mxu0 }
 0x19a   : > { %v1796_v16 = vpop.f32.mrf.mxu1  ;;  %v1493_v15 = vadd.f32 %v1446_v58, %v10331_v14 }
 0x19b   : > { %v10443_v17 = vadd.f32 %v1796_v16, %v1485_v20  ;;  %v8641_v31 = vpop.f32.mrf.mxu0  ;;  %8940 = vmatmul.mubr.msk.f32.gmra.mxu0 %vm312_vm1, %v3479_v4 }
 0x19c   : > { %v8679_v8 = vpop.f32.mrf.mxu1  ;;  %v1496_v5 = vadd.f32 %v8641_v31, %v10338_v11 }
 0x19d   : > { %v10447_v39 = vadd.f32 %v8679_v8, %v1488_v18  ;;  %v1456_v25 = vpop.f32.mrf.mxu0 }
 0x19e   : > { %v1806_v24 = vpop.f32.mrf.mxu1  ;;  %v1495_v62 = vadd.f32 %v1456_v25, %v10344_v54 }
 0x19f   : > { %v10450_v61 = vadd.f32 %v1806_v24, %v1487_v48  ;;  %v8696_v27 = vpop.f32.mrf.mxu0 }
 0x1a0   : > { %v8682_v33 = vpop.f32.mrf.mxu1  ;;  %v2246_v14 = vadd.f32 %v8696_v27, %v10350_v59 }
 0x1a1   : > { %v10452_v29 = vadd.f32 %v8682_v33, %v1490_v35  ;;  %v2086_v43 = vpop.f32.mrf.mxu0 }
 0x1a2   : > { %v1816_v20 = vpop.f32.mrf.mxu1  ;;  %v2245_v11 = vadd.f32 %v2086_v43, %v10355_v12 }
 0x1a3   : > { %v10455_v2 = vadd.f32 %v1816_v20, %v1489_v23  ;;  %v8699_v0 = vpop.f32.mrf.mxu0 }
 0x1a4   : > { %v8685_v18 = vpop.f32.mrf.mxu1  ;;  %v2248_v54 = vadd.f32 %v8699_v0, %v10360_v50 }
 0x1a5   : > { %v10458_v57 = vadd.f32 %v8685_v18, %v1492_v42  ;;  %v2096_v30 = vpop.f32.mrf.mxu0 }
 0x1a6   : > { %v1826_v48 = vpop.f32.mrf.mxu1  ;;  %v10464_v35 = vadd.f32 %v2096_v30, %v10365_v56 }
 0x1a7   : > { %v10461_v34 = vadd.f32 %v1826_v48, %v1491_v1  ;;  %v8702_v46 = vpop.f32.mrf.mxu0 }
 0x1a8   : > { %v8688_v59 = vpop.f32.mrf.mxu1  ;;  %v2250_v23 = vadd.f32 %v8702_v46, %v10370_v60 }
 0x1a9   : > { %v10466_v49 = vadd.f32 %v8688_v59, %v1494_v47  ;;  %v2106_v3 = vpop.f32.mrf.mxu0 }
 0x1aa   : > { %v1836_v12 = vpop.f32.mrf.mxu1  ;;  %v2249_v42 = vadd.f32 %v2106_v3, %v10375_v36 }
 0x1ab   : > { %v10469_v41 = vadd.f32 %v1836_v12, %v1493_v15  ;;  %v8705_v9 = vpop.f32.mrf.mxu0 }
 0x1ac   : > { %v8691_v50 = vpop.f32.mrf.mxu1  ;;  %v2252_v53 = vadd.f32 %v8705_v9, %v10380_v22 }
 0x1ad   : > { %v10472_v44 = vadd.f32 %v8691_v50, %v1496_v5  ;;  %v2116_v1 = vpop.f32.mrf.mxu0 }
 0x1ae   : > { %v1846_v56 = vpop.f32.mrf.mxu1  ;;  %v2251_v37 = vadd.f32 %v2116_v1, %v10385_v45 }
 0x1af   : > { %v10475_v63 = vadd.f32 %v1846_v56, %v1495_v62  ;;  %v8708_v21 = vpop.f32.mrf.mxu0 }
 0x1b0   : > { %v8746_v60 = vpop.f32.mrf.mxu1  ;;  %v2254_v47 = vadd.f32 %v8708_v21, %v10389_v6 }
 0x1b1   : > { %v10479_v4 = vadd.f32 %v8746_v60, %v2246_v14  ;;  %v2126_v58 = vpop.f32.mrf.mxu0 }
 0x1b2   : > { %v2476_v36 = vpop.f32.mrf.mxu1  ;;  %v2253_v16 = vadd.f32 %v2126_v58, %v10393_v55 }
 0x1b3   : > { %v10482_v15 = vadd.f32 %v2476_v36, %v2245_v11  ;;  %v8711_v31 = vpop.f32.mrf.mxu0 }
 0x1b4   : > { %v8749_v22 = vpop.f32.mrf.mxu1  ;;  %v2256_v8 = vadd.f32 %v8711_v31, %v10397_v32 }
 0x1b5   : > { %v10485_v5 = vadd.f32 %v8749_v22, %v2248_v54  ;;  %v2136_v25 = vpop.f32.mrf.mxu0 }
 0x1b6   : > { %v10487_v45 = vpop.f32.mrf.mxu1  ;;  %v2255_v24 = vadd.f32 %v2136_v25, %v10401_v51 }
 0x1b7   : > { %v8714_v6 = vpop.f32.mrf.mxu0 }
 0x1b8   : > { %v8752_v62 = vpop.f32.mrf.mxu1  ;;  %v2258_v33 = vadd.f32 %v8714_v6, %v10405_v13 }
 0x1b9   : > { %v10491_v27 = vadd.f32 %v8752_v62, %v2250_v23  ;;  %v2146_v55 = vpop.f32.mrf.mxu0 }
 0x1ba   : > { %v2496_v14 = vpop.f32.mrf.mxu1  ;;  %v2257_v20 = vadd.f32 %v2146_v55, %v10409_v7 }
 0x1bb   : > { %v10494_v43 = vadd.f32 %v2496_v14, %v2249_v42  ;;  %v8717_v32 = vpop.f32.mrf.mxu0 }
 0x1bc   : > { %v8755_v11 = vpop.f32.mrf.mxu1  ;;  %v2260_v18 = vadd.f32 %v8717_v32, %v10413_v19 }
 0x1bd   : > { %v10497_v0 = vadd.f32 %v8755_v11, %v2252_v53  ;;  %v2156_v54 = vpop.f32.mrf.mxu0 }
 0x1be   : > { %v2506_v51 = vpop.f32.mrf.mxu1  ;;  %v2259_v48 = vadd.f32 %v2156_v54, %v10417_v28 }
 0x1bf   : > { %v10500_v30 = vadd.f32 %v2506_v51, %v2251_v37  ;;  %v8720_v13 = vpop.f32.mrf.mxu0 }
 0x1c0   : > { %v8758_v59 = vpop.f32.mrf.mxu1  ;;  %v2262_v46 = vadd.f32 %v8720_v13, %v10421_v38 }
 0x1c1   : > { %v10503_v23 = vadd.f32 %v8758_v59, %v2254_v47  ;;  %v2166_v7 = vpop.f32.mrf.mxu0 }
 0x1c2   : > { %v2516_v12 = vpop.f32.mrf.mxu1  ;;  %v2261_v3 = vadd.f32 %v2166_v7, %v10425_v26 }
 0x1c3   : > { %v10506_v42 = vadd.f32 %v2516_v12, %v2253_v16  ;;  %v8723_v19 = vpop.f32.mrf.mxu0 }
 0x1c4   : > { %v8761_v50 = vpop.f32.mrf.mxu1  ;;  %v2264_v9 = vadd.f32 %v8723_v19, %v10429_v40 }
 0x1c5   : > { %v10509_v53 = vadd.f32 %v8761_v50, %v2256_v8  ;;  %v2176_v28 = vpop.f32.mrf.mxu0 }
 0x1c6   : > { %v2526_v56 = vpop.f32.mrf.mxu1  ;;  %v2263_v1 = vadd.f32 %v2176_v28, %v10434_v10 }
 0x1c7   : > { %v10512_v37 = vadd.f32 %v2526_v56, %v2255_v24  ;;  %v8726_v38 = vpop.f32.mrf.mxu0 }
 0x1c8   : > { %v8764_v21 = vpop.f32.mrf.mxu1  ;;  %v2266_v60 = vadd.f32 %v8726_v38, %v10439_v52 }
 0x1c9   : > { %v10515_v47 = vadd.f32 %v8764_v21, %v2258_v33  ;;  %v2186_v26 = vpop.f32.mrf.mxu0 }
 0x1ca   : > { %v2536_v58 = vpop.f32.mrf.mxu1  ;;  %v2265_v36 = vadd.f32 %v2186_v26, %v10443_v17 }
 0x1cb   : > { %v10518_v16 = vadd.f32 %v2536_v58, %v2257_v20  ;;  %v8729_v40 = vpop.f32.mrf.mxu0 }
 0x1cc   : > { %v8767_v31 = vpop.f32.mrf.mxu1  ;;  %v2268_v22 = vadd.f32 %v8729_v40, %v10447_v39 }
 0x1cd   : > { %v10521_v8 = vadd.f32 %v8767_v31, %v2260_v18  ;;  %v2196_v10 = vpop.f32.mrf.mxu0 }
 0x1ce   : > { %v2546_v25 = vpop.f32.mrf.mxu1  ;;  %v2267_v24 = vadd.f32 %v2196_v10, %v10450_v61 }
 0x1cf   : > { %v10524_v6 = vadd.f32 %v2546_v25, %v2259_v48  ;;  %v8732_v52 = vpop.f32.mrf.mxu0 }
 0x1d0   : > { %v8770_v62 = vpop.f32.mrf.mxu1  ;;  %v2270_v33 = vadd.f32 %v8732_v52, %v10452_v29 }
 0x1d1   : > { %v10527_v55 = vadd.f32 %v8770_v62, %v2262_v46  ;;  %v2206_v17 = vpop.f32.mrf.mxu0 }
 0x1d2   : > { %v2556_v14 = vpop.f32.mrf.mxu1  ;;  %v2269_v20 = vadd.f32 %v2206_v17, %v10455_v2 }
 0x1d3   : > { %v10530_v32 = vadd.f32 %v2556_v14, %v2261_v3  ;;  %v8735_v39 = vpop.f32.mrf.mxu0 }
 0x1d4   : > { %v8773_v11 = vpop.f32.mrf.mxu1  ;;  %v2272_v18 = vadd.f32 %v8735_v39, %v10458_v57 }
 0x1d5   : > { %v10533_v54 = vadd.f32 %v8773_v11, %v2264_v9  ;;  %v2216_v61 = vpop.f32.mrf.mxu0 }
 0x1d6   : > { %v2566_v51 = vpop.f32.mrf.mxu1  ;;  %v2271_v48 = vadd.f32 %v2216_v61, %v10461_v34 }
 0x1d7   : > { %v10536_v13 = vadd.f32 %v2566_v51, %v2263_v1  ;;  %v8738_v29 = vpop.f32.mrf.mxu0 }
 0x1d8   : > { %v8776_v59 = vpop.f32.mrf.mxu1  ;;  %v2274_v46 = vadd.f32 %v8738_v29, %v10466_v49 }
 0x1d9   : > { %v10539_v7 = vadd.f32 %v8776_v59, %v2266_v60  ;;  %v2226_v2 = vpop.f32.mrf.mxu0 }
 0x1da   : > { %v2576_v12 = vpop.f32.mrf.mxu1  ;;  %v2273_v3 = vadd.f32 %v2226_v2, %v10469_v41 }
 0x1db   : > { %v10542_v19 = vadd.f32 %v2576_v12, %v2265_v36  ;;  %v8741_v57 = vpop.f32.mrf.mxu0 }
 0x1dc   : > { %v8779_v50 = vpop.f32.mrf.mxu1  ;;  %v2276_v9 = vadd.f32 %v8741_v57, %v10472_v44 }
 0x1dd   : > { %v10545_v28 = vadd.f32 %v8779_v50, %v2268_v22  ;;  %v2236_v34 = vpop.f32.mrf.mxu0 }
 0x1de   : > { %v2586_v56 = vpop.f32.mrf.mxu1  ;;  %v2275_v1 = vadd.f32 %v2236_v34, %v10475_v63 }
 0x1df   : > { %v10548_v38 = vadd.f32 %v2586_v56, %v2267_v24  ;;  %v8796_v21 = vpop.f32.mrf.mxu0 }
 0x1e0   : > { %v8782_v49 = vpop.f32.mrf.mxu1  ;;  %v10553_v41 = vadd.f32 %v8796_v21, %v10479_v4 }
 0x1e1   : > { %v10550_v60 = vadd.f32 %v8782_v49, %v2270_v33  ;;  %v2867_v58 = vpop.f32.mrf.mxu0 }
 0x1e2   : > { %v2596_v26 = vpop.f32.mrf.mxu1  ;;  %v10558_v44 = vadd.f32 %v2867_v58, %v10482_v15 }
 0x1e3   : > { %v10555_v36 = vadd.f32 %v2596_v26, %v2269_v20  ;;  %v8799_v31 = vpop.f32.mrf.mxu0 }
 0x1e4   : > { %v8785_v40 = vpop.f32.mrf.mxu1  ;;  %v10563_v63 = vadd.f32 %v8799_v31, %v10485_v5 }
 0x1e5   : > { %v10560_v22 = vadd.f32 %v8785_v40, %v2272_v18  ;;  %v10565_v25 = vpop.f32.mrf.mxu0 }
 0x1e6   : > { %v2606_v10 = vpop.f32.mrf.mxu1 }
 0x1e7   : > { %v10567_v24 = vadd.f32 %v2606_v10, %v2271_v48  ;;  %v8802_v52 = vpop.f32.mrf.mxu0 }
 0x1e8   : > { %v8788_v4 = vpop.f32.mrf.mxu1  ;;  %v10572_v33 = vadd.f32 %v8802_v52, %v10491_v27 }
 0x1e9   : > { %v10569_v62 = vadd.f32 %v8788_v4, %v2274_v46  ;;  %v2887_v17 = vpop.f32.mrf.mxu0 }
 0x1ea   : > { %v2616_v15 = vpop.f32.mrf.mxu1  ;;  %v10577_v20 = vadd.f32 %v2887_v17, %v10494_v43 }
 0x1eb   : > { %v10574_v14 = vadd.f32 %v2616_v15, %v2273_v3  ;;  %v8805_v39 = vpop.f32.mrf.mxu0 }
 0x1ec   : > { %v8791_v5 = vpop.f32.mrf.mxu1  ;;  %v10582_v18 = vadd.f32 %v8805_v39, %v10497_v0 }
 0x1ed   : > { %v10579_v11 = vadd.f32 %v8791_v5, %v2276_v9  ;;  %v2897_v51 = vpop.f32.mrf.mxu0 }
 0x1ee   : > { %v2626_v61 = vpop.f32.mrf.mxu1  ;;  %v10587_v27 = vadd.f32 %v2897_v51, %v10500_v30 }
 0x1ef   : > { %v10584_v48 = vadd.f32 %v2626_v61, %v2275_v1  ;;  %v8808_v29 = vpop.f32.mrf.mxu0 }
 0x1f0   : > { %v10589_v59 = vpop.f32.mrf.mxu1  ;;  %v10592_v43 = vadd.f32 %v8808_v29, %v10503_v23 }
 0x1f1   : > { %v2907_v46 = vpop.f32.mrf.mxu0 }
 0x1f2   : > { %v10594_v2 = vpop.f32.mrf.mxu1  ;;  %v10597_v12 = vadd.f32 %v2907_v46, %v10506_v42 }
 0x1f3   : > { %v8811_v0 = vpop.f32.mrf.mxu0 }
 0x1f4   : > { %v10599_v3 = vpop.f32.mrf.mxu1  ;;  %v10602_v57 = vadd.f32 %v8811_v0, %v10509_v53 }
 0x1f5   : > { %v2917_v30 = vpop.f32.mrf.mxu0 }
 0x1f6   : > { %v10604_v50 = vpop.f32.mrf.mxu1  ;;  %v10607_v9 = vadd.f32 %v2917_v30, %v10512_v37 }
 0x1f7   : > { %v8814_v23 = vpop.f32.mrf.mxu0 }
 0x1f8   : > { %v10609_v34 = vpop.f32.mrf.mxu1  ;;  %v10612_v56 = vadd.f32 %v8814_v23, %v10515_v47 }
 0x1f9   : > { %v2927_v42 = vpop.f32.mrf.mxu0 }
 0x1fa   : > { %v10614_v1 = vpop.f32.mrf.mxu1  ;;  %v10617_v49 = vadd.f32 %v2927_v42, %v10518_v16 }
 0x1fb   : > { %v8817_v53 = vpop.f32.mrf.mxu0 }
 0x1fc   : > { %v10619_v21 = vpop.f32.mrf.mxu1  ;;  %v10622_v26 = vadd.f32 %v8817_v53, %v10521_v8 }
 0x1fd   : > { %v2937_v37 = vpop.f32.mrf.mxu0 }
 0x1fe   : > { %v10624_v58 = vpop.f32.mrf.mxu1  ;;  %v10627_v40 = vadd.f32 %v2937_v37, %v10524_v6 }
 0x1ff   : > { %v8820_v47 = vpop.f32.mrf.mxu0 }
 0x200   : > { %v10629_v31 = vpop.f32.mrf.mxu1  ;;  %v10632_v10 = vadd.f32 %v8820_v47, %v10527_v55 }
 0x201   : > { %v2947_v16 = vpop.f32.mrf.mxu0 }
 0x202   : > { %v10634_v4 = vpop.f32.mrf.mxu1  ;;  %v10637_v52 = vadd.f32 %v2947_v16, %v10530_v32 }
 0x203   : > { %v8823_v8 = vpop.f32.mrf.mxu0 }
 0x204   : > { %v10639_v15 = vpop.f32.mrf.mxu1  ;;  %v10642_v17 = vadd.f32 %v8823_v8, %v10533_v54 }
 0x205   : > { %v2957_v6 = vpop.f32.mrf.mxu0 }
 0x206   : > { %v10644_v5 = vpop.f32.mrf.mxu1  ;;  %v10647_v39 = vadd.f32 %v2957_v6, %v10536_v13 }
 0x207   : > { %v8826_v55 = vpop.f32.mrf.mxu0 }
 0x208   : > { %v10649_v61 = vpop.f32.mrf.mxu1  ;;  %v10652_v51 = vadd.f32 %v8826_v55, %v10539_v7 }
 0x209   : > { %v2967_v32 = vpop.f32.mrf.mxu0 }
 0x20a   : > { %v3317_v29 = vpop.f32.mrf.mxu1  ;;  %v10655_v46 = vadd.f32 %v2967_v32, %v10542_v19 }
 0x20b   : > { %v8829_v0 = vpop.f32.mrf.mxu0 }
 0x20c   : > { %v8867_v54 = vpop.f32.mrf.mxu1  ;;  %v10658_v30 = vadd.f32 %v8829_v0, %v10545_v28 }
 0x20d   : > { %v2977_v23 = vpop.f32.mrf.mxu0 }
 0x20e   : > { %11616 = vst [vmem:[#allocation39_spill] sm:$0xff] %v10658_v30  ;;  %v3327_v42 = vpop.f32.mrf.mxu1  ;;  %v10661_v13 = vadd.f32 %v2977_v23, %v10548_v38 }
 0x20f   : > { %v8832_v53 = vpop.f32.mrf.mxu0 }
 0x210   : > { %11617 = vst [vmem:[#allocation40_spill] sm:$0xff] %v10661_v13  ;;  %v8870_v37 = vpop.f32.mrf.mxu1  ;;  %v10664_v7 = vadd.f32 %v8832_v53, %v10550_v60  ;;  %v9278_v13 = vmov 1983009808   ;;  %v3945_v53 = vlaneseq }
 0x211   : > { %v2987_v47 = vpop.f32.mrf.mxu0  ;;  %v3943_v60 = vunpack.c.l.s4 %v9278_v13 }
 0x212   : > { %11618 = vst [vmem:[#allocation15_spill] sm:$0xff] %v10664_v7  ;;  %v3337_v16 = vpop.f32.mrf.mxu1  ;;  %v10667_v19 = vadd.f32 %v2987_v47, %v10555_v36  ;;  %v3946_v30 = vshrl.u32 %v3945_v53, 7 }
 0x213   : > { %v8835_v8 = vpop.f32.mrf.mxu0 }
 0x214   : > { %11619 = vst [vmem:[#allocation16_spill] sm:$0xff] %v10667_v19  ;;  %v8873_v6 = vpop.f32.mrf.mxu1  ;;  %v10670_v28 = vadd.f32 %v8835_v8, %v10560_v22 }
 0x215   : > { %v2997_v55 = vpop.f32.mrf.mxu0 }
 0x216   : > { %11620 = vst [vmem:[#allocation17_spill] sm:$0xff] %v10670_v28  ;;  %v3347_v32 = vpop.f32.mrf.mxu1  ;;  %v10673_v38 = vadd.f32 %v2997_v55, %v10567_v24  ;;  %v3944_v28 = vunpack.c.0.s8 %v3943_v60  ;;  %v2637_v24 = vadd.f32 %v10487_v45, %v10464_v35  ;;  %v3416_v60 = vadd.f32 %v10594_v2, %v10558_v44 }
 0x217   : > { %v8838_v0 = vpop.f32.mrf.mxu0  ;;  %v10698_v45 = vsub.s32 0, %v3946_v30  ;;  %v10709_v44 = vadd.f32 %v10614_v1, %v10577_v20  ;;  %v10717_v2 = vadd.f32 %v10624_v58, %v10587_v27  ;;  %v10729_v20 = vadd.f32 %v10639_v15, %v10602_v57 }
 0x218   : > { %11621 = vst [vmem:[#allocation18_spill] sm:$0xff] %v10673_v38  ;;  %v8876_v23 = vpop.f32.mrf.mxu1  ;;  %v10676_v7 = vadd.f32 %v8838_v0, %v10569_v62  ;;  %v3028_v62 = vadd.f32 %v10565_v25, %v2637_v24  ;;  %v3417_v0 = vadd.f32 %v10589_v59, %v10553_v41  ;;  %v10696_v35 = vsub.s32 %v3944_v28, %v3946_v30  ;;  %v11626_v30 = vld [vmem:[#allocation39_spill] sm:$0xff] }
 0x219   : > { %v3007_v36 = vpop.f32.mrf.mxu0  ;;  %11625 = vst [vmem:[#allocation51_spill] sm:$0xff] %v10698_v45  ;;  %v3419_v25 = vadd.f32 %v10599_v3, %v10563_v63  ;;  %v10705_v41 = vadd.f32 %v10609_v34, %v10572_v33  ;;  %v10713_v59 = vadd.f32 %v10619_v21, %v10582_v18  ;;  %v10721_v63 = vadd.f32 %v10629_v31, %v10592_v43 }
 0x21a   : > { %v3357_v47 = vpop.f32.mrf.mxu1  ;;  %v10679_v19 = vadd.f32 %v3007_v36, %v10574_v14  ;;  %11624 = vst [vmem:[#allocation50_spill] sm:$0xff] %v10696_v35  ;;  %v10734_v27 = vadd.f32 %v10644_v5, %v10607_v9  ;;  %v10738_v43 = vadd.f32 %v10649_v61, %v10612_v56  ;;  %v10741_v1 = vadd.f32 %v3317_v29, %v10617_v49 }
 0x21b   : > { %v8841_v22 = vpop.f32.mrf.mxu0  ;;  %v10747_v57 = vadd.f32 %v3327_v42, %v10627_v40  ;;  %v10751_v9 = vadd.f32 %v8870_v37, %v10632_v10  ;;  %v10754_v56 = vadd.f32 %v3337_v16, %v10637_v52  ;;  %v10757_v49 = vadd.f32 %v8873_v6, %v10642_v17 }
 0x21c   : > { %11622 = vst [vmem:[#allocation19_spill] sm:$0xff] %v10679_v19  ;;  %v8879_v8 = vpop.f32.mrf.mxu1  ;;  %v10684_v55 = vadd.f32 %v8841_v22, %v10579_v11  ;;  %v10694_v19 = vld [vmem:[#allocation5] ss:$0 sm:$0xff]  ;;  %v3418_v11 = vadd.f32 %v10604_v50, %v3028_v62  ;;  %v10725_v50 = vadd.f32 %v10634_v4, %v10597_v12  ;;  %v10744_v12 = vadd.f32 %v8867_v54, %v10622_v26 }
 0x21d   : > { %v3017_v13 = vpop.f32.mrf.mxu0  ;;  %v10760_v26 = vadd.f32 %v3347_v32, %v10647_v39  ;;  %v10765_v10 = vadd.f32 %v8876_v23, %v10652_v51  ;;  %v10768_v52 = vadd.f32 %v3357_v47, %v10655_v46  ;;  %v10771_v17 = vadd.f32 %v8879_v8, %v11626_v30  ;;  %v11627_v39 = vld [vmem:[#allocation40_spill] sm:$0xff]  ;;  %v11628_v32 = vld [vmem:[#allocation15_spill] sm:$0xff] }
 0x21e   : > { %v3367_v38 = vpop.f32.mrf.mxu1  ;;  %v10690_v14 = vadd.f32 %v3017_v13, %v10584_v48 }
 0x21f   : > { %v8896_v36 = vpop.f32.mrf.mxu0  ;;  %v10774_v37 = vadd.f32 %v3367_v38, %v11627_v39 }
 0x220   : > { %11623 = vst [vmem:[#allocation20_spill] sm:$0xff] %v10690_v14  ;;  %v8882_v53 = vpop.f32.mrf.mxu1  ;;  %v3807_v48 = vadd.f32 %v8896_v36, %v3417_v0 }
 0x221   : > { %v3647_v33 = vpop.f32.mrf.mxu0  ;;  %v10778_v22 = vadd.f32 %v8882_v53, %v11628_v32  ;;  %v11630_v53 = vld [vmem:[#allocation17_spill] sm:$0xff] }
 0x222   : > { %v3377_v3 = vpop.f32.mrf.mxu1  ;;  %v3846_v18 = vadd.f32 %v10694_v19, %v3807_v48  ;;  %v3806_v34 = vadd.f32 %v3647_v33, %v3416_v60 }
 0x223   : > { %v8899_v21 = vpop.f32.mrf.mxu0 }
 0x224   : > { %v3878_v58 = vmax.f32 %v3846_v18, 0.0  ;;  %v3845_v31 = vadd.f32 %v10694_v19, %v3806_v34  ;;  %v3809_v4 = vadd.f32 %v8899_v21, %v3419_v25  ;;  %v8885_v15 = vpop.f32.mrf.mxu1  ;;  %v11629_v25 = vld [vmem:[#allocation16_spill] sm:$0xff]  ;;  %v11631_v18 = vld [vmem:[#allocation18_spill] sm:$0xff] }
 0x225   : > { %v3657_v5 = vpop.f32.mrf.mxu0  ;;  %v10787_v48 = vadd.f32 %v8885_v15, %v11630_v53 }
 0x226   : > { %v3958_v40 = vcombine.high %v3878_v58, %v3878_v58  ;;  %v3965_v61 = vrot.slane %v3878_v58, %v10696_v35  ;;  %v3877_v29 = vmax.f32 %v3845_v31, 0.0  ;;  %v3848_v54 = vadd.f32 %v10694_v19, %v3809_v4  ;;  %v3387_v46 = vpop.f32.mrf.mxu1 }
 0x227   : > { %v3808_v42 = vadd.f32 %v3657_v5, %v3418_v11  ;;  %v10784_v11 = vadd.f32 %v3377_v3, %v11629_v25  ;;  %v10791_v34 = vadd.f32 %v3387_v46, %v11631_v18  ;;  %v8902_v5 = vpop.f32.mrf.mxu0 }
 0x228   : > { %v3972_v16 = vrot.slane %v3958_v40, %v10696_v35  ;;  %v3973_v6 = vcombine.high %v3965_v61, %v3965_v61  ;;  %v3941_v28 = vcombine.high %v3877_v29, %v3877_v29  ;;  %v7864_v24 = vrot.slane %v3965_v61, 9 }
 0x229   : > { %v3948_v51 = vrot.slane %v3877_v29, %v10696_v35  ;;  %v3880_v23 = vmax.f32 %v3848_v54, 0.0  ;;  %v3847_v62 = vadd.f32 %v10694_v19, %v3808_v42 }
 0x22a   : > { %v3974_v47 = vcombine.high %v3972_v16, %v3972_v16  ;;  %v7865_v13 = vrot.slane %v3973_v6, 9  ;;  %v7866_v8 = vrot.slane %v3972_v16, 9  ;;  %v3955_v38 = vrot.slane %v3941_v28, %v10696_v35 }
 0x22b   : > { %v3956_v0 = vcombine.high %v3948_v51, %v3948_v51  ;;  %v7860_v60 = vrot.slane %v3948_v51, 9  ;;  %v3992_v36 = vcombine.high %v3880_v23, %v3880_v23  ;;  %v3999_v33 = vrot.slane %v3880_v23, %v10696_v35 }
 0x22c   : > { %v7867_v21 = vrot.slane %v3974_v47, 9  ;;  %v5001_v58 = vmax.f32 %v3965_v61, %v7864_v24  ;;  %v5002_v31 = vmax.f32 %v3973_v6, %v7865_v13  ;;  %v10793_v4 = vmax.f32 %v3972_v16, %v7866_v8  ;;  %v3667_v24 = vpop.f32.mrf.mxu0 }
 0x22d   : > { %v3957_v40 = vcombine.high %v3955_v38, %v3955_v38  ;;  %v4006_v29 = vrot.slane %v3992_v36, %v10696_v35  ;;  %v4007_v54 = vcombine.high %v3999_v33, %v3999_v33  ;;  %v7872_v3 = vrot.slane %v3999_v33, 9 }
 0x22e   : > { %v7861_v30 = vrot.slane %v3956_v0, 9  ;;  %v7862_v42 = vrot.slane %v3955_v38, 9  ;;  %v4997_v15 = vmax.f32 %v3948_v51, %v7860_v60  ;;  %v3879_v39 = vmax.f32 %v3847_v62, 0.0 }
 0x22f   : > { %v4008_v28 = vcombine.high %v4006_v29, %v4006_v29  ;;  %v7873_v32 = vrot.slane %v4007_v54, 9  ;;  %v7874_v23 = vrot.slane %v4006_v29, 9  ;;  %v5009_v46 = vmax.f32 %v3999_v33, %v7872_v3 }
 0x230   : > { %v10796_v25 = vmax.f32 %v3974_v47, %v7867_v21  ;;  %v3975_v61 = vcombine.high %v3879_v39, %v3879_v39  ;;  %v3982_v16 = vrot.slane %v3879_v39, %v10696_v35  ;;  %v3811_v6 = vadd.f32 %v8902_v5, %v10705_v41 }
 0x231   : > { %v7875_v13 = vrot.slane %v4008_v28, 9  ;;  %v5010_v8 = vmax.f32 %v4007_v54, %v7873_v32  ;;  %v5011_v36 = vmax.f32 %v4006_v29, %v7874_v23  ;;  %v5129_v53 = vmax.f32 %v5001_v58, %v5009_v46  ;;  %v8905_v58 = vpop.f32.mrf.mxu0 }
 0x232   : > { %v3989_v51 = vrot.slane %v3975_v61, %v10696_v35  ;;  %v3990_v62 = vcombine.high %v3982_v16, %v3982_v16  ;;  %v7868_v60 = vrot.slane %v3982_v16, 9  ;;  %v3850_v33 = vadd.f32 %v10694_v19, %v3811_v6 }
 0x233   : > { %v7863_v47 = vrot.slane %v3957_v40, 9  ;;  %v5012_v18 = vmax.f32 %v4008_v28, %v7875_v13  ;;  %v5130_v21 = vmax.f32 %v5002_v31, %v5010_v8  ;;  %v5131_v3 = vmax.f32 %v10793_v4, %v5011_v36 }
 0x234   : > { %v3991_v41 = vcombine.high %v3989_v51, %v3989_v51  ;;  %v7869_v5 = vrot.slane %v3990_v62, 9  ;;  %v7870_v39 = vrot.slane %v3989_v51, 9  ;;  %v5005_v54 = vmax.f32 %v3982_v16, %v7868_v60 }
 0x235   : > { %v4998_v29 = vmax.f32 %v3956_v0, %v7861_v30  ;;  %v4999_v32 = vmax.f32 %v3955_v38, %v7862_v42  ;;  %v5132_v23 = vmax.f32 %v10796_v25, %v5012_v18  ;;  %v3882_v46 = vmax.f32 %v3850_v33, 0.0  ;;  %v3677_v42 = vpop.f32.mrf.mxu0 }
 0x236   : > { %v7871_v61 = vrot.slane %v3991_v41, 9  ;;  %v5006_v6 = vmax.f32 %v3990_v62, %v7869_v5  ;;  %v5007_v14 = vmax.f32 %v3989_v51, %v7870_v39  ;;  %v5125_v28 = vmax.f32 %v4997_v15, %v5005_v54 }
 0x237   : > { %v5000_v31 = vmax.f32 %v3957_v40, %v7863_v47  ;;  %v5272_v4 = vrot.slane %v5129_v53, %v10698_v45  ;;  %v4026_v13 = vcombine.high %v3882_v46, %v3882_v46  ;;  %v4033_v16 = vrot.slane %v3882_v46, %v10696_v35 }
 0x238   : > { %v5276_v8 = vrot.slane %v5130_v21, %v10698_v45  ;;  %v5008_v0 = vmax.f32 %v3991_v41, %v7871_v61  ;;  %v5126_v38 = vmax.f32 %v4998_v29, %v5006_v6  ;;  %v5127_v30 = vmax.f32 %v4999_v32, %v5007_v14 }
 0x239   : > { %v4040_v25 = vrot.slane %v4026_v13, %v10696_v35  ;;  %v4041_v36 = vcombine.high %v4033_v16, %v4033_v16  ;;  %v7880_v51 = vrot.slane %v4033_v16, 9  ;;  %v3810_v15 = vadd.f32 %v3667_v24, %v10709_v44  ;;  %v8908_v24 = vpop.f32.mrf.mxu0 }
 0x23a   : > { %v5128_v40 = vmax.f32 %v5000_v31, %v5008_v0  ;;  %v5256_v53 = vrot.slane %v5125_v28, %v10698_v45  ;;  %v5260_v62 = vrot.slane %v5126_v38, %v10698_v45  ;;  %v5264_v60 = vrot.slane %v5127_v30, %v10698_v45 }
 0x23b   : > { %v5280_v33 = vrot.slane %v5131_v3, %v10698_v45  ;;  %v4042_v47 = vcombine.high %v4040_v25, %v4040_v25  ;;  %v7881_v18 = vrot.slane %v4041_v36, 9  ;;  %v7882_v14 = vrot.slane %v4040_v25, 9  ;;  %v3687_v38 = vpop.f32.mrf.mxu0 }
 0x23c   : > { %v5268_v21 = vrot.slane %v5128_v40, %v10698_v45  ;;  %v5510_v41 = vsel %vm5509_vm4, %v5260_v62, %v5256_v53  ;;  %v3849_v5 = vadd.f32 %v10694_v19, %v3810_v15  ;;  %v3813_v44 = vadd.f32 %v8905_v58, %v10713_v59 }
 0x23d   : > { %v5284_v39 = vrot.slane %v5132_v23, %v10698_v45  ;;  %v5512_v54 = vsel %vm5511_vm5, %v5264_v60, %v5510_v41  ;;  %v7883_v29 = vrot.slane %v4042_v47, 9  ;;  %v10819_v32 = vmax.f32 %v4033_v16, %v7880_v51 }
 0x23e   : > { %v5514_v3 = vsel %vm5513_vm6, %v5268_v21, %v5512_v54  ;;  %v10822_v46 = vmax.f32 %v4041_v36, %v7881_v18  ;;  %v3881_v61 = vmax.f32 %v3849_v5, 0.0  ;;  %v3852_v6 = vadd.f32 %v10694_v19, %v3813_v44 }
 0x23f   : > { %v5516_v28 = vsel %vm5515_vm7, %v5272_v4, %v5514_v3  ;;  %v10826_v31 = vmax.f32 %v4040_v25, %v7882_v14  ;;  %v3812_v59 = vadd.f32 %v3677_v42, %v10717_v2  ;;  %v3815_v58 = vadd.f32 %v8908_v24, %v10721_v63 }
 0x240   : > { %v5518_v23 = vsel %vm5517_vm8, %v5276_v8, %v5516_v28  ;;  %v4009_v13 = vcombine.high %v3881_v61, %v3881_v61  ;;  %v4016_v16 = vrot.slane %v3881_v61, %v10696_v35  ;;  %v3884_v0 = vmax.f32 %v3852_v6, 0.0  ;;  %v8911_v6 = vpop.f32.mrf.mxu0 }
 0x241   : > { %v5520_v30 = vsel %vm5519_vm9, %v5280_v33, %v5518_v23  ;;  %v10833_v36 = vmax.f32 %v4042_v47, %v7883_v29  ;;  %v3851_v51 = vadd.f32 %v10694_v19, %v3812_v59  ;;  %v3854_v4 = vadd.f32 %v10694_v19, %v3815_v58 }
 0x242   : > { %v5522_v25 = vsel %vm5521_vm10, %v5284_v39, %v5520_v30  ;;  %v4023_v2 = vrot.slane %v4009_v13, %v10696_v35  ;;  %v4024_v63 = vcombine.high %v4016_v16, %v4016_v16  ;;  %v7876_v42 = vrot.slane %v4016_v16, 9 }
 0x243   : > { %5581 = vst.msk [vmem:[#allocation2] sm:$0xff] %vm5580_vm11, %v5522_v25  ;;  %v4060_v8 = vcombine.high %v3884_v0, %v3884_v0  ;;  %v4067_v15 = vrot.slane %v3884_v0, %v10696_v35  ;;  %v3883_v40 = vmax.f32 %v3851_v51, 0.0  ;;  %v3814_v53 = vadd.f32 %v3687_v38, %v10725_v50 }
 0x244   : > { %v4025_v62 = vcombine.high %v4023_v2, %v4023_v2  ;;  %v7877_v60 = vrot.slane %v4024_v63, 9  ;;  %v7878_v33 = vrot.slane %v4023_v2, 9  ;;  %v3886_v47 = vmax.f32 %v3854_v4, 0.0 }
 0x245   : > { %v4074_v18 = vrot.slane %v4060_v8, %v10696_v35  ;;  %v4075_v14 = vcombine.high %v4067_v15, %v4067_v15  ;;  %v7888_v21 = vrot.slane %v4067_v15, 9  ;;  %v4043_v41 = vcombine.high %v3883_v40, %v3883_v40 }
 0x246   : > { %v7879_v5 = vrot.slane %v4025_v62, 9  ;;  %v5013_v44 = vmax.f32 %v4016_v16, %v7876_v42  ;;  %v5014_v24 = vmax.f32 %v4024_v63, %v7877_v60  ;;  %v4050_v39 = vrot.slane %v3883_v40, %v10696_v35 }
 0x247   : > { %v4076_v54 = vcombine.high %v4074_v18, %v4074_v18  ;;  %v7889_v29 = vrot.slane %v4075_v14, 9  ;;  %v7890_v3 = vrot.slane %v4074_v18, 9  ;;  %v5025_v61 = vmax.f32 %v4067_v15, %v7888_v21 }
 0x248   : > { %v5015_v50 = vmax.f32 %v4023_v2, %v7878_v33  ;;  %v4057_v28 = vrot.slane %v4043_v41, %v10696_v35  ;;  %v4058_v59 = vcombine.high %v4050_v39, %v4050_v39  ;;  %v7884_v58 = vrot.slane %v4050_v39, 9  ;;  %v3697_v2 = vpop.f32.mrf.mxu0 }
 0x249   : > { %v7891_v23 = vrot.slane %v4076_v54, 9  ;;  %v5026_v13 = vmax.f32 %v4075_v14, %v7889_v29  ;;  %v5027_v0 = vmax.f32 %v4074_v18, %v7890_v3  ;;  %v5137_v38 = vmax.f32 %v10819_v32, %v5025_v61 }
 0x24a   : > { %v4059_v30 = vcombine.high %v4057_v28, %v4057_v28  ;;  %v7885_v16 = vrot.slane %v4058_v59, 9  ;;  %v7886_v51 = vrot.slane %v4057_v28, 9  ;;  %v5021_v4 = vmax.f32 %v4050_v39, %v7884_v58  ;;  %v8914_v29 = vpop.f32.mrf.mxu0 }
 0x24b   : > { %v5016_v25 = vmax.f32 %v4025_v62, %v7879_v5  ;;  %v5028_v63 = vmax.f32 %v4076_v54, %v7891_v23  ;;  %v5138_v42 = vmax.f32 %v10822_v46, %v5026_v13  ;;  %v5139_v8 = vmax.f32 %v10826_v31, %v5027_v0 }
 0x24c   : > { %v7887_v15 = vrot.slane %v4059_v30, 9  ;;  %v5022_v40 = vmax.f32 %v4058_v59, %v7885_v16  ;;  %v5023_v60 = vmax.f32 %v4057_v28, %v7886_v51  ;;  %v5133_v33 = vmax.f32 %v5013_v44, %v5021_v4  ;;  %v3707_v51 = vpop.f32.mrf.mxu0 }
 0x24d   : > { %v5140_v14 = vmax.f32 %v10833_v36, %v5028_v63  ;;  %v5304_v18 = vrot.slane %v5137_v38, %v10698_v45  ;;  %v5308_v32 = vrot.slane %v5138_v42, %v10698_v45  ;;  %v4094_v21 = vcombine.high %v3886_v47, %v3886_v47 }
 0x24e   : > { %v5312_v41 = vrot.slane %v5139_v8, %v10698_v45  ;;  %v5024_v62 = vmax.f32 %v4059_v30, %v7887_v15  ;;  %v5134_v5 = vmax.f32 %v5014_v24, %v5022_v40  ;;  %v5135_v39 = vmax.f32 %v5015_v50, %v5023_v60 }
 0x24f   : > { %v5288_v46 = vrot.slane %v5133_v33, %v10698_v45  ;;  %v4101_v31 = vrot.slane %v3886_v47, %v10696_v35  ;;  %v4108_v54 = vrot.slane %v4094_v21, %v10696_v35  ;;  %v3853_v44 = vadd.f32 %v10694_v19, %v3814_v53 }
 0x250   : > { %v5136_v36 = vmax.f32 %v5016_v25, %v5024_v62  ;;  %v5292_v3 = vrot.slane %v5134_v5, %v10698_v45  ;;  %v5296_v61 = vrot.slane %v5135_v39, %v10698_v45  ;;  %v3817_v28 = vadd.f32 %v8911_v6, %v10729_v20 }
 0x251   : > { %v4109_v59 = vcombine.high %v4101_v31, %v4101_v31  ;;  %v4110_v58 = vcombine.high %v4108_v54, %v4108_v54  ;;  %v7896_v24 = vrot.slane %v4101_v31, 9  ;;  %v7898_v50 = vrot.slane %v4108_v54, 9 }
 0x252   : > { %v5300_v23 = vrot.slane %v5136_v36, %v10698_v45  ;;  %v5523_v47 = vsel %vm5509_vm4, %v5292_v3, %v5288_v46  ;;  %v3885_v13 = vmax.f32 %v3853_v44, 0.0  ;;  %v3856_v0 = vadd.f32 %v10694_v19, %v3817_v28  ;;  %v10872_v46 = vpop.f32.mrf.mxu0 }
 0x253   : > { %v5316_v53 = vrot.slane %v5140_v14, %v10698_v45  ;;  %v5524_v38 = vsel %vm5511_vm5, %v5296_v61, %v5523_v47  ;;  %v7897_v30 = vrot.slane %v4109_v59, 9  ;;  %v7899_v16 = vrot.slane %v4110_v58, 9 }
 0x254   : > { %v5525_v20 = vsel %vm5513_vm6, %v5300_v23, %v5524_v38  ;;  %v5033_v6 = vmax.f32 %v4101_v31, %v7896_v24  ;;  %v4077_v4 = vcombine.high %v3885_v13, %v3885_v13  ;;  %v4084_v25 = vrot.slane %v3885_v13, %v10696_v35  ;;  %v10878_v47 = vpop.f32.mrf.mxu0 }
 0x255   : > { %v5526_v63 = vsel %vm5515_vm7, %v5304_v18, %v5525_v20  ;;  %v5034_v42 = vmax.f32 %v4109_v59, %v7897_v30  ;;  %v5035_v8 = vmax.f32 %v4108_v54, %v7898_v50  ;;  %v3888_v15 = vmax.f32 %v3856_v0, 0.0 }
 0x256   : > { %v5527_v40 = vsel %vm5517_vm8, %v5308_v32, %v5526_v63  ;;  %v4091_v60 = vrot.slane %v4077_v4, %v10696_v35  ;;  %v4092_v33 = vcombine.high %v4084_v25, %v4084_v25  ;;  %v7892_v14 = vrot.slane %v4084_v25, 9 }
 0x257   : > { %v5528_v21 = vsel %vm5519_vm9, %v5312_v41, %v5527_v40  ;;  %v4128_v62 = vcombine.high %v3888_v15, %v3888_v15  ;;  %v4135_v5 = vrot.slane %v3888_v15, %v10696_v35  ;;  %v3816_v39 = vadd.f32 %v3697_v2, %v10734_v27 }
 0x258   : > { %v5529_v18 = vsel %vm5521_vm10, %v5316_v53, %v5528_v21  ;;  %v4093_v31 = vcombine.high %v4091_v60, %v4091_v60  ;;  %v7893_v54 = vrot.slane %v4092_v33, 9  ;;  %v7894_v44 = vrot.slane %v4091_v60, 9  ;;  %v10885_v21 = vpop.f32.mrf.mxu0 }
 0x259   : > { %5582 = vst.msk [vmem:[#allocation2 + $0x8] sm:$0xff] %vm5580_vm11, %v5529_v18  ;;  %v5036_v32 = vmax.f32 %v4110_v58, %v7899_v16  ;;  %v4142_v36 = vrot.slane %v4128_v62, %v10696_v35  ;;  %v4143_v3 = vcombine.high %v4135_v5, %v4135_v5  ;;  %v7904_v61 = vrot.slane %v4135_v5, 9 }
 0x25a   : > { %v7895_v41 = vrot.slane %v4093_v31, 9  ;;  %v5029_v28 = vmax.f32 %v4084_v25, %v7892_v14  ;;  %v5030_v59 = vmax.f32 %v4092_v33, %v7893_v54  ;;  %v3855_v24 = vadd.f32 %v10694_v19, %v3816_v39 }
 0x25b   : > { %v4144_v27 = vcombine.high %v4142_v36, %v4142_v36  ;;  %v7905_v2 = vrot.slane %v4143_v3, 9  ;;  %v7906_v50 = vrot.slane %v4142_v36, 9  ;;  %v5041_v23 = vmax.f32 %v4135_v5, %v7904_v61  ;;  %v3727_v61 = vpop.f32.mrf.mxu0 }
 0x25c   : > { %v5031_v13 = vmax.f32 %v4091_v60, %v7894_v44  ;;  %v3887_v0 = vmax.f32 %v3855_v24, 0.0  ;;  %v3819_v53 = vadd.f32 %v8914_v29, %v10738_v43  ;;  %v3818_v58 = vadd.f32 %v3707_v51, %v10741_v1 }
 0x25d   : > { %v7907_v38 = vrot.slane %v4144_v27, 9  ;;  %v5042_v30 = vmax.f32 %v4143_v3, %v7905_v2  ;;  %v5043_v16 = vmax.f32 %v4142_v36, %v7906_v50  ;;  %v5145_v20 = vmax.f32 %v5033_v6, %v5041_v23 }
 0x25e   : > { %v4111_v4 = vcombine.high %v3887_v0, %v3887_v0  ;;  %v4118_v25 = vrot.slane %v3887_v0, %v10696_v35  ;;  %v3858_v63 = vadd.f32 %v10694_v19, %v3819_v53  ;;  %v3857_v15 = vadd.f32 %v10694_v19, %v3818_v58 }
 0x25f   : > { %v5032_v40 = vmax.f32 %v4093_v31, %v7895_v41  ;;  %v5044_v33 = vmax.f32 %v4144_v27, %v7907_v38  ;;  %v5146_v14 = vmax.f32 %v5034_v42, %v5042_v30  ;;  %v5147_v60 = vmax.f32 %v5035_v8, %v5043_v16 }
 0x260   : > { %v4125_v43 = vrot.slane %v4111_v4, %v10696_v35  ;;  %v4126_v1 = vcombine.high %v4118_v25, %v4118_v25  ;;  %v7900_v29 = vrot.slane %v4118_v25, 9  ;;  %v3890_v51 = vmax.f32 %v3858_v63, 0.0  ;;  %v8923_v63 = vpop.f32.mrf.mxu0 }
 0x261   : > { %v5148_v62 = vmax.f32 %v5036_v32, %v5044_v33  ;;  %v5336_v6 = vrot.slane %v5145_v20, %v10698_v45  ;;  %v5340_v5 = vrot.slane %v5146_v14, %v10698_v45  ;;  %v3889_v39 = vmax.f32 %v3857_v15, 0.0 }
 0x262   : > { %v4127_v18 = vcombine.high %v4125_v43, %v4125_v43  ;;  %v7901_v54 = vrot.slane %v4126_v1, 9  ;;  %v7902_v44 = vrot.slane %v4125_v43, 9  ;;  %v5037_v31 = vmax.f32 %v4118_v25, %v7900_v29 }
 0x263   : > { %v5344_v42 = vrot.slane %v5147_v60, %v10698_v45  ;;  %v4162_v8 = vcombine.high %v3890_v51, %v3890_v51  ;;  %v4169_v36 = vrot.slane %v3890_v51, %v10696_v35  ;;  %v4145_v3 = vcombine.high %v3889_v39, %v3889_v39 }
 0x264   : > { %v7903_v41 = vrot.slane %v4127_v18, 9  ;;  %v5038_v24 = vmax.f32 %v4126_v1, %v7901_v54  ;;  %v5039_v27 = vmax.f32 %v4125_v43, %v7902_v44  ;;  %v5141_v32 = vmax.f32 %v5029_v28, %v5037_v31  ;;  %v3737_v44 = vpop.f32.mrf.mxu0 }
 0x265   : > { %v4176_v2 = vrot.slane %v4162_v8, %v10696_v35  ;;  %v4177_v50 = vcombine.high %v4169_v36, %v4169_v36  ;;  %v7912_v23 = vrot.slane %v4169_v36, 9  ;;  %v4152_v0 = vrot.slane %v3889_v39, %v10696_v35 }
 0x266   : > { %v5348_v53 = vrot.slane %v5148_v62, %v10698_v45  ;;  %v5040_v58 = vmax.f32 %v4127_v18, %v7903_v41  ;;  %v5142_v38 = vmax.f32 %v5030_v59, %v5038_v24  ;;  %v5143_v30 = vmax.f32 %v5031_v13, %v5039_v27 }
 0x267   : > { %v5320_v16 = vrot.slane %v5141_v32, %v10698_v45  ;;  %v4178_v20 = vcombine.high %v4176_v2, %v4176_v2  ;;  %v7913_v4 = vrot.slane %v4177_v50, 9  ;;  %v7914_v25 = vrot.slane %v4176_v2, 9 }
 0x268   : > { %v5144_v15 = vmax.f32 %v5032_v40, %v5040_v58  ;;  %v5324_v28 = vrot.slane %v5142_v38, %v10698_v45  ;;  %v5328_v33 = vrot.slane %v5143_v30, %v10698_v45  ;;  %v4159_v14 = vrot.slane %v4145_v3, %v10696_v35  ;;  %v8926_v38 = vpop.f32.mrf.mxu0 }
 0x269   : > { %v7915_v60 = vrot.slane %v4178_v20, 9  ;;  %v10899_v43 = vmax.f32 %v4169_v36, %v7912_v23  ;;  %v10901_v1 = vmax.f32 %v4177_v50, %v7913_v4  ;;  %v4160_v59 = vcombine.high %v4152_v0, %v4152_v0 }
 0x26a   : > { %v5332_v13 = vrot.slane %v5144_v15, %v10698_v45  ;;  %v5530_v29 = vsel %vm5509_vm4, %v5324_v28, %v5320_v16  ;;  %v4161_v51 = vcombine.high %v4159_v14, %v4159_v14  ;;  %v7908_v62 = vrot.slane %v4152_v0, 9 }
 0x26b   : > { %v5531_v40 = vsel %vm5511_vm5, %v5328_v33, %v5530_v29  ;;  %v10906_v39 = vmax.f32 %v4176_v2, %v7914_v25  ;;  %v7909_v18 = vrot.slane %v4160_v59, 9  ;;  %v7910_v54 = vrot.slane %v4159_v14, 9 }
 0x26c   : > { %v5532_v31 = vsel %vm5513_vm6, %v5332_v13, %v5531_v40  ;;  %v10909_v8 = vmax.f32 %v4178_v20, %v7915_v60  ;;  %v7911_v36 = vrot.slane %v4161_v51, 9  ;;  %v3821_v3 = vadd.f32 %v10872_v46, %v10744_v12 }
 0x26d   : > { %v5533_v41 = vsel %vm5515_vm7, %v5336_v6, %v5532_v31  ;;  %v10914_v24 = vmax.f32 %v4152_v0, %v7908_v62  ;;  %v10916_v27 = vmax.f32 %v4160_v59, %v7909_v18  ;;  %v3820_v32 = vadd.f32 %v10878_v47, %v10747_v57 }
 0x26e   : > { %v5534_v2 = vsel %vm5517_vm8, %v5340_v5, %v5533_v41  ;;  %v10921_v50 = vmax.f32 %v4159_v14, %v7910_v54  ;;  %v3860_v23 = vadd.f32 %v10694_v19, %v3821_v3  ;;  %v3823_v58 = vadd.f32 %v10885_v21, %v10751_v9 }
 0x26f   : > { %v5535_v12 = vsel %vm5519_vm9, %v5344_v42, %v5534_v2  ;;  %v3859_v46 = vadd.f32 %v10694_v19, %v3820_v32  ;;  %v3822_v6 = vadd.f32 %v3727_v61, %v10754_v56  ;;  %v3825_v0 = vadd.f32 %v8923_v63, %v10757_v49 }
 0x270   : > { %v5536_v57 = vsel %vm5521_vm10, %v5348_v53, %v5535_v12  ;;  %v3892_v47 = vmax.f32 %v3860_v23, 0.0  ;;  %v3862_v5 = vadd.f32 %v10694_v19, %v3823_v58  ;;  %v3824_v30 = vadd.f32 %v3737_v44, %v10760_v26 }
 0x271   : > { %5583 = vst.msk [vmem:[#allocation2 + $0x10] sm:$0xff] %vm5580_vm11, %v5536_v57  ;;  %v5048_v16 = vmax.f32 %v4161_v51, %v7911_v36  ;;  %v3891_v9 = vmax.f32 %v3859_v46, 0.0  ;;  %v3861_v21 = vadd.f32 %v10694_v19, %v3822_v6  ;;  %v3864_v42 = vadd.f32 %v10694_v19, %v3825_v0 }
 0x272   : > { %v4196_v20 = vcombine.high %v3892_v47, %v3892_v47  ;;  %v4203_v56 = vrot.slane %v3892_v47, %v10696_v35  ;;  %v3894_v49 = vmax.f32 %v3862_v5, 0.0  ;;  %v10938_v61 = vadd.f32 %v8926_v38, %v10765_v10 }
 0x273   : > { %v4179_v53 = vcombine.high %v3891_v9, %v3891_v9  ;;  %v4186_v4 = vrot.slane %v3891_v9, %v10696_v35  ;;  %v3893_v25 = vmax.f32 %v3861_v21, 0.0  ;;  %v10942_v26 = vadd.f32 %v10694_v19, %v3824_v30 }
 0x274   : > { %v4210_v63 = vrot.slane %v4196_v20, %v10696_v35  ;;  %v4211_v15 = vcombine.high %v4203_v56, %v4203_v56  ;;  %v7920_v28 = vrot.slane %v4203_v56, 9  ;;  %v4230_v33 = vcombine.high %v3894_v49, %v3894_v49 }
 0x275   : > { %v4193_v14 = vrot.slane %v4179_v53, %v10696_v35  ;;  %v4194_v60 = vcombine.high %v4186_v4, %v4186_v4  ;;  %v7916_v59 = vrot.slane %v4186_v4, 9  ;;  %v4237_v13 = vrot.slane %v3894_v49, %v10696_v35 }
 0x276   : > { %v4212_v10 = vcombine.high %v4210_v63, %v4210_v63  ;;  %v7921_v29 = vrot.slane %v4211_v15, 9  ;;  %v7922_v51 = vrot.slane %v4210_v63, 9  ;;  %v5057_v62 = vmax.f32 %v4203_v56, %v7920_v28 }
 0x277   : > { %v4195_v40 = vcombine.high %v4193_v14, %v4193_v14  ;;  %v7917_v18 = vrot.slane %v4194_v60, 9  ;;  %v7918_v54 = vrot.slane %v4193_v14, 9  ;;  %v5053_v44 = vmax.f32 %v4186_v4, %v7916_v59 }
 0x278   : > { %v7923_v31 = vrot.slane %v4212_v10, 9  ;;  %v5058_v36 = vmax.f32 %v4211_v15, %v7921_v29  ;;  %v5059_v3 = vmax.f32 %v4210_v63, %v7922_v51  ;;  %v5153_v41 = vmax.f32 %v10899_v43, %v5057_v62 }
 0x279   : > { %v7919_v32 = vrot.slane %v4195_v40, 9  ;;  %v5054_v2 = vmax.f32 %v4194_v60, %v7917_v18  ;;  %v5055_v23 = vmax.f32 %v4193_v14, %v7918_v54  ;;  %v5149_v58 = vmax.f32 %v10914_v24, %v5053_v44 }
 0x27a   : > { %v5060_v12 = vmax.f32 %v4212_v10, %v7923_v31  ;;  %v5154_v46 = vmax.f32 %v10901_v1, %v5058_v36  ;;  %v5155_v6 = vmax.f32 %v10906_v39, %v5059_v3  ;;  %v3896_v0 = vmax.f32 %v3864_v42, 0.0 }
 0x27b   : > { %v5368_v38 = vrot.slane %v5153_v41, %v10698_v45  ;;  %v5056_v57 = vmax.f32 %v4195_v40, %v7919_v32  ;;  %v5150_v47 = vmax.f32 %v10916_v27, %v5054_v2  ;;  %v5151_v5 = vmax.f32 %v10921_v50, %v5055_v23 }
 0x27c   : > { %v5156_v43 = vmax.f32 %v10909_v8, %v5060_v12  ;;  %v5372_v30 = vrot.slane %v5154_v46, %v10698_v45  ;;  %v5352_v9 = vrot.slane %v5149_v58, %v10698_v45  ;;  %v4244_v24 = vrot.slane %v4230_v33, %v10696_v35 }
 0x27d   : > { %v5152_v21 = vmax.f32 %v5048_v16, %v5056_v57  ;;  %v5356_v1 = vrot.slane %v5150_v47, %v10698_v45  ;;  %v5360_v39 = vrot.slane %v5151_v5, %v10698_v45  ;;  %v4245_v42 = vcombine.high %v4237_v13, %v4237_v13 }
 0x27e   : > { %v5376_v20 = vrot.slane %v5155_v6, %v10698_v45  ;;  %v4246_v56 = vcombine.high %v4244_v24, %v4244_v24  ;;  %v7928_v27 = vrot.slane %v4237_v13, 9  ;;  %v7930_v49 = vrot.slane %v4244_v24, 9  ;;  %v3747_v6 = vpop.f32.mrf.mxu0 }
 0x27f   : > { %v5364_v50 = vrot.slane %v5152_v21, %v10698_v45  ;;  %v5537_v8 = vsel %vm5509_vm4, %v5356_v1, %v5352_v9  ;;  %v7929_v53 = vrot.slane %v4245_v42, 9  ;;  %v4213_v4 = vcombine.high %v3893_v25, %v3893_v25 }
 0x280   : > { %v5380_v63 = vrot.slane %v5156_v43, %v10698_v45  ;;  %v5538_v16 = vsel %vm5511_vm5, %v5360_v39, %v5537_v8  ;;  %v7931_v15 = vrot.slane %v4246_v56, 9  ;;  %v5065_v28 = vmax.f32 %v4237_v13, %v7928_v27 }
 0x281   : > { %v5539_v33 = vsel %vm5513_vm6, %v5364_v50, %v5538_v16  ;;  %v5067_v14 = vmax.f32 %v4244_v24, %v7930_v49  ;;  %v4220_v60 = vrot.slane %v3893_v25, %v10696_v35  ;;  %v4227_v59 = vrot.slane %v4213_v4, %v10696_v35  ;;  %v8929_v49 = vpop.f32.mrf.mxu0 }
 0x282   : > { %v5540_v10 = vsel %vm5515_vm7, %v5368_v38, %v5539_v33  ;;  %v5066_v29 = vmax.f32 %v4245_v42, %v7929_v53  ;;  %v4264_v51 = vcombine.high %v3896_v0, %v3896_v0  ;;  %v4271_v62 = vrot.slane %v3896_v0, %v10696_v35 }
 0x283   : > { %v5541_v40 = vsel %vm5517_vm8, %v5372_v30, %v5540_v10  ;;  %v4228_v18 = vcombine.high %v4220_v60, %v4220_v60  ;;  %v4229_v54 = vcombine.high %v4227_v59, %v4227_v59  ;;  %v7924_v44 = vrot.slane %v4220_v60, 9 }
 0x284   : > { %v5542_v13 = vsel %vm5519_vm9, %v5376_v20, %v5541_v40  ;;  %v7926_v31 = vrot.slane %v4227_v59, 9  ;;  %v4278_v36 = vrot.slane %v4264_v51, %v10696_v35  ;;  %v4279_v3 = vcombine.high %v4271_v62, %v4271_v62 }
 0x285   : > { %v5543_v25 = vsel %vm5521_vm10, %v5380_v63, %v5542_v13  ;;  %v5068_v41 = vmax.f32 %v4246_v56, %v7931_v15  ;;  %v7925_v32 = vrot.slane %v4228_v18, 9  ;;  %v7927_v2 = vrot.slane %v4229_v54, 9 }
 0x286   : > { %5584 = vst.msk [vmem:[#allocation2 + $0x18] sm:$0xff] %vm5580_vm11, %v5543_v25  ;;  %v5061_v23 = vmax.f32 %v4220_v60, %v7924_v44  ;;  %v4280_v58 = vcombine.high %v4278_v36, %v4278_v36  ;;  %v7936_v12 = vrot.slane %v4271_v62, 9  ;;  %v7937_v46 = vrot.slane %v4279_v3, 9 }
 0x287   : > { %v5062_v0 = vmax.f32 %v4228_v18, %v7925_v32  ;;  %v5063_v38 = vmax.f32 %v4227_v59, %v7926_v31  ;;  %v7938_v57 = vrot.slane %v4278_v36, 9  ;;  %v3895_v47 = vmax.f32 %v10942_v26, 0.0 }
 0x288   : > { %v7939_v5 = vrot.slane %v4280_v58, 9  ;;  %v5073_v43 = vmax.f32 %v4271_v62, %v7936_v12  ;;  %v5074_v30 = vmax.f32 %v4279_v3, %v7937_v46  ;;  %v3866_v9 = vadd.f32 %v10694_v19, %v10938_v61 }
 0x289   : > { %v5075_v24 = vmax.f32 %v4278_v36, %v7938_v57  ;;  %v4247_v21 = vcombine.high %v3895_v47, %v3895_v47  ;;  %v4254_v1 = vrot.slane %v3895_v47, %v10696_v35  ;;  %v3826_v39 = vadd.f32 %v3747_v6, %v10768_v52 }
 0x28a   : > { %v5076_v42 = vmax.f32 %v4280_v58, %v7939_v5  ;;  %v5161_v20 = vmax.f32 %v5065_v28, %v5073_v43  ;;  %v5162_v56 = vmax.f32 %v5066_v29, %v5074_v30  ;;  %v3898_v27 = vmax.f32 %v3866_v9, 0.0  ;;  %v3757_v29 = vpop.f32.mrf.mxu0 }
 0x28b   : > { %v5163_v50 = vmax.f32 %v5067_v14, %v5075_v24  ;;  %v4261_v26 = vrot.slane %v4247_v21, %v10696_v35  ;;  %v4262_v8 = vcombine.high %v4254_v1, %v4254_v1  ;;  %v7932_v53 = vrot.slane %v4254_v1, 9 }
 0x28c   : > { %v5064_v4 = vmax.f32 %v4229_v54, %v7927_v2  ;;  %v5164_v63 = vmax.f32 %v5068_v41, %v5076_v42  ;;  %v5400_v61 = vrot.slane %v5161_v20, %v10698_v45  ;;  %v4298_v16 = vcombine.high %v3898_v27, %v3898_v27  ;;  %v8932_v46 = vpop.f32.mrf.mxu0  ;;  %v11004_v42 = vld [vmem:[#allocation5] ss:$0 sm:$0xff] }
 0x28d   : > { %v5404_v15 = vrot.slane %v5162_v56, %v10698_v45  ;;  %v4263_v33 = vcombine.high %v4261_v26, %v4261_v26  ;;  %v7933_v60 = vrot.slane %v4262_v8, 9  ;;  %v7934_v52 = vrot.slane %v4261_v26, 9 }
 0x28e   : > { %v5408_v28 = vrot.slane %v5163_v50, %v10698_v45  ;;  %v5069_v59 = vmax.f32 %v4254_v1, %v7932_v53  ;;  %v4305_v10 = vrot.slane %v3898_v27, %v10696_v35  ;;  %v4312_v14 = vrot.slane %v4298_v16, %v10696_v35 }
 0x28f   : > { %v7935_v51 = vrot.slane %v4263_v33, 9  ;;  %v5070_v62 = vmax.f32 %v4262_v8, %v7933_v60  ;;  %v5071_v40 = vmax.f32 %v4261_v26, %v7934_v52  ;;  %v3865_v18 = vadd.f32 %v10694_v19, %v3826_v39  ;;  %v3767_v8 = vpop.f32.mrf.mxu0 }
 0x290   : > { %v5157_v54 = vmax.f32 %v5061_v23, %v5069_v59  ;;  %v4313_v44 = vcombine.high %v4305_v10, %v4305_v10  ;;  %v4314_v13 = vcombine.high %v4312_v14, %v4312_v14  ;;  %v7944_v31 = vrot.slane %v4305_v10, 9 }
 0x291   : > { %v5072_v36 = vmax.f32 %v4263_v33, %v7935_v51  ;;  %v5158_v3 = vmax.f32 %v5062_v0, %v5070_v62  ;;  %v5159_v25 = vmax.f32 %v5063_v38, %v5071_v40  ;;  %v7946_v41 = vrot.slane %v4312_v14, 9 }
 0x292   : > { %v5412_v32 = vrot.slane %v5164_v63, %v10698_v45  ;;  %v5384_v2 = vrot.slane %v5157_v54, %v10698_v45  ;;  %v7945_v58 = vrot.slane %v4313_v44, 9  ;;  %v7947_v12 = vrot.slane %v4314_v13, 9 }
 0x293   : > { %v5160_v6 = vmax.f32 %v5064_v4, %v5072_v36  ;;  %v5388_v57 = vrot.slane %v5158_v3, %v10698_v45  ;;  %v5392_v19 = vrot.slane %v5159_v25, %v10698_v45  ;;  %v10991_v23 = vmax.f32 %v4305_v10, %v7944_v31 }
 0x294   : > { %v10993_v47 = vmax.f32 %v4313_v44, %v7945_v58  ;;  %v10995_v5 = vmax.f32 %v4312_v14, %v7946_v41  ;;  %v3897_v0 = vmax.f32 %v3865_v18, 0.0  ;;  %v3829_v38 = vadd.f32 %v8929_v49, %v10771_v17 }
 0x295   : > { %v5396_v43 = vrot.slane %v5160_v6, %v10698_v45  ;;  %v5544_v30 = vsel %vm5509_vm4, %v5388_v57, %v5384_v2  ;;  %v3828_v9 = vadd.f32 %v3757_v29, %v10774_v37  ;;  %v3831_v24 = vadd.f32 %v8932_v46, %v10778_v22 }
 0x296   : > { %v5545_v21 = vsel %vm5511_vm5, %v5392_v19, %v5544_v30  ;;  %v4281_v1 = vcombine.high %v3897_v0, %v3897_v0  ;;  %v4288_v39 = vrot.slane %v3897_v0, %v10696_v35  ;;  %v3868_v20 = vadd.f32 %v11004_v42, %v3829_v38 }
 0x297   : > { %v5546_v56 = vsel %vm5513_vm6, %v5396_v43, %v5545_v21  ;;  %v11008_v17 = vmax.f32 %v4314_v13, %v7947_v12  ;;  %v3867_v27 = vadd.f32 %v11004_v42, %v3828_v9  ;;  %v3870_v49 = vadd.f32 %v11004_v42, %v3831_v24  ;;  %v8888_v13 = vpop.f32.mrf.mxu1 }
 0x298   : > { %v5547_v37 = vsel %vm5515_vm7, %v5400_v61, %v5546_v56  ;;  %v4295_v22 = vrot.slane %v4281_v1, %v10696_v35  ;;  %v4296_v50 = vcombine.high %v4288_v39, %v4288_v39  ;;  %v7940_v26 = vrot.slane %v4288_v39, 9  ;;  %v8935_v1 = vpop.f32.mrf.mxu0 }
 0x299   : > { %v5548_v53 = vsel %vm5517_vm8, %v5404_v15, %v5547_v37  ;;  %v3900_v4 = vmax.f32 %v3868_v20, 0.0  ;;  %v3899_v63 = vmax.f32 %v3867_v27, 0.0  ;;  %v3902_v16 = vmax.f32 %v3870_v49, 0.0  ;;  %v3397_v43 = vpop.f32.mrf.mxu1 }
 0x29a   : > { %v5549_v33 = vsel %vm5519_vm9, %v5408_v28, %v5548_v53  ;;  %v4297_v60 = vcombine.high %v4295_v22, %v4295_v22  ;;  %v7941_v52 = vrot.slane %v4296_v50, 9  ;;  %v7942_v59 = vrot.slane %v4295_v22, 9 }
 0x29b   : > { %v5550_v10 = vsel %vm5521_vm10, %v5412_v32, %v5549_v33  ;;  %v4332_v14 = vcombine.high %v3900_v4, %v3900_v4  ;;  %v4339_v61 = vrot.slane %v3900_v4, %v10696_v35  ;;  %v3830_v29 = vadd.f32 %v3767_v8, %v10784_v11 }
 0x29c   : > { %5585 = vst.msk [vmem:[#allocation2 + $0x20] sm:$0xff] %vm5580_vm11, %v5550_v10  ;;  %v7943_v51 = vrot.slane %v4297_v60, 9  ;;  %v5077_v62 = vmax.f32 %v4288_v39, %v7940_v26  ;;  %v5078_v15 = vmax.f32 %v4296_v50, %v7941_v52  ;;  %v4315_v40 = vcombine.high %v3899_v63, %v3899_v63 }
 0x29d   : > { %v4346_v18 = vrot.slane %v4332_v14, %v10696_v35  ;;  %v4347_v54 = vcombine.high %v4339_v61, %v4339_v61  ;;  %v7952_v28 = vrot.slane %v4339_v61, 9  ;;  %v4322_v44 = vrot.slane %v3899_v63, %v10696_v35 }
 0x29e   : > { %v5079_v31 = vmax.f32 %v4295_v22, %v7942_v59  ;;  %v5080_v36 = vmax.f32 %v4297_v60, %v7943_v51  ;;  %v4329_v3 = vrot.slane %v4315_v40, %v10696_v35  ;;  %v4366_v25 = vcombine.high %v3902_v16, %v3902_v16  ;;  %v3777_v60 = vpop.f32.mrf.mxu0 }
 0x29f   : > { %v4348_v41 = vcombine.high %v4346_v18, %v4346_v18  ;;  %v7953_v11 = vrot.slane %v4347_v54, 9  ;;  %v7954_v32 = vrot.slane %v4346_v18, 9  ;;  %v5089_v2 = vmax.f32 %v4339_v61, %v7952_v28 }
 0x2a0   : > { %v4330_v58 = vcombine.high %v4322_v44, %v4322_v44  ;;  %v4331_v12 = vcombine.high %v4329_v3, %v4329_v3  ;;  %v7948_v46 = vrot.slane %v4322_v44, 9  ;;  %v7950_v6 = vrot.slane %v4329_v3, 9 }
 0x2a1   : > { %v7955_v57 = vrot.slane %v4348_v41, 9  ;;  %v5090_v19 = vmax.f32 %v4347_v54, %v7953_v11  ;;  %v5091_v0 = vmax.f32 %v4346_v18, %v7954_v32  ;;  %v5169_v38 = vmax.f32 %v10991_v23, %v5089_v2  ;;  %v11632_v23 = vld [vmem:[#allocation19_spill] sm:$0xff] }
 0x2a2   : > { %v7949_v30 = vrot.slane %v4330_v58, 9  ;;  %v7951_v9 = vrot.slane %v4331_v12, 9  ;;  %v5085_v24 = vmax.f32 %v4322_v44, %v7948_v46  ;;  %v5087_v21 = vmax.f32 %v4329_v3, %v7950_v6 }
 0x2a3   : > { %v5092_v39 = vmax.f32 %v4348_v41, %v7955_v57  ;;  %v5170_v20 = vmax.f32 %v10993_v47, %v5090_v19  ;;  %v5171_v56 = vmax.f32 %v10995_v5, %v5091_v0  ;;  %v4373_v27 = vrot.slane %v3902_v16, %v10696_v35 }
 0x2a4   : > { %v5086_v49 = vmax.f32 %v4330_v58, %v7949_v30  ;;  %v5088_v37 = vmax.f32 %v4331_v12, %v7951_v9  ;;  %v5165_v22 = vmax.f32 %v5077_v62, %v5085_v24  ;;  %v5167_v50 = vmax.f32 %v5079_v31, %v5087_v21 }
 0x2a5   : > { %v3445_v26 = vadd.f32 %v8888_v13, %v10676_v7  ;;  %v3444_v8 = vadd.f32 %v3397_v43, %v11632_v23  ;;  %v5172_v53 = vmax.f32 %v11008_v17, %v5092_v39  ;;  %v4380_v4 = vrot.slane %v4366_v25, %v10696_v35  ;;  %v8938_v13 = vpop.f32.mrf.mxu0 }
 0x2a6   : > { %v5432_v63 = vrot.slane %v5169_v38, %v10698_v45  ;;  %v5436_v47 = vrot.slane %v5170_v20, %v10698_v45  ;;  %v5166_v33 = vmax.f32 %v5078_v15, %v5086_v49  ;;  %v5168_v5 = vmax.f32 %v5080_v36, %v5088_v37 }
 0x2a7   : > { %v5424_v16 = vrot.slane %v5167_v50, %v10698_v45  ;;  %v4381_v52 = vcombine.high %v4373_v27, %v4373_v27  ;;  %v4382_v59 = vcombine.high %v4380_v4, %v4380_v4  ;;  %v7960_v10 = vrot.slane %v4373_v27, 9  ;;  %v3787_v19 = vpop.f32.mrf.mxu0 }
 0x2a8   : > { %v5416_v7 = vrot.slane %v5165_v22, %v10698_v45  ;;  %v5420_v14 = vrot.slane %v5166_v33, %v10698_v45  ;;  %v5428_v17 = vrot.slane %v5168_v5, %v10698_v45  ;;  %v3869_v61 = vadd.f32 %v11004_v42, %v3830_v29 }
 0x2a9   : > { %v5440_v51 = vrot.slane %v5171_v56, %v10698_v45  ;;  %v7961_v62 = vrot.slane %v4381_v52, 9  ;;  %v7962_v40 = vrot.slane %v4380_v4, 9  ;;  %v3833_v15 = vadd.f32 %v8935_v1, %v10787_v48 }
 0x2aa   : > { %v5444_v18 = vrot.slane %v5172_v53, %v10698_v45  ;;  %v5551_v54 = vsel %vm5509_vm4, %v5420_v14, %v5416_v7  ;;  %v3901_v28 = vmax.f32 %v3869_v61, 0.0  ;;  %v3832_v44 = vadd.f32 %v3777_v60, %v10791_v34  ;;  %v8891_v60 = vpop.f32.mrf.mxu1 }
 0x2ab   : > { %v5552_v31 = vsel %vm5511_vm5, %v5424_v16, %v5551_v54  ;;  %v7963_v36 = vrot.slane %v4382_v59, 9  ;;  %v11044_v3 = vmax.f32 %v4373_v27, %v7960_v10  ;;  %v3872_v29 = vadd.f32 %v11004_v42, %v3833_v15 }
 0x2ac   : > { %v5553_v25 = vsel %vm5513_vm6, %v5428_v17, %v5552_v31  ;;  %v4349_v41 = vcombine.high %v3901_v28, %v3901_v28  ;;  %v4356_v48 = vrot.slane %v3901_v28, %v10696_v35  ;;  %v3871_v11 = vadd.f32 %v11004_v42, %v3832_v44  ;;  %v8941_v44 = vpop.f32.mrf.mxu0 }
 0x2ad   : > { %v5554_v32 = vsel %vm5515_vm7, %v5432_v63, %v5553_v25  ;;  %v11051_v2 = vmax.f32 %v4381_v52, %v7961_v62  ;;  %v11053_v34 = vmax.f32 %v4380_v4, %v7962_v40  ;;  %v3904_v58 = vmax.f32 %v3872_v29, 0.0 }
 0x2ae   : > { %v5555_v12 = vsel %vm5517_vm8, %v5436_v47, %v5554_v32  ;;  %v4363_v46 = vrot.slane %v4349_v41, %v10696_v35  ;;  %v4364_v6 = vcombine.high %v4356_v48, %v4356_v48  ;;  %v7956_v57 = vrot.slane %v4356_v48, 9 }
 0x2af   : > { %v5556_v0 = vsel %vm5519_vm9, %v5440_v51, %v5555_v12  ;;  %v4400_v38 = vcombine.high %v3904_v58, %v3904_v58  ;;  %v4407_v43 = vrot.slane %v3904_v58, %v10696_v35  ;;  %v3903_v30 = vmax.f32 %v3871_v11, 0.0  ;;  %v11633_v12 = vld [vmem:[#allocation20_spill] sm:$0xff] }
 0x2b0   : > { %v5557_v9 = vsel %vm5521_vm10, %v5444_v18, %v5556_v0  ;;  %v11060_v24 = vmax.f32 %v4382_v59, %v7963_v36  ;;  %v4365_v21 = vcombine.high %v4363_v46, %v4363_v46  ;;  %v3835_v1 = vadd.f32 %v8938_v13, %v3445_v26  ;;  %v3407_v13 = vpop.f32.mrf.mxu1 }
 0x2b1   : > { %5586 = vst.msk [vmem:[#allocation2 + $0x28] sm:$0xff] %vm5580_vm11, %v5557_v9  ;;  %v4414_v39 = vrot.slane %v4400_v38, %v10696_v35  ;;  %v4415_v20 = vcombine.high %v4407_v43, %v4407_v43  ;;  %v7968_v56 = vrot.slane %v4407_v43, 9  ;;  %v3834_v27 = vadd.f32 %v3787_v19, %v3444_v8 }
 0x2b2   : > { %v7957_v49 = vrot.slane %v4364_v6, 9  ;;  %v7958_v37 = vrot.slane %v4363_v46, 9  ;;  %v5093_v22 = vmax.f32 %v4356_v48, %v7956_v57  ;;  %v4383_v50 = vcombine.high %v3903_v30, %v3903_v30 }
 0x2b3   : > { %v4416_v23 = vcombine.high %v4414_v39, %v4414_v39  ;;  %v7969_v53 = vrot.slane %v4415_v20, 9  ;;  %v7970_v4 = vrot.slane %v4414_v39, 9  ;;  %v5105_v63 = vmax.f32 %v4407_v43, %v7968_v56 }
 0x2b4   : > { %v7959_v47 = vrot.slane %v4365_v21, 9  ;;  %v4390_v33 = vrot.slane %v3903_v30, %v10696_v35  ;;  %v4397_v26 = vrot.slane %v4383_v50, %v10696_v35  ;;  %v3874_v5 = vadd.f32 %v11004_v42, %v3835_v1 }
 0x2b5   : > { %v7971_v16 = vrot.slane %v4416_v23, 9  ;;  %v5106_v52 = vmax.f32 %v4415_v20, %v7969_v53  ;;  %v5107_v59 = vmax.f32 %v4414_v39, %v7970_v4  ;;  %v5177_v8 = vmax.f32 %v11044_v3, %v5105_v63 }
 0x2b6   : > { %v4398_v10 = vcombine.high %v4390_v33, %v4390_v33  ;;  %v4399_v7 = vcombine.high %v4397_v26, %v4397_v26  ;;  %v7964_v14 = vrot.slane %v4390_v33, 9  ;;  %v7966_v17 = vrot.slane %v4397_v26, 9 }
 0x2b7   : > { %v5095_v61 = vmax.f32 %v4363_v46, %v7958_v37  ;;  %v5108_v51 = vmax.f32 %v4416_v23, %v7971_v16  ;;  %v5178_v62 = vmax.f32 %v11051_v2, %v5106_v52  ;;  %v5179_v40 = vmax.f32 %v11053_v34, %v5107_v59 }
 0x2b8   : > { %v7965_v15 = vrot.slane %v4398_v10, 9  ;;  %v7967_v18 = vrot.slane %v4399_v7, 9  ;;  %v5101_v54 = vmax.f32 %v4390_v33, %v7964_v14  ;;  %v5103_v28 = vmax.f32 %v4397_v26, %v7966_v17 }
 0x2b9   : > { %v5094_v31 = vmax.f32 %v4364_v6, %v7957_v49  ;;  %v5096_v36 = vmax.f32 %v4365_v21, %v7959_v47  ;;  %v5180_v3 = vmax.f32 %v11060_v24, %v5108_v51  ;;  %v3906_v29 = vmax.f32 %v3874_v5, 0.0  ;;  %v3797_v6 = vpop.f32.mrf.mxu0 }
 0x2ba   : > { %v5102_v25 = vmax.f32 %v4398_v10, %v7965_v15  ;;  %v5104_v41 = vmax.f32 %v4399_v7, %v7967_v18  ;;  %v5173_v48 = vmax.f32 %v5093_v22, %v5101_v54  ;;  %v5175_v11 = vmax.f32 %v5095_v61, %v5103_v28 }
 0x2bb   : > { %v4434_v32 = vcombine.high %v3906_v29, %v3906_v29  ;;  %v4441_v2 = vrot.slane %v3906_v29, %v10696_v35  ;;  %v3873_v34 = vadd.f32 %v11004_v42, %v3834_v27  ;;  %v3447_v58 = vadd.f32 %v8891_v60, %v10684_v55 }
 0x2bc   : > { %v3446_v46 = vadd.f32 %v3407_v13, %v11633_v12  ;;  %v5174_v57 = vmax.f32 %v5094_v31, %v5102_v25  ;;  %v5176_v19 = vmax.f32 %v5096_v36, %v5104_v41  ;;  %v5448_v0 = vrot.slane %v5173_v48, %v10698_v45 }
 0x2bd   : > { %v5456_v38 = vrot.slane %v5175_v11, %v10698_v45  ;;  %v4448_v43 = vrot.slane %v4434_v32, %v10696_v35  ;;  %v3905_v30 = vmax.f32 %v3873_v34, 0.0  ;;  %v4449_v21 = vcombine.high %v4441_v2, %v4441_v2 }
 0x2be   : > { %v5452_v9 = vrot.slane %v5174_v57, %v10698_v45  ;;  %v5460_v24 = vrot.slane %v5176_v19, %v10698_v45  ;;  %v3837_v1 = vadd.f32 %v8941_v44, %v3447_v58  ;;  %v3836_v39 = vadd.f32 %v3797_v6, %v3446_v46 }
 0x2bf   : > { %v4450_v20 = vcombine.high %v4448_v43, %v4448_v43  ;;  %v4417_v56 = vcombine.high %v3905_v30, %v3905_v30  ;;  %v5464_v49 = vrot.slane %v5177_v8, %v10698_v45  ;;  %v5468_v37 = vrot.slane %v5178_v62, %v10698_v45 }
 0x2c0   : > { %v5558_v55 = vsel %vm5509_vm4, %v5452_v9, %v5448_v0  ;;  %v3876_v27 = vadd.f32 %v11004_v42, %v3837_v1  ;;  %v5472_v22 = vrot.slane %v5179_v40, %v10698_v45  ;;  %v7976_v53 = vrot.slane %v4441_v2, 9 }
 0x2c1   : > { %v5559_v50 = vsel %vm5511_vm5, %v5456_v38, %v5558_v55  ;;  %v7977_v4 = vrot.slane %v4449_v21, 9  ;;  %v4424_v63 = vrot.slane %v3905_v30, %v10696_v35  ;;  %v5476_v47 = vrot.slane %v5180_v3, %v10698_v45 }
 0x2c2   : > { %v5560_v23 = vsel %vm5513_vm6, %v5460_v24, %v5559_v50  ;;  %v3908_v26 = vmax.f32 %v3876_v27, 0.0  ;;  %v3875_v5 = vadd.f32 %v11004_v42, %v3836_v39  ;;  %v7978_v16 = vrot.slane %v4448_v43, 9 }
 0x2c3   : > { %v5561_v33 = vsel %vm5515_vm7, %v5464_v49, %v5560_v23  ;;  %v7979_v52 = vrot.slane %v4450_v20, 9  ;;  %v4431_v59 = vrot.slane %v4417_v56, %v10696_v35  ;;  %v5113_v17 = vmax.f32 %v4441_v2, %v7976_v53 }
 0x2c4   : > { %v5562_v60 = vsel %vm5517_vm8, %v5468_v37, %v5561_v33  ;;  %v4468_v10 = vcombine.high %v3908_v26, %v3908_v26  ;;  %v4475_v7 = vrot.slane %v3908_v26, %v10696_v35  ;;  %v5114_v61 = vmax.f32 %v4449_v21, %v7977_v4 }
 0x2c5   : > { %v5563_v8 = vsel %vm5519_vm9, %v5472_v22, %v5562_v60  ;;  %v4432_v51 = vcombine.high %v4424_v63, %v4424_v63  ;;  %v3907_v15 = vmax.f32 %v3875_v5, 0.0  ;;  %v5115_v18 = vmax.f32 %v4448_v43, %v7978_v16 }
 0x2c6   : > { %v5564_v14 = vsel %vm5521_vm10, %v5476_v47, %v5563_v8  ;;  %v4482_v42 = vrot.slane %v4468_v10, %v10696_v35  ;;  %v4483_v62 = vcombine.high %v4475_v7, %v4475_v7  ;;  %v7984_v40 = vrot.slane %v4475_v7, 9 }
 0x2c7   : > { %5587 = vst.msk [vmem:[#allocation2 + $0x30] sm:$0xff] %vm5580_vm11, %v5564_v14  ;;  %v5116_v54 = vmax.f32 %v4450_v20, %v7979_v52  ;;  %v4433_v28 = vcombine.high %v4431_v59, %v4431_v59  ;;  %v7972_v44 = vrot.slane %v4424_v63, 9  ;;  %v7973_v29 = vrot.slane %v4432_v51, 9 }
 0x2c8   : > { %v4484_v13 = vcombine.high %v4482_v42, %v4482_v42  ;;  %v7985_v31 = vrot.slane %v4483_v62, 9  ;;  %v7986_v36 = vrot.slane %v4482_v42, 9  ;;  %v5121_v3 = vmax.f32 %v4475_v7, %v7984_v40 }
 0x2c9   : > { %v7974_v25 = vrot.slane %v4431_v59, 9  ;;  %v4451_v41 = vcombine.high %v3907_v15, %v3907_v15  ;;  %v4458_v48 = vrot.slane %v3907_v15, %v10696_v35  ;;  %v5109_v58 = vmax.f32 %v4424_v63, %v7972_v44 }
 0x2ca   : > { %v7987_v11 = vrot.slane %v4484_v13, 9  ;;  %v5122_v32 = vmax.f32 %v4483_v62, %v7985_v31  ;;  %v5123_v2 = vmax.f32 %v4482_v42, %v7986_v36  ;;  %v5185_v34 = vmax.f32 %v5113_v17, %v5121_v3 }
 0x2cb   : > { %v4465_v12 = vrot.slane %v4451_v41, %v10696_v35  ;;  %v4466_v46 = vcombine.high %v4458_v48, %v4458_v48  ;;  %v7980_v57 = vrot.slane %v4458_v48, 9  ;;  %v7975_v19 = vrot.slane %v4433_v28, 9 }
 0x2cc   : > { %v5124_v6 = vmax.f32 %v4484_v13, %v7987_v11  ;;  %v5186_v0 = vmax.f32 %v5114_v61, %v5122_v32  ;;  %v5187_v38 = vmax.f32 %v5115_v18, %v5123_v2  ;;  %v5110_v21 = vmax.f32 %v4432_v51, %v7973_v29 }
 0x2cd   : > { %v4467_v43 = vcombine.high %v4465_v12, %v4465_v12  ;;  %v7981_v30 = vrot.slane %v4466_v46, 9  ;;  %v7982_v9 = vrot.slane %v4465_v12, 9  ;;  %v5117_v24 = vmax.f32 %v4458_v48, %v7980_v57 }
 0x2ce   : > { %v5111_v1 = vmax.f32 %v4431_v59, %v7974_v25  ;;  %v5188_v39 = vmax.f32 %v5116_v54, %v5124_v6  ;;  %v5112_v49 = vmax.f32 %v4433_v28, %v7975_v19  ;;  %v5496_v26 = vrot.slane %v5185_v34, %v10698_v45 }
 0x2cf   : > { %v7983_v55 = vrot.slane %v4467_v43, 9  ;;  %v5118_v20 = vmax.f32 %v4466_v46, %v7981_v30  ;;  %v5119_v56 = vmax.f32 %v4465_v12, %v7982_v9  ;;  %v5181_v27 = vmax.f32 %v5109_v58, %v5117_v24 }
 0x2d0   : > { %v5500_v60 = vrot.slane %v5186_v0, %v10698_v45  ;;  %v5504_v52 = vrot.slane %v5187_v38, %v10698_v45  ;;  %v5508_v8 = vrot.slane %v5188_v39, %v10698_v45 }
 0x2d1   : > { %v5120_v37 = vmax.f32 %v4467_v43, %v7983_v55  ;;  %v5182_v22 = vmax.f32 %v5110_v21, %v5118_v20  ;;  %v5183_v50 = vmax.f32 %v5111_v1, %v5119_v56  ;;  %v5480_v53 = vrot.slane %v5181_v27, %v10698_v45 }
 0x2d3   : > { %v5184_v23 = vmax.f32 %v5112_v49, %v5120_v37  ;;  %v5484_v4 = vrot.slane %v5182_v22, %v10698_v45  ;;  %v5488_v63 = vrot.slane %v5183_v50, %v10698_v45 }
 0x2d5   : > { %v5492_v47 = vrot.slane %v5184_v23, %v10698_v45  ;;  %v5565_v33 = vsel %vm5509_vm4, %v5484_v4, %v5480_v53 }
 0x2d6   : > { %v5566_v5 = vsel %vm5511_vm5, %v5488_v63, %v5565_v33 }
 0x2d7   : > { %v5567_v16 = vsel %vm5513_vm6, %v5492_v47, %v5566_v5 }
 0x2d8   : > { %v5568_v59 = vsel %vm5515_vm7, %v5496_v26, %v5567_v16 }
 0x2d9   : > { %v5569_v10 = vsel %vm5517_vm8, %v5500_v60, %v5568_v59 }
 0x2da   : > { %v5570_v7 = vsel %vm5519_vm9, %v5504_v52, %v5569_v10 }
 0x2db   : > { %v5571_v14 = vsel %vm5521_vm10, %v5508_v8, %v5570_v7 }
 0x2dc   : > { %5588 = vst.msk [vmem:[#allocation2 + $0x38] sm:$0xff] %vm5580_vm11, %v5571_v14 }
 0x2dd   : > { %v5654_v17 = vld [vmem:[#allocation7 + $0x18] sm:$0xff]  ;;  %v5653_v61 = vld [vmem:[#allocation7 + $0x10] sm:$0xff]  ;;  %vm5599_vm12 = vcmask 123904   ;;  %vm5604_vm13 = vcmask 122880   ;;  %v9279_v51 = vmov 0.0   ;;  %v5590_v62 = vld [vmem:[#allocation2 + $0x8] sm:$0xff] }
 0x2de   : > { %8942 = vmatprep.subr.mxu1 %v5654_v17  ;;  %5598 = vst.msk [vmem:[#allocation11] sm:$0xff] %vm5580_vm11, %v9279_v51  ;;  %5602 = vst.msk [vmem:[#allocation11 + $0x5a] sm:$0xff] %vm5580_vm11, %v9279_v51  ;;  %v5589_v42 = vld [vmem:[#allocation2] sm:$0xff]  ;;  %v5591_v40 = vld [vmem:[#allocation2 + $0x10] sm:$0xff]  ;;  %vm7444_vm14 = vcmask 125952  }
 0x2df   : > { %5600 = vst.msk [vmem:[#allocation11 + $0x8] sm:$0x3] %vm5599_vm12, %v9279_v51  ;;  %5603 = vst.msk [vmem:[#allocation11 + $0x62] sm:$0x3] %vm5599_vm12, %v9279_v51  ;;  %8943 = vmatpush3.msra.mxu1 %v5654_v17  ;;  %v5643_v15 = vld [vmem:[#allocation7 + $0x8] sm:$0xff]  ;;  %v5592_v18 = vld [vmem:[#allocation2 + $0x18] sm:$0xff] }
 0x2e0   : > { %5606 = vst.msk [vmem:[#allocation11 + $0xa] sm:$0x1] %vm5604_vm13, %v9279_v51  ;;  %5607 = vst.msk [vmem:[#allocation11 + $0x14] sm:$0x1] %vm5604_vm13, %v9279_v51  ;;  %v5593_v54 = vld [vmem:[#allocation2 + $0x20] sm:$0xff]  ;;  %8944 = vmatprep.subr.mxu1 %v5653_v61  ;;  %v5594_v28 = vld [vmem:[#allocation2 + $0x28] sm:$0xff] }
 0x2e1   : > { %5608 = vst.msk [vmem:[#allocation11 + $0x1e] sm:$0x1] %vm5604_vm13, %v9279_v51  ;;  %5609 = vst.msk [vmem:[#allocation11 + $0x28] sm:$0x1] %vm5604_vm13, %v9279_v51  ;;  %v5595_v44 = vld [vmem:[#allocation2 + $0x30] sm:$0xff]  ;;  %8945 = vmatpush3.msra.mxu1 %v5653_v61  ;;  %v6218_v31 = vld [vmem:[#allocation7 + $0x40] sm:$0xff] }
 0x2e2   : > { %5610 = vst.msk [vmem:[#allocation11 + $0x32] sm:$0x1] %vm5604_vm13, %v9279_v51  ;;  %5611 = vst.msk [vmem:[#allocation11 + $0x3c] sm:$0x1] %vm5604_vm13, %v9279_v51  ;;  %8958 = vmatprep.subr.mxu1 %v5643_v15  ;;  %v6219_v13 = vld [vmem:[#allocation7 + $0x48] sm:$0xff]  ;;  %v5642_v41 = vld [vmem:[#allocation7] sm:$0xff] }
 0x2e3   : > { %5612 = vst.msk [vmem:[#allocation11 + $0x46] sm:$0x1] %vm5604_vm13, %v9279_v51  ;;  %5613 = vst.msk [vmem:[#allocation11 + $0x50] sm:$0x1] %vm5604_vm13, %v9279_v51  ;;  %9006 = vmatprep.subr.mxu0 %v6219_v13  ;;  %v5596_v36 = vld [vmem:[#allocation2 + $0x38] sm:$0xff]  ;;  %v6516_v48 = vld [vmem:[#allocation7 + $0x68] sm:$0xff] }
 0x2e4   : > { %5616 = vst.msk [vmem:[#allocation11 + $0x13] sm:$0x1] %vm5604_vm13, %v9279_v51  ;;  %5617 = vst.msk [vmem:[#allocation11 + $0x1d] sm:$0x1] %vm5604_vm13, %v9279_v51  ;;  %9007 = vmatpush3.msra.mxu0 %v6219_v13  ;;  %v5923_v32 = vld [vmem:[#allocation7 + $0x28] sm:$0xff]  ;;  %v6515_v34 = vld [vmem:[#allocation7 + $0x60] sm:$0xff] }
 0x2e5   : > { %5618 = vst.msk [vmem:[#allocation11 + $0x27] sm:$0x1] %vm5604_vm13, %v9279_v51  ;;  %5619 = vst.msk [vmem:[#allocation11 + $0x31] sm:$0x1] %vm5604_vm13, %v9279_v51  ;;  %9008 = vmatprep.subr.mxu0 %v6218_v31  ;;  %v6812_v46 = vld [vmem:[#allocation7 + $0x88] sm:$0xff]  ;;  %v5922_v43 = vld [vmem:[#allocation7 + $0x20] sm:$0xff] }
 0x2e6   : > { %5620 = vst.msk [vmem:[#allocation11 + $0x3b] sm:$0x1] %vm5604_vm13, %v9279_v51  ;;  %5621 = vst.msk [vmem:[#allocation11 + $0x45] sm:$0x1] %vm5604_vm13, %v9279_v51  ;;  %v5644_v3 = vld [vmem:[#allocation11 + $0x1] sm:$0xff]  ;;  %9009 = vmatpush3.msra.mxu0 %v6218_v31  ;;  %v6071_v9 = vld [vmem:[#allocation7 + $0x38] sm:$0xff] }
 0x2e7   : > { %5622 = vst.msk [vmem:[#allocation11 + $0x4f] sm:$0x1] %vm5604_vm13, %v9279_v51  ;;  %5623 = vst.msk [vmem:[#allocation11 + $0x59] sm:$0x1] %vm5604_vm13, %v9279_v51  ;;  %8946 = vmatprep.mubr.msk.f32.mxu1 %vm5580_vm11, %v5644_v3  ;;  %9038 = vmatprep.subr.mxu0 %v6516_v48  ;;  %v6811_v21 = vld [vmem:[#allocation7 + $0x80] sm:$0xff]  ;;  %v6070_v22 = vld [vmem:[#allocation7 + $0x30] sm:$0xff] }
 0x2e8   : > { %5626 = vst.msk [vmem:[#allocation11 + $0xb] sm:$0xff] %vm5580_vm11, %v5589_v42  ;;  %5627 = vst.msk [vmem:[#allocation11 + $0x15] sm:$0xff] %vm5580_vm11, %v5590_v62  ;;  %v6367_v23 = vld [vmem:[#allocation7 + $0x58] sm:$0xff]  ;;  %v6366_v5 = vld [vmem:[#allocation7 + $0x50] sm:$0xff] }
 0x2e9   : > { %5628 = vst.msk [vmem:[#allocation11 + $0x1f] sm:$0xff] %vm5580_vm11, %v5591_v40  ;;  %5629 = vst.msk [vmem:[#allocation11 + $0x29] sm:$0xff] %vm5580_vm11, %v5592_v18  ;;  %v6664_v60 = vld [vmem:[#allocation7 + $0x78] sm:$0xff]  ;;  %v6663_v16 = vld [vmem:[#allocation7 + $0x70] sm:$0xff] }
 0x2ea   : > { %5605 = vst.msk [vmem:[#allocation11] sm:$0x1] %vm5604_vm13, %v9279_v51  ;;  %5614 = vst.msk [vmem:[#allocation11 + $0x5a] sm:$0x1] %vm5604_vm13, %v9279_v51  ;;  %v6661_v52 = vld [vmem:[#allocation11 + $0x5b] sm:$0xff] }
 0x2eb   : > { %5615 = vst.msk [vmem:[#allocation11 + $0x9] sm:$0x1] %vm5604_vm13, %v9279_v51  ;;  %5624 = vst.msk [vmem:[#allocation11 + $0x63] sm:$0x1] %vm5604_vm13, %v9279_v51 }
 0x2ec   : > { %5630 = vst.msk [vmem:[#allocation11 + $0x33] sm:$0xff] %vm5580_vm11, %v5593_v54  ;;  %5631 = vst.msk [vmem:[#allocation11 + $0x3d] sm:$0xff] %vm5580_vm11, %v5594_v28 }
 0x2ed   : > { %5632 = vst.msk [vmem:[#allocation11 + $0x47] sm:$0xff] %vm5580_vm11, %v5595_v44  ;;  %5633 = vst.msk [vmem:[#allocation11 + $0x51] sm:$0xff] %vm5580_vm11, %v5596_v36 }
 0x2ef   : > { %v5645_v29 = vld [vmem:[#allocation11 + $0xb] sm:$0xff]  ;;  %v11147_v25 = vld [vmem:[#allocation11 + $0x15] sm:$0xff] }
 0x2f0   : > { %8947 = vmatmul.mubr.msk.f32.vlgmr.msra.gmra.mxu1 %vm5580_vm11, %v5645_v29  ;;  %9010 = vmatprep.mubr.msk.f32.mxu0 %vm5580_vm11, %v5645_v29  ;;  %v11153_v11 = vld [vmem:[#allocation11 + $0x1f] sm:$0xff]  ;;  %v11155_v2 = vld [vmem:[#allocation11 + $0x29] sm:$0xff]  ;;  %v11190_v38 = vld [vmem:[#allocation11 + $0x14] sm:$0xff] }
 0x2f1   : > { %8959 = vmatpush3.msra.mxu1 %v5643_v15  ;;  %8949 = vmatprep.mubr.msk.f32.mxu1 %vm5580_vm11, %v11147_v25  ;;  %v5634_v19 = vld [vmem:[#allocation11] sm:$0xff]  ;;  %v11188_v0 = vld [vmem:[#allocation11 + $0xa] sm:$0xff]  ;;  %v5915_v37 = vld [vmem:[#allocation11 + $0x16] sm:$0xff] }
 0x2f2   : > { %8960 = vmatprep.subr.mxu1 %v5642_v41  ;;  %9011 = vmatmul.mubr.msk.f32.vlgmr.msra.gmra.mxu0 %vm5580_vm11, %v11147_v25  ;;  %v11200_v30 = vld [vmem:[#allocation11 + $0x1e] sm:$0xff]  ;;  %v11202_v24 = vld [vmem:[#allocation11 + $0x28] sm:$0xff] }
 0x2f3   : > { %8961 = vmatpush3.msra.mxu1 %v5642_v41  ;;  %v11163_v58 = vld [vmem:[#allocation11 + $0x33] sm:$0xff]  ;;  %9039 = vmatpush3.msra.mxu0 %v6516_v48  ;;  %v11165_v12 = vld [vmem:[#allocation11 + $0x3d] sm:$0xff]  ;;  %v5917_v53 = vld [vmem:[#allocation11 + $0x2a] sm:$0xff] }
 0x2f4   : > { %8950 = vmatmul.mubr.msk.f32.gmra.mxu1 %vm5580_vm11, %v11153_v11  ;;  %8974 = vmatprep.subr.mxu1 %v5923_v32  ;;  %v11177_v57 = vld [vmem:[#allocation11 + $0x47] sm:$0xff]  ;;  %v11185_v6 = vld [vmem:[#allocation11 + $0x51] sm:$0xff]  ;;  %v5640_v39 = vld [vmem:[#allocation11 + $0x3c] sm:$0xff] }
 0x2f5   : > { %8952 = vmatprep.mubr.msk.f32.mxu1 %vm5580_vm11, %v11155_v2  ;;  %9013 = vmatprep.mubr.msk.f32.mxu0 %vm5580_vm11, %v11153_v11  ;;  %v5639_v1 = vld [vmem:[#allocation11 + $0x32] sm:$0xff]  ;;  %v5641_v55 = vld [vmem:[#allocation11 + $0x46] sm:$0xff]  ;;  %v6513_v27 = vld [vmem:[#allocation11 + $0x5a] sm:$0xff] }
 0x2f6   : > { %9040 = vmatprep.subr.mxu0 %v6515_v34  ;;  %9014 = vmatmul.mubr.msk.f32.gmra.mxu0 %vm5580_vm11, %v11155_v2  ;;  %v5913_v20 = vld [vmem:[#allocation11 + $0x2] sm:$0xff]  ;;  %v6068_v56 = vld [vmem:[#allocation11 + $0x50] sm:$0xff] }
 0x2f7   : > { %9016 = vmatprep.mubr.msk.f32.mxu0 %vm5580_vm11, %v11163_v58  ;;  %9041 = vmatpush3.msra.mxu0 %v6515_v34  ;;  %v5914_v49 = vld [vmem:[#allocation11 + $0xc] sm:$0xff]  ;;  %v5916_v50 = vld [vmem:[#allocation11 + $0x20] sm:$0xff]  ;;  %v5918_v4 = vld [vmem:[#allocation11 + $0x34] sm:$0xff] }
 0x2f8   : > { %8953 = vmatmul.mubr.msk.f32.gmra.mxu1 %vm5580_vm11, %v11163_v58  ;;  %9070 = vmatprep.subr.mxu0 %v6812_v46  ;;  %v5919_v63 = vld [vmem:[#allocation11 + $0x3e] sm:$0xff]  ;;  %v5920_v47 = vld [vmem:[#allocation11 + $0x48] sm:$0xff]  ;;  %v6364_v33 = vld [vmem:[#allocation11 + $0x52] sm:$0xff] }
 0x2f9   : > { %8955 = vmatprep.mubr.msk.f32.mxu1 %vm5580_vm11, %v11165_v12  ;;  %v6809_v26 = vld [vmem:[#allocation11 + $0x5c] sm:$0xff] }
 0x2fa   : > { %9017 = vmatmul.mubr.msk.f32.gmra.mxu0 %vm5580_vm11, %v11165_v12 }
 0x2fb   : > { %9019 = vmatprep.mubr.msk.f32.mxu0 %vm5580_vm11, %v11177_v57 }
 0x2fc   : > { %8956 = vmatmul.mubr.msk.f32.gmra.mxu1 %vm5580_vm11, %v11177_v57 }
 0x2fd   : > { %8962 = vmatprep.mubr.msk.f32.mxu1 %vm5580_vm11, %v5634_v19 }
 0x2fe   : > { %9020 = vmatmul.mubr.msk.f32.gmra.mxu0 %vm5580_vm11, %v11185_v6 }
 0x2ff   : > { %9042 = vmatprep.mubr.msk.f32.mxu0 %vm5580_vm11, %v11190_v38 }
 0x300   : > { %8963 = vmatmul.mubr.msk.f32.vlgmr.msra.gmra.mxu1 %vm5580_vm11, %v11188_v0 }
 0x301   : > { %8975 = vmatpush3.msra.mxu1 %v5923_v32  ;;  %8965 = vmatprep.mubr.msk.f32.mxu1 %vm5580_vm11, %v11190_v38 }
 0x302   : > { %8976 = vmatprep.subr.mxu1 %v5922_v43  ;;  %9043 = vmatmul.mubr.msk.f32.vlgmr.msra.gmra.mxu0 %vm5580_vm11, %v11200_v30 }
 0x303   : > { %8977 = vmatpush3.msra.mxu1 %v5922_v43  ;;  %9071 = vmatpush3.msra.mxu0 %v6812_v46 }
 0x304   : > { %8966 = vmatmul.mubr.msk.f32.gmra.mxu1 %vm5580_vm11, %v11200_v30  ;;  %8990 = vmatprep.subr.mxu1 %v6071_v9 }
 0x305   : > { %8968 = vmatprep.mubr.msk.f32.mxu1 %vm5580_vm11, %v11202_v24  ;;  %9045 = vmatprep.mubr.msk.f32.mxu0 %vm5580_vm11, %v11202_v24 }
 0x306   : > { %9072 = vmatprep.subr.mxu0 %v6811_v21  ;;  %9046 = vmatmul.mubr.msk.f32.gmra.mxu0 %vm5580_vm11, %v5639_v1 }
 0x307   : > { %9048 = vmatprep.mubr.msk.f32.mxu0 %vm5580_vm11, %v5640_v39  ;;  %9073 = vmatpush3.msra.mxu0 %v6811_v21 }
 0x308   : > { %8969 = vmatmul.mubr.msk.f32.gmra.mxu1 %vm5580_vm11, %v5639_v1 }
 0x309   : > { %8971 = vmatprep.mubr.msk.f32.mxu1 %vm5580_vm11, %v5640_v39 }
 0x30a   : > { %9049 = vmatmul.mubr.msk.f32.gmra.mxu0 %vm5580_vm11, %v5641_v55 }
 0x30b   : > { %9051 = vmatprep.mubr.msk.f32.mxu0 %vm5580_vm11, %v6068_v56 }
 0x30c   : > { %8972 = vmatmul.mubr.msk.f32.gmra.mxu1 %vm5580_vm11, %v5641_v55 }
 0x30d   : > { %8978 = vmatprep.mubr.msk.f32.mxu1 %vm5580_vm11, %v5913_v20 }
 0x30e   : > { %9052 = vmatmul.mubr.msk.f32.gmra.mxu0 %vm5580_vm11, %v6513_v27 }
 0x30f   : > { %9074 = vmatprep.mubr.msk.f32.mxu0 %vm5580_vm11, %v5915_v37 }
 0x310   : > { %8979 = vmatmul.mubr.msk.f32.vlgmr.msra.gmra.mxu1 %vm5580_vm11, %v5914_v49 }
 0x311   : > { %8991 = vmatpush3.msra.mxu1 %v6071_v9  ;;  %8981 = vmatprep.mubr.msk.f32.mxu1 %vm5580_vm11, %v5915_v37 }
 0x312   : > { %8992 = vmatprep.subr.mxu1 %v6070_v22  ;;  %9075 = vmatmul.mubr.msk.f32.vlgmr.msra.gmra.mxu0 %vm5580_vm11, %v5916_v50 }
 0x313   : > { %8993 = vmatpush3.msra.mxu1 %v6070_v22  ;;  %9077 = vmatprep.mubr.msk.f32.mxu0 %vm5580_vm11, %v5917_v53 }
 0x314   : > { %8982 = vmatmul.mubr.msk.f32.gmra.mxu1 %vm5580_vm11, %v5916_v50  ;;  %9022 = vmatprep.subr.mxu1 %v6367_v23 }
 0x315   : > { %8984 = vmatprep.mubr.msk.f32.mxu1 %vm5580_vm11, %v5917_v53 }
 0x316   : > { %9078 = vmatmul.mubr.msk.f32.gmra.mxu0 %vm5580_vm11, %v5918_v4 }
 0x317   : > { %9080 = vmatprep.mubr.msk.f32.mxu0 %vm5580_vm11, %v5919_v63 }
 0x318   : > { %8985 = vmatmul.mubr.msk.f32.gmra.mxu1 %vm5580_vm11, %v5918_v4 }
 0x319   : > { %8987 = vmatprep.mubr.msk.f32.mxu1 %vm5580_vm11, %v5919_v63 }
 0x31a   : > { %9081 = vmatmul.mubr.msk.f32.gmra.mxu0 %vm5580_vm11, %v5920_v47 }
 0x31b   : > { %9083 = vmatprep.mubr.msk.f32.mxu0 %vm5580_vm11, %v6364_v33 }
 0x31c   : > { %8988 = vmatmul.mubr.msk.f32.gmra.mxu1 %vm5580_vm11, %v5920_v47 }
 0x31d   : > { %8994 = vmatprep.mubr.msk.f32.mxu1 %vm5580_vm11, %v11188_v0 }
 0x31e   : > { %9084 = vmatmul.mubr.msk.f32.gmra.mxu0 %vm5580_vm11, %v6809_v26 }
 0x320   : > { %8995 = vmatmul.mubr.msk.f32.vlgmr.msra.gmra.mxu1 %vm5580_vm11, %v11190_v38 }
 0x321   : > { %9023 = vmatpush3.msra.mxu1 %v6367_v23  ;;  %8997 = vmatprep.mubr.msk.f32.mxu1 %vm5580_vm11, %v11200_v30 }
 0x322   : > { %9024 = vmatprep.subr.mxu1 %v6366_v5 }
 0x323   : > { %9025 = vmatpush3.msra.mxu1 %v6366_v5 }
 0x324   : > { %8998 = vmatmul.mubr.msk.f32.gmra.mxu1 %vm5580_vm11, %v11202_v24  ;;  %9054 = vmatprep.subr.mxu1 %v6664_v60 }
 0x325   : > { %9000 = vmatprep.mubr.msk.f32.mxu1 %vm5580_vm11, %v5639_v1 }
 0x328   : > { %9001 = vmatmul.mubr.msk.f32.gmra.mxu1 %vm5580_vm11, %v5640_v39 }
 0x329   : > { %9003 = vmatprep.mubr.msk.f32.mxu1 %vm5580_vm11, %v5641_v55 }
 0x32c   : > { %9004 = vmatmul.mubr.msk.f32.gmra.mxu1 %vm5580_vm11, %v6068_v56 }
 0x32d   : > { %9026 = vmatprep.mubr.msk.f32.mxu1 %vm5580_vm11, %v5914_v49 }
 0x330   : > { %9027 = vmatmul.mubr.msk.f32.vlgmr.msra.gmra.mxu1 %vm5580_vm11, %v5915_v37 }
 0x331   : > { %9055 = vmatpush3.msra.mxu1 %v6664_v60  ;;  %9029 = vmatprep.mubr.msk.f32.mxu1 %vm5580_vm11, %v5916_v50 }
 0x332   : > { %9056 = vmatprep.subr.mxu1 %v6663_v16 }
 0x333   : > { %9057 = vmatpush3.msra.mxu1 %v6663_v16 }
 0x334   : > { %9030 = vmatmul.mubr.msk.f32.gmra.mxu1 %vm5580_vm11, %v5917_v53 }
 0x335   : > { %9032 = vmatprep.mubr.msk.f32.mxu1 %vm5580_vm11, %v5918_v4 }
 0x338   : > { %9033 = vmatmul.mubr.msk.f32.gmra.mxu1 %vm5580_vm11, %v5919_v63 }
 0x339   : > { %9035 = vmatprep.mubr.msk.f32.mxu1 %vm5580_vm11, %v5920_v47 }
 0x33c   : > { %9036 = vmatmul.mubr.msk.f32.gmra.mxu1 %vm5580_vm11, %v6364_v33 }
 0x33d   : > { %9058 = vmatprep.mubr.msk.f32.mxu1 %vm5580_vm11, %v11147_v25 }
 0x340   : > { %9059 = vmatmul.mubr.msk.f32.vlgmr.msra.gmra.mxu1 %vm5580_vm11, %v11153_v11 }
 0x341   : > { %9061 = vmatprep.mubr.msk.f32.mxu1 %vm5580_vm11, %v11155_v2 }
 0x344   : > { %9062 = vmatmul.mubr.msk.f32.gmra.mxu1 %vm5580_vm11, %v11163_v58 }
 0x345   : > { %9064 = vmatprep.mubr.msk.f32.mxu1 %vm5580_vm11, %v11165_v12 }
 0x348   : > { %9065 = vmatmul.mubr.msk.f32.gmra.mxu1 %vm5580_vm11, %v11177_v57 }
 0x349   : > { %9067 = vmatprep.mubr.msk.f32.mxu1 %vm5580_vm11, %v11185_v6 }
 0x34c   : > { %9068 = vmatmul.mubr.msk.f32.gmra.mxu1 %vm5580_vm11, %v6661_v52 }
 0x3b0   : > { %v8948_v59 = vpop.f32.mrf.mxu1 }
 0x3b2   : > { %v5745_v8 = vpop.f32.mrf.mxu1  ;;  %v9012_v14 = vpop.f32.mrf.mxu0 }
 0x3b4   : > { %v8951_v10 = vpop.f32.mrf.mxu1  ;;  %v6310_v51 = vpop.f32.mrf.mxu0 }
 0x3b6   : > { %v5755_v7 = vpop.f32.mrf.mxu1  ;;  %v11275_v40 = vpop.f32.mrf.mxu0 }
 0x3b8   : > { %v8954_v17 = vpop.f32.mrf.mxu1  ;;  %v11277_v54 = vpop.f32.mrf.mxu0 }
 0x3ba   : > { %v5765_v61 = vpop.f32.mrf.mxu1  ;;  %v11279_v13 = vpop.f32.mrf.mxu0 }
 0x3bc   : > { %v11271_v42 = vpop.f32.mrf.mxu1  ;;  %v11281_v3 = vpop.f32.mrf.mxu0 }
 0x3be   : > { %v11273_v62 = vpop.f32.mrf.mxu1  ;;  %v11283_v41 = vpop.f32.mrf.mxu0 }
 0x3c0   : > { %v8964_v15 = vpop.f32.mrf.mxu1  ;;  %v11285_v32 = vpop.f32.mrf.mxu0 }
 0x3c1   : > { %v5880_v37 = vadd.f32 %v8964_v15, %v8948_v59 }
 0x3c2   : > { %v5874_v18 = vpop.f32.mrf.mxu1  ;;  %v9044_v58 = vpop.f32.mrf.mxu0 }
 0x3c3   : > { %v5875_v50 = vadd.f32 %v5874_v18, %v5745_v8 }
 0x3c4   : > { %v8967_v28 = vpop.f32.mrf.mxu1  ;;  %v6607_v57 = vpop.f32.mrf.mxu0 }
 0x3c5   : > { %v5890_v63 = vadd.f32 %v8967_v28, %v8951_v10 }
 0x3c6   : > { %v5884_v44 = vpop.f32.mrf.mxu1  ;;  %v11287_v0 = vpop.f32.mrf.mxu0 }
 0x3c7   : > { %v5885_v5 = vadd.f32 %v5884_v44, %v5755_v7 }
 0x3c8   : > { %v8970_v31 = vpop.f32.mrf.mxu1  ;;  %v11289_v30 = vpop.f32.mrf.mxu0 }
 0x3ca   : > { %v5894_v36 = vpop.f32.mrf.mxu1  ;;  %v11291_v21 = vpop.f32.mrf.mxu0 }
 0x3cb   : > { %11634 = vst [vmem:[#allocation52_spill] sm:$0xff] %v11291_v21  ;;  %v5900_v21 = vadd.f32 %v8970_v31, %v8954_v17  ;;  %v5895_v59 = vadd.f32 %v5894_v36, %v5765_v61 }
 0x3cc   : > { %v8973_v29 = vpop.f32.mrf.mxu1  ;;  %v11293_v55 = vpop.f32.mrf.mxu0 }
 0x3cd   : > { %11635 = vst [vmem:[#allocation53_spill] sm:$0xff] %v11293_v55  ;;  %v5910_v10 = vadd.f32 %v8973_v29, %v11271_v42 }
 0x3ce   : > { %v5904_v25 = vpop.f32.mrf.mxu1  ;;  %v11295_v27 = vpop.f32.mrf.mxu0 }
 0x3cf   : > { %11636 = vst [vmem:[#allocation54_spill] sm:$0xff] %v11295_v27  ;;  %v5905_v28 = vadd.f32 %v5904_v25, %v11273_v62 }
 0x3d0   : > { %v8980_v48 = vpop.f32.mrf.mxu1  ;;  %v11297_v53 = vpop.f32.mrf.mxu0 }
 0x3d1   : > { %v6054_v23 = vadd.f32 %v8980_v48, %v5880_v37 }
 0x3d2   : > { %v6014_v11 = vpop.f32.mrf.mxu1  ;;  %v9076_v52 = vpop.f32.mrf.mxu0 }
 0x3d3   : > { %v6053_v47 = vadd.f32 %v6014_v11, %v5875_v50 }
 0x3d4   : > { %v8983_v2 = vpop.f32.mrf.mxu1  ;;  %v6903_v37 = vpop.f32.mrf.mxu0 }
 0x3d5   : > { %v6056_v60 = vadd.f32 %v8983_v2, %v5890_v63 }
 0x3d6   : > { %v6024_v34 = vpop.f32.mrf.mxu1  ;;  %v9079_v36 = vpop.f32.mrf.mxu0 }
 0x3d7   : > { %v6055_v35 = vadd.f32 %v6024_v34, %v5885_v5 }
 0x3d8   : > { %v8986_v12 = vpop.f32.mrf.mxu1 }
 0x3d9   : > { %v6058_v11 = vadd.f32 %v8986_v12, %v5900_v21 }
 0x3da   : > { %v6034_v46 = vpop.f32.mrf.mxu1 }
 0x3db   : > { %v6057_v7 = vadd.f32 %v6034_v46, %v5895_v59  ;;  %v11640_v59 = vld [vmem:[#allocation54_spill] sm:$0xff] }
 0x3dc   : > { %v8989_v19 = vpop.f32.mrf.mxu1 }
 0x3dd   : > { %v6060_v34 = vadd.f32 %v8989_v19, %v5910_v10  ;;  %v11305_v19 = vld [vmem:[#allocation8] ss:$0 sm:$0xff] }
 0x3de   : > { %v6044_v6 = vpop.f32.mrf.mxu1 }
 0x3e0   : > { %v8996_v38 = vpop.f32.mrf.mxu1 }
 0x3e1   : > { %v6202_v33 = vadd.f32 %v8996_v38, %v6054_v23 }
 0x3e2   : > { %v6162_v43 = vpop.f32.mrf.mxu1 }
 0x3e3   : > { %v6201_v16 = vadd.f32 %v6162_v43, %v6053_v47  ;;  %v6350_v55 = vadd.f32 %v9012_v14, %v6202_v33  ;;  %v6059_v14 = vadd.f32 %v6044_v6, %v5905_v28  ;;  %v11637_v47 = vld [vmem:[#allocation52_spill] sm:$0xff] }
 0x3e4   : > { %v8999_v9 = vpop.f32.mrf.mxu1 }
 0x3e5   : > { %v6204_v27 = vadd.f32 %v8999_v9, %v6056_v60  ;;  %v6349_v8 = vadd.f32 %v6310_v51, %v6201_v16 }
 0x3e6   : > { %v6172_v24 = vpop.f32.mrf.mxu1 }
 0x3e7   : > { %v6203_v18 = vadd.f32 %v6172_v24, %v6055_v35  ;;  %v6352_v2 = vadd.f32 %v11275_v40, %v6204_v27 }
 0x3e8   : > { %v9002_v1 = vpop.f32.mrf.mxu1 }
 0x3e9   : > { %v6206_v43 = vadd.f32 %v9002_v1, %v6058_v11  ;;  %v6351_v51 = vadd.f32 %v11277_v54, %v6203_v18 }
 0x3ea   : > { %v6182_v39 = vpop.f32.mrf.mxu1 }
 0x3eb   : > { %v6205_v17 = vadd.f32 %v6182_v39, %v6057_v7  ;;  %v6354_v46 = vadd.f32 %v11279_v13, %v6206_v43 }
 0x3ec   : > { %v9005_v20 = vpop.f32.mrf.mxu1 }
 0x3ed   : > { %v6208_v9 = vadd.f32 %v9005_v20, %v6060_v34  ;;  %v6353_v40 = vadd.f32 %v11281_v3, %v6205_v17 }
 0x3ee   : > { %v6192_v56 = vpop.f32.mrf.mxu1 }
 0x3ef   : > { %v6207_v42 = vadd.f32 %v6192_v56, %v6059_v14  ;;  %v6356_v1 = vadd.f32 %v11283_v41, %v6208_v9 }
 0x3f0   : > { %v9028_v49 = vpop.f32.mrf.mxu1 }
 0x3f1   : > { %v6498_v48 = vadd.f32 %v9028_v49, %v6350_v55  ;;  %v6355_v39 = vadd.f32 %v11285_v32, %v6207_v42 }
 0x3f2   : > { %v6458_v22 = vpop.f32.mrf.mxu1 }
 0x3f3   : > { %v6497_v38 = vadd.f32 %v6458_v22, %v6349_v8  ;;  %v6647_v35 = vadd.f32 %v9044_v58, %v6498_v48  ;;  %v6913_v58 = vpop.f32.mrf.mxu0 }
 0x3f4   : > { %v9031_v4 = vpop.f32.mrf.mxu1 }
 0x3f5   : > { %v6500_v31 = vadd.f32 %v9031_v4, %v6352_v2  ;;  %v6646_v62 = vadd.f32 %v6607_v57, %v6497_v38  ;;  %v9082_v41 = vpop.f32.mrf.mxu0 }
 0x3f6   : > { %v6468_v26 = vpop.f32.mrf.mxu1 }
 0x3f7   : > { %v6499_v25 = vadd.f32 %v6468_v26, %v6351_v51  ;;  %v6649_v24 = vadd.f32 %v11287_v0, %v6500_v31 }
 0x3f8   : > { %v9034_v45 = vpop.f32.mrf.mxu1 }
 0x3f9   : > { %v6502_v55 = vadd.f32 %v9034_v45, %v6354_v46  ;;  %v6648_v56 = vadd.f32 %v11289_v30, %v6499_v25  ;;  %v11638_v45 = vld [vmem:[#allocation53_spill] sm:$0xff] }
 0x3fa   : > { %v6478_v15 = vpop.f32.mrf.mxu1  ;;  %v11639_v30 = vld [vmem:[#allocation50_spill] sm:$0xff] }
 0x3fb   : > { %v6501_v57 = vadd.f32 %v6478_v15, %v6353_v40  ;;  %v6651_v32 = vadd.f32 %v11637_v47, %v6502_v55 }
 0x3fc   : > { %v9037_v44 = vpop.f32.mrf.mxu1 }
 0x3fd   : > { %v6504_v49 = vadd.f32 %v9037_v44, %v6356_v1  ;;  %v6650_v33 = vadd.f32 %v11638_v45, %v6501_v57  ;;  %v6923_v44 = vpop.f32.mrf.mxu0 }
 0x3fe   : > { %v6488_v61 = vpop.f32.mrf.mxu1 }
 0x3ff   : > { %v6503_v22 = vadd.f32 %v6488_v61, %v6355_v39  ;;  %v6653_v15 = vadd.f32 %v11640_v59, %v6504_v49 }
 0x400   : > { %v9060_v29 = vpop.f32.mrf.mxu1 }
 0x401   : > { %v6795_v12 = vadd.f32 %v9060_v29, %v6647_v35  ;;  %v6652_v8 = vadd.f32 %v11297_v53, %v6503_v22 }
 0x402   : > { %v6755_v6 = vpop.f32.mrf.mxu1 }
 0x403   : > { %v6943_v21 = vadd.f32 %v9076_v52, %v6795_v12  ;;  %v6794_v54 = vadd.f32 %v6755_v6, %v6646_v62  ;;  %v9085_v12 = vpop.f32.mrf.mxu0 }
 0x404   : > { %v9063_v20 = vpop.f32.mrf.mxu1 }
 0x405   : > { %v6958_v13 = vadd.f32 %v11305_v19, %v6943_v21  ;;  %v6942_v3 = vadd.f32 %v6903_v37, %v6794_v54  ;;  %v6797_v27 = vadd.f32 %v9063_v20, %v6649_v24  ;;  %v6933_v49 = vpop.f32.mrf.mxu0 }
 0x406   : > { %v6765_v50 = vpop.f32.mrf.mxu1 }
 0x407   : > { %v6966_v0 = vmax.f32 %v6958_v13, 0.0  ;;  %v6957_v23 = vadd.f32 %v11305_v19, %v6942_v3  ;;  %v6945_v4 = vadd.f32 %v9079_v36, %v6797_v27  ;;  %v6796_v63 = vadd.f32 %v6765_v50, %v6648_v56 }
 0x408   : > { %v9066_v26 = vpop.f32.mrf.mxu1 }
 0x409   : > { %v6998_v5 = vcombine.high %v6966_v0, %v6966_v0  ;;  %v7005_v60 = vrot.slane %v6966_v0, %v11639_v30  ;;  %v6965_v16 = vmax.f32 %v6957_v23, 0.0  ;;  %v6960_v52 = vadd.f32 %v11305_v19, %v6945_v4 }
 0x40a   : > { %v6944_v18 = vadd.f32 %v6913_v58, %v6796_v63  ;;  %v6799_v48 = vadd.f32 %v9066_v26, %v6651_v32  ;;  %v6775_v37 = vpop.f32.mrf.mxu1 }
 0x40b   : > { %v11320_v10 = vrot.slane %v6998_v5, %v11639_v30  ;;  %v11322_v28 = vcombine.high %v7005_v60, %v7005_v60  ;;  %v8065_v11 = vrot.slane %v7005_v60, 9  ;;  %v6981_v7 = vcombine.high %v6965_v16, %v6965_v16 }
 0x40c   : > { %v6988_v2 = vrot.slane %v6965_v16, %v11639_v30  ;;  %v6968_v38 = vmax.f32 %v6960_v52, 0.0  ;;  %v6959_v34 = vadd.f32 %v11305_v19, %v6944_v18  ;;  %v6947_v14 = vadd.f32 %v9082_v41, %v6799_v48  ;;  %v9069_v43 = vpop.f32.mrf.mxu1 }
 0x40d   : > { %v11328_v53 = vcombine.high %v11320_v10, %v11320_v10  ;;  %v8066_v17 = vrot.slane %v11322_v28, 9  ;;  %v8067_v61 = vrot.slane %v11320_v10, 9  ;;  %v11332_v51 = vmax.f32 %v7005_v60, %v8065_v11 }
 0x40e   : > { %v11335_v35 = vrot.slane %v6981_v7, %v11639_v30  ;;  %v11337_v31 = vcombine.high %v6988_v2, %v6988_v2  ;;  %v8061_v36 = vrot.slane %v6988_v2, 9  ;;  %v7032_v9 = vcombine.high %v6968_v38, %v6968_v38  ;;  %v6785_v46 = vpop.f32.mrf.mxu1 }
 0x40f   : > { %v11340_v42 = vrot.slane %v6968_v38, %v11639_v30  ;;  %v6967_v29 = vmax.f32 %v6959_v34, 0.0  ;;  %v6962_v62 = vadd.f32 %v11305_v19, %v6947_v14  ;;  %v6798_v25 = vadd.f32 %v6775_v37, %v6650_v33 }
 0x410   : > { %v11345_v40 = vcombine.high %v11335_v35, %v11335_v35  ;;  %v8062_v6 = vrot.slane %v11337_v31, 9  ;;  %v8063_v24 = vrot.slane %v11335_v35, 9  ;;  %v11349_v21 = vmax.f32 %v6988_v2, %v8061_v36 }
 0x411   : > { %v11352_v54 = vrot.slane %v7032_v9, %v11639_v30  ;;  %v7015_v58 = vcombine.high %v6967_v29, %v6967_v29  ;;  %v7022_v1 = vrot.slane %v6967_v29, %v11639_v30  ;;  %v6970_v39 = vmax.f32 %v6962_v62, 0.0 }
 0x412   : > { %v6946_v55 = vadd.f32 %v6923_v44, %v6798_v25  ;;  %v6801_v57 = vadd.f32 %v9069_v43, %v6653_v15  ;;  %v6800_v20 = vadd.f32 %v6785_v46, %v6652_v8  ;;  %v7047_v56 = vcombine.high %v11340_v42, %v11340_v42 }
 0x413   : > { %v7029_v13 = vrot.slane %v7015_v58, %v11639_v30  ;;  %v7066_v3 = vcombine.high %v6970_v39, %v6970_v39  ;;  %v7073_v27 = vrot.slane %v6970_v39, %v11639_v30  ;;  %v7030_v22 = vcombine.high %v7022_v1, %v7022_v1 }
 0x414   : > { %v6961_v50 = vadd.f32 %v11305_v19, %v6946_v55  ;;  %v6949_v0 = vadd.f32 %v9085_v12, %v6801_v57  ;;  %v6948_v23 = vadd.f32 %v6933_v49, %v6800_v20  ;;  %v7048_v4 = vcombine.high %v11352_v54, %v11352_v54 }
 0x415   : > { %v11363_v63 = vrot.slane %v7066_v3, %v11639_v30  ;;  %v11365_v41 = vcombine.high %v7073_v27, %v7073_v27  ;;  %v8081_v47 = vrot.slane %v7073_v27, 9  ;;  %v7031_v32 = vcombine.high %v7029_v13, %v7029_v13 }
 0x416   : > { %v6969_v45 = vmax.f32 %v6961_v50, 0.0  ;;  %v6964_v33 = vadd.f32 %v11305_v19, %v6949_v0  ;;  %v6963_v26 = vadd.f32 %v11305_v19, %v6948_v23  ;;  %v8064_v5 = vrot.slane %v11345_v40, 9 }
 0x417   : > { %v11372_v60 = vcombine.high %v11363_v63, %v11363_v63  ;;  %v8082_v16 = vrot.slane %v11365_v41, 9  ;;  %v8083_v52 = vrot.slane %v11363_v63, 9  ;;  %v11376_v59 = vmax.f32 %v7073_v27, %v8081_v47 }
 0x418   : > { %v7049_v15 = vcombine.high %v6969_v45, %v6969_v45  ;;  %v7056_v8 = vrot.slane %v6969_v45, %v11639_v30  ;;  %v6972_v18 = vmax.f32 %v6964_v33, 0.0  ;;  %v6971_v48 = vmax.f32 %v6963_v26, 0.0 }
 0x419   : > { %v8068_v37 = vrot.slane %v11328_v53, 9  ;;  %v8069_v19 = vrot.slane %v7022_v1, 9  ;;  %v8070_v11 = vrot.slane %v7030_v22, 9  ;;  %v8071_v7 = vrot.slane %v7029_v13, 9 }
 0x41a   : > { %v11381_v44 = vrot.slane %v7049_v15, %v11639_v30  ;;  %v11383_v2 = vcombine.high %v7056_v8, %v7056_v8  ;;  %v8077_v38 = vrot.slane %v7056_v8, 9  ;;  %v7100_v34 = vcombine.high %v6972_v18, %v6972_v18 }
 0x41b   : > { %v11386_v14 = vrot.slane %v6972_v18, %v11639_v30  ;;  %v7083_v43 = vcombine.high %v6971_v48, %v6971_v48  ;;  %v11389_v36 = vrot.slane %v6971_v48, %v11639_v30  ;;  %v8072_v9 = vrot.slane %v7031_v32, 9 }
 0x41c   : > { %v7065_v29 = vcombine.high %v11381_v44, %v11381_v44  ;;  %v8078_v62 = vrot.slane %v11383_v2, 9  ;;  %v8079_v25 = vrot.slane %v11381_v44, 9  ;;  %v11395_v12 = vmax.f32 %v7056_v8, %v8077_v38 }
 0x41d   : > { %v11398_v46 = vrot.slane %v7100_v34, %v11639_v30  ;;  %v8089_v58 = vrot.slane %v11386_v14, 9  ;;  %v11402_v39 = vrot.slane %v7083_v43, %v11639_v30  ;;  %v8085_v55 = vrot.slane %v11389_v36, 9 }
 0x41e   : > { %v8073_v57 = vrot.slane %v11340_v42, 9  ;;  %v8074_v20 = vrot.slane %v7047_v56, 9  ;;  %v8075_v3 = vrot.slane %v11352_v54, 9  ;;  %v8076_v27 = vrot.slane %v7048_v4, 9 }
 0x41f   : > { %v7246_v49 = vmax.f32 %v11337_v31, %v8062_v6  ;;  %v7247_v50 = vmax.f32 %v11335_v35, %v8063_v24  ;;  %v7248_v0 = vmax.f32 %v11345_v40, %v8064_v5  ;;  %v7250_v23 = vmax.f32 %v11322_v28, %v8066_v17 }
 0x420   : > { %v7251_v30 = vmax.f32 %v11320_v10, %v8067_v61  ;;  %v7252_v47 = vmax.f32 %v11328_v53, %v8068_v37  ;;  %v7253_v45 = vmax.f32 %v7022_v1, %v8069_v19  ;;  %v7254_v33 = vmax.f32 %v7030_v22, %v8070_v11  ;;  %v11641_v1 = vld [vmem:[#allocation51_spill] sm:$0xff] }
 0x421   : > { %v7255_v26 = vmax.f32 %v7029_v13, %v8071_v7  ;;  %v7256_v15 = vmax.f32 %v7031_v32, %v8072_v9  ;;  %v7257_v31 = vmax.f32 %v11340_v42, %v8073_v57  ;;  %v7258_v6 = vmax.f32 %v7047_v56, %v8074_v20 }
 0x422   : > { %v7259_v35 = vmax.f32 %v11352_v54, %v8075_v3  ;;  %v7260_v40 = vmax.f32 %v7048_v4, %v8076_v27  ;;  %v7277_v24 = vmax.f32 %v11349_v21, %v11332_v51  ;;  %v7278_v28 = vmax.f32 %v7246_v49, %v7250_v23 }
 0x423   : > { %v7279_v17 = vmax.f32 %v7247_v50, %v7251_v30  ;;  %v7280_v5 = vmax.f32 %v7248_v0, %v7252_v47  ;;  %v7281_v8 = vmax.f32 %v7253_v45, %v7257_v31  ;;  %v7282_v10 = vmax.f32 %v7254_v33, %v7258_v6 }
 0x424   : > { %v7283_v61 = vmax.f32 %v7255_v26, %v7259_v35  ;;  %v7284_v53 = vmax.f32 %v7256_v15, %v7260_v40  ;;  %v7312_v22 = vrot.slane %v7277_v24, %v11641_v1  ;;  %v7316_v13 = vrot.slane %v7278_v28, %v11641_v1 }
 0x425   : > { %v7320_v42 = vrot.slane %v7279_v17, %v11641_v1  ;;  %v7324_v56 = vrot.slane %v7280_v5, %v11641_v1  ;;  %v7328_v54 = vrot.slane %v7281_v8, %v11641_v1  ;;  %v7332_v4 = vrot.slane %v7282_v10, %v11641_v1 }
 0x426   : > { %v7336_v51 = vrot.slane %v7283_v61, %v11641_v1  ;;  %v7340_v21 = vrot.slane %v7284_v53, %v11641_v1  ;;  %v7374_v32 = vsel %vm5509_vm4, %v7316_v13, %v7312_v22  ;;  %v7098_v18 = vcombine.high %v11389_v36, %v11389_v36 }
 0x427   : > { %v7376_v48 = vsel %vm5511_vm5, %v7320_v42, %v7374_v32  ;;  %v7099_v37 = vcombine.high %v11402_v39, %v11402_v39  ;;  %v7115_v19 = vcombine.high %v11386_v14, %v11386_v14  ;;  %v7116_v11 = vcombine.high %v11398_v46, %v11398_v46 }
 0x428   : > { %v7378_v7 = vsel %vm5513_vm6, %v7324_v56, %v7376_v48  ;;  %v8080_v38 = vrot.slane %v7065_v29, 9  ;;  %v8084_v34 = vrot.slane %v11372_v60, 9  ;;  %v8086_v43 = vrot.slane %v7098_v18, 9 }
 0x429   : > { %v7380_v9 = vsel %vm5515_vm7, %v7328_v54, %v7378_v7  ;;  %v8087_v57 = vrot.slane %v11402_v39, 9  ;;  %v8088_v20 = vrot.slane %v7099_v37, 9  ;;  %v8090_v3 = vrot.slane %v7115_v19, 9 }
 0x42a   : > { %v7382_v27 = vsel %vm5517_vm8, %v7332_v4, %v7380_v9  ;;  %v8091_v49 = vrot.slane %v11398_v46, 9  ;;  %v8092_v50 = vrot.slane %v7116_v11, 9  ;;  %v7262_v0 = vmax.f32 %v11383_v2, %v8078_v62 }
 0x42b   : > { %v7384_v23 = vsel %vm5519_vm9, %v7336_v51, %v7382_v27  ;;  %v7263_v30 = vmax.f32 %v11381_v44, %v8079_v25  ;;  %v7264_v47 = vmax.f32 %v7065_v29, %v8080_v38  ;;  %v7266_v45 = vmax.f32 %v11365_v41, %v8082_v16 }
 0x42c   : > { %v7386_v33 = vsel %vm5521_vm10, %v7340_v21, %v7384_v23  ;;  %v7267_v26 = vmax.f32 %v11363_v63, %v8083_v52  ;;  %v7268_v15 = vmax.f32 %v11372_v60, %v8084_v34  ;;  %v7269_v31 = vmax.f32 %v11389_v36, %v8085_v55 }
 0x42d   : > { %7396 = vxpose.xlu0.b32.start [1/2] (short) (narrow) %v7386_v33, 32  ;;  %v7270_v2 = vmax.f32 %v7098_v18, %v8086_v43  ;;  %v7271_v62 = vmax.f32 %v11402_v39, %v8087_v57  ;;  %v7272_v44 = vmax.f32 %v7099_v37, %v8088_v20  ;;  %v7273_v29 = vmax.f32 %v11386_v14, %v8089_v58 }
 0x42e   : > { %v7274_v41 = vmax.f32 %v7115_v19, %v8090_v3  ;;  %v7275_v16 = vmax.f32 %v11398_v46, %v8091_v49  ;;  %v7276_v25 = vmax.f32 %v7116_v11, %v8092_v50  ;;  %v7285_v63 = vmax.f32 %v11395_v12, %v11376_v59 }
 0x42f   : > { %v7286_v52 = vmax.f32 %v7262_v0, %v7266_v45  ;;  %v7287_v60 = vmax.f32 %v7263_v30, %v7267_v26  ;;  %v7288_v6 = vmax.f32 %v7264_v47, %v7268_v15  ;;  %v7289_v36 = vmax.f32 %v7269_v31, %v7273_v29 }
 0x430   : > { %v7290_v55 = vmax.f32 %v7270_v2, %v7274_v41  ;;  %v7291_v35 = vmax.f32 %v7271_v62, %v7275_v16  ;;  %v7292_v40 = vmax.f32 %v7272_v44, %v7276_v25  ;;  %v7344_v39 = vrot.slane %v7285_v63, %v11641_v1 }
 0x431   : > { %v7348_v24 = vrot.slane %v7286_v52, %v11641_v1  ;;  %v7352_v14 = vrot.slane %v7287_v60, %v11641_v1  ;;  %v7356_v58 = vrot.slane %v7288_v6, %v11641_v1  ;;  %v7360_v46 = vrot.slane %v7289_v36, %v11641_v1 }
 0x432   : > { %v7364_v59 = vrot.slane %v7290_v55, %v11641_v1  ;;  %v7368_v28 = vrot.slane %v7291_v35, %v11641_v1  ;;  %v7372_v5 = vrot.slane %v7292_v40, %v11641_v1 }
 0x433   : > { %v7387_v12 = vsel %vm5509_vm4, %v7348_v24, %v7344_v39 }
 0x434   : > { %v7388_v17 = vsel %vm5511_vm5, %v7352_v14, %v7387_v12 }
 0x435   : > { %v7389_v8 = vsel %vm5513_vm6, %v7356_v58, %v7388_v17 }
 0x436   : > { %v7390_v10 = vsel %vm5515_vm7, %v7360_v46, %v7389_v8 }
 0x437   : > { %v7391_v61 = vsel %vm5517_vm8, %v7364_v59, %v7390_v10 }
 0x438   : > { %v7392_v53 = vsel %vm5519_vm9, %v7368_v28, %v7391_v61 }
 0x439   : > { %v7393_v22 = vsel %vm5521_vm10, %v7372_v5, %v7392_v53 }
 0x43a   : > { %7397 = vxpose.xlu0.b32.end [2/2] (short) (narrow) %v7393_v22, 32 }
 0x4b2   : > { %v7412_v13 = vpop.trf.xlu0 }
 0x4b3   : > { %v8101_v42 = vpack.c.bf16 %v7412_v13, %v7412_v13 }
 0x4b5   : > { %7445 = vst.msk [vmem:[%s9405_s7] sm:$0xf] %vm7444_vm14, %v8101_v42 }
 0x4b6   : > { %v7413_v56 = vpop.trf.xlu0 }
 0x4b7   : > { %v8102_v54 = vpack.c.bf16 %v7413_v56, %v7413_v56 }
 0x4b9   : > { %7446 = vst.msk [vmem:[%s9405_s7 + $0x4] sm:$0xf] %vm7444_vm14, %v8102_v54 }
 0x4ba   : > { %v7414_v1 = vpop.trf.xlu0 }
 0x4bb   : > { %v8103_v4 = vpack.c.bf16 %v7414_v1, %v7414_v1 }
 0x4bd   : > { %7447 = vst.msk [vmem:[%s9405_s7 + $0x8] sm:$0xf] %vm7444_vm14, %v8103_v4 }
 0x4be   : > { %v7415_v51 = vpop.trf.xlu0 }
 0x4bf   : > { %v8104_v21 = vpack.c.bf16 %v7415_v51, %v7415_v51 }
 0x4c1   : > { %7448 = vst.msk [vmem:[%s9405_s7 + $0xc] sm:$0xf] %vm7444_vm14, %v8104_v21 }
 0x4c2 PF: > { %s18_s18 = sadd.s32 1, %s9267_s18  }
 0x4c3   : > { %p15_p2 = scmp.ge.s32.totalorder %s18_s18, 4  }
 0x4c5   :  { %17 = sbr.rel (!%p15_p2) target bundleno = 3 (0x3), region = 111 }
 0x4ca   :  { %7470 = vsyncpa [#allocation4], 1 }
 0x4cb   :  { %7472 = vsyncpa [#allocation4 + $0x1], 1 }
 0x4cc   :  { %7473 = vsyncpa [#allocation6], 1 }
 0x4cd   :  { %7474 = vsyncpa [#allocation9], 1 }

</bundles_post_ra>
